<compile_context>
chip_gen: v7x
topology: tpu7x:2x2x1
jax: 0.10.0
libtpu: 0.0.40
codegen_flags: <defaults>
</compile_context>

<pallas_src>
import numpy as np
import jax
import jax.numpy as jnp
from jax import lax
from jax.experimental import pallas as pl
from jax.experimental.pallas import tpu as pltpu

LANE = 128
SUBLANE = 8


# ----------------------------------------------------------------------------
# padding / layout helpers (wrapper-side glue)
# ----------------------------------------------------------------------------
def _ceil_to(n, m):
    return ((n + m - 1) // m) * m


def _pad_axis(x, axis, target):
    pad = target - x.shape[axis]
    if pad == 0:
        return x
    widths = [(0, 0)] * x.ndim
    widths[axis] = (0, pad)
    return jnp.pad(x, widths)


def _pad2(x, rows, cols):
    return jnp.pad(x, ((0, rows - x.shape[0]), (0, cols - x.shape[1])))


def _pick_row_tile(n):
    # largest sublane-aligned divisor of n that still gives >=2 grid steps
    for t in (256, 128, 64, 32, 16, 8):
        if n % t == 0 and n // t >= 2:
            return t
    for t in (256, 128, 64, 32, 16, 8):
        if n % t == 0:
            return t
    return n


# ----------------------------------------------------------------------------
# Kernel 1: encoder GRU + tanh(en2de) + decoder GRU.
# Gate weights are fused [r|z|n]; input projections are hoisted into one big
# matmul; hidden state lives in the fori_loop carry (vregs).
# ----------------------------------------------------------------------------
def rnn_kernel(enc_x_ref, dec_x_ref,
               e_wih_ref, e_whh_ref, e_gb_ref, e_bhn_ref,
               en2de_w_ref, en2de_b_ref,
               d_wih_ref, d_whh_ref, d_gb_ref, d_bhn_ref,
               hs_ref,
               enc_gx, dec_gx):
    T, Bp, _ = enc_x_ref.shape
    Hp = e_whh_ref.shape[0]

    # --- hoisted input-to-hidden projections: one (T*Bp, F) @ (F, 3Hp) each ---
    ex = enc_x_ref[...].reshape(T * Bp, enc_x_ref.shape[2])
    enc_gx[...] = (jnp.dot(ex, e_wih_ref[...],
                           preferred_element_type=jnp.float32)
                   + e_gb_ref[...]).reshape(T, Bp, 3 * Hp)

    dx = dec_x_ref[...].reshape(T * Bp, dec_x_ref.shape[2])
    dec_gx[...] = (jnp.dot(dx, d_wih_ref[...],
                           preferred_element_type=jnp.float32)
                   + d_gb_ref[...]).reshape(T, Bp, 3 * Hp)

    def gru_scan(gx_ref, whh, bhn, h0, hs_out=None):
        # PyTorch gate order r, z, n:
        #   r = sigmoid(x Wir + bi_r + h Whr + bh_r)
        #   z = sigmoid(x Wiz + bi_z + h Whz + bh_z)
        #   n = tanh  (x Win + bi_n + r * (h Whn + bh_n))
        #   h' = (1 - z) * n + z * h
        # gx already contains x W_i* + bi_* (+ bh_r / bh_z folded in).
        def step(t, h):
            pre = gx_ref[t]                                         # (Bp, 3Hp)
            hh = jnp.dot(h, whh, preferred_element_type=jnp.float32)
            r = jax.nn.sigmoid(pre[:, 0:Hp] + hh[:, 0:Hp])
            z = jax.nn.sigmoid(pre[:, Hp:2 * Hp] + hh[:, Hp:2 * Hp])
            n = jnp.tanh(pre[:, 2 * Hp:] + r * (hh[:, 2 * Hp:] + bhn))
            h_new = (1.0 - z) * n + z * h
            if hs_out is not None:
                hs_out[t] = h_new
            return h_new

        return lax.fori_loop(0, T, step, h0, unroll=True)

    # encoder (h0 = 0), only final hidden needed
    h0 = jnp.zeros((Bp, Hp), jnp.float32)
    h_enc = gru_scan(enc_gx, e_whh_ref[...], e_bhn_ref[...], h0)

    # h_t = tanh(en2de(h_last)) -> decoder initial hidden
    h_t = jnp.tanh(jnp.dot(h_enc, en2de_w_ref[...],
                           preferred_element_type=jnp.float32)
                   + en2de_b_ref[...])

    # decoder, per-step hidden states written to hs_ref (lane-dense Hp=128)
    gru_scan(dec_gx, d_whh_ref[...], d_bhn_ref[...], h_t, hs_out=hs_ref)


# ----------------------------------------------------------------------------
# Kernel 2: batched output heads  (T*B, H) @ (H, E) @ (E, V)
# Row-tiled grid marked "parallel" so v7x can shard across TensorCores.
# ----------------------------------------------------------------------------
def head_kernel(h_ref, d2e_w_ref, d2e_b_ref, e2v_w_ref, e2v_b_ref, out_ref):
    e = (jnp.dot(h_ref[...], d2e_w_ref[...],
                 preferred_element_type=jnp.float32) + d2e_b_ref[...])
    out_ref[...] = (jnp.dot(e, e2v_w_ref[...],
                            preferred_element_type=jnp.float32)
                    + e2v_b_ref[...])


# ----------------------------------------------------------------------------
# wrapper: embedding gathers + padding/fusion glue + two pallas_calls
# ----------------------------------------------------------------------------
def autoencoder_forward(inp, pos1, pos2, params):
    # embedding lookups (plain-JAX gather glue)
    word = params["word_emb"][inp]                        # (B, T, E)
    p1 = params["pos1_emb"][pos1]                         # (B, T, dWPE)
    p2 = params["pos2_emb"][pos2]                         # (B, T, dWPE)
    enc_in = jnp.concatenate([word, p1, p2], axis=2).astype(jnp.float32)
    trg = params["tgt_emb"][inp].astype(jnp.float32)      # (B, T, E)

    B, T = inp.shape
    H = params["en2de_w"].shape[0]
    E = params["d2e_w"].shape[1]
    V = params["e2v_w"].shape[1]
    Ee = enc_in.shape[2]

    Hp = _ceil_to(H, LANE)
    Ep = _ceil_to(E, LANE)
    Vp = _ceil_to(V, LANE)
    Eep = _ceil_to(Ee, LANE)
    Bp = _ceil_to(B, SUBLANE)

    # time-major, sublane/lane padded sequences
    enc_x = _pad_axis(_pad_axis(jnp.transpose(enc_in, (1, 0, 2)), 1, Bp), 2, Eep)
    dec_x = _pad_axis(_pad_axis(jnp.transpose(trg, (1, 0, 2)), 1, Bp), 2, Ep)

    # gate-fused, lane-padded weights ([r|z|n] along the output axis)
    def fuse_ih(wr, wz, wn, in_pad):
        return jnp.concatenate(
            [_pad2(wr, in_pad, Hp), _pad2(wz, in_pad, Hp), _pad2(wn, in_pad, Hp)],
            axis=1)

    def fuse_bias(b6):  # rows: [bi_r, bi_z, bi_n, bh_r, bh_z, bh_n]
        gb = jnp.concatenate(
            [_pad2(b6[0:1] + b6[3:4], 1, Hp),   # bi_r + bh_r
             _pad2(b6[1:2] + b6[4:5], 1, Hp),   # bi_z + bh_z
             _pad2(b6[2:3], 1, Hp)],            # bi_n
            axis=1)                             # (1, 3Hp)
        bhn = _pad2(b6[5:6], 1, Hp)             # (1, Hp), stays inside r*(...)
        return gb, bhn

    e_wih = fuse_ih(params["e_wir"], params["e_wiz"], params["e_win"], Eep)
    e_whh = fuse_ih(params["e_whr"], params["e_whz"], params["e_whn"], Hp)
    e_gb, e_bhn = fuse_bias(params["e_b"])

    d_wih = fuse_ih(params["d_wir"], params["d_wiz"], params["d_win"], Ep)
    d_whh = fuse_ih(params["d_whr"], params["d_whz"], params["d_whn"], Hp)
    d_gb, d_bhn = fuse_bias(params["d_b"])

    en2de_w = _pad2(params["en2de_w"], Hp, Hp)
    en2de_b = _pad2(params["en2de_b"], 1, Hp)
    d2e_w = _pad2(params["d2e_w"], Hp, Ep)
    d2e_b = _pad2(params["d2e_b"], 1, Ep)
    e2v_w = _pad2(params["e2v_w"], Ep, Vp)
    e2v_b = _pad2(params["e2v_b"], 1, Vp)

    # ---- kernel 1: the sequential RNN part (everything VMEM-resident) ----
    hs = pl.pallas_call(
        rnn_kernel,
        out_shape=jax.ShapeDtypeStruct((T, Bp, Hp), jnp.float32),
        in_specs=[pl.BlockSpec(memory_space=pltpu.MemorySpace.VMEM)] * 12,
        out_specs=pl.BlockSpec(memory_space=pltpu.MemorySpace.VMEM),
        scratch_shapes=[
            pltpu.VMEM((T, Bp, 3 * Hp), jnp.float32),   # encoder gate-x precompute
            pltpu.VMEM((T, Bp, 3 * Hp), jnp.float32),   # decoder gate-x precompute
        ],
    )(enc_x, dec_x,
      e_wih, e_whh, e_gb, e_bhn,
      en2de_w, en2de_b,
      d_wih, d_whh, d_gb, d_bhn)

    # ---- kernel 2: batched heads with a parallel row grid ----
    rows = T * Bp
    h_flat = hs.reshape(rows, Hp)
    row_tile = _pick_row_tile(rows)
    grid = (rows // row_tile,)

    out_flat = pl.pallas_call(
        head_kernel,
        out_shape=jax.ShapeDtypeStruct((rows, Vp), jnp.float32),
        grid=grid,
        in_specs=[
            pl.BlockSpec((row_tile, Hp), lambda i: (i, 0)),
            pl.BlockSpec((Hp, Ep), lambda i: (0, 0)),
            pl.BlockSpec((1, Ep), lambda i: (0, 0)),
            pl.BlockSpec((Ep, Vp), lambda i: (0, 0)),
            pl.BlockSpec((1, Vp), lambda i: (0, 0)),
        ],
        out_specs=pl.BlockSpec((row_tile, Vp), lambda i: (i, 0)),
        compiler_params=pltpu.CompilerParams(
            dimension_semantics=("parallel",)),
    )(h_flat, d2e_w, d2e_b, e2v_w, e2v_b)

    out = out_flat.reshape(T, Bp, Vp)[:, :B, :V]          # strip padding
    return jnp.transpose(out, (1, 0, 2))                  # (B, T, V)


# ----------------------------------------------------------------------------
# pure-JAX reference (unfused, PyTorch gate order r, z, n) for verification
# ----------------------------------------------------------------------------
def _gru_cell_ref(x, h, wir, wiz, win, whr, whz, whn, b):
    r = jax.nn.sigmoid(x @ wir + b[0:1] + h @ whr + b[3:4])
    z = jax.nn.sigmoid(x @ wiz + b[1:2] + h @ whz + b[4:5])
    n = jnp.tanh(x @ win + b[2:3] + r * (h @ whn + b[5:6]))
    return (1.0 - z) * n + z * h


def reference_forward(inp, pos1, pos2, p):
    word = p["word_emb"][inp]
    p1 = p["pos1_emb"][pos1]
    p2 = p["pos2_emb"][pos2]
    enc_in = jnp.concatenate([word, p1, p2], axis=2)
    trg = p["tgt_emb"][inp]

    B = inp.shape[0]
    H = p["en2de_w"].shape[0]

    xs = jnp.transpose(enc_in, (1, 0, 2)).astype(jnp.float32)

    def enc_step(h, x):
        h = _gru_cell_ref(x, h, p["e_wir"], p["e_wiz"], p["e_win"],
                          p["e_whr"], p["e_whz"], p["e_whn"], p["e_b"])
        return h, None

    h_last, _ = lax.scan(enc_step, jnp.zeros((B, H), jnp.float32), xs)
    h_t = jnp.tanh(h_last @ p["en2de_w"] + p["en2de_b"])

    ds = jnp.transpose(trg, (1, 0, 2)).astype(jnp.float32)

    def dec_step(h, x):
        h = _gru_cell_ref(x, h, p["d_wir"], p["d_wiz"], p["d_win"],
                          p["d_whr"], p["d_whz"], p["d_whn"], p["d_b"])
        return h, h

    _, hs = lax.scan(dec_step, h_t, ds)                    # (T, B, H)
    e = hs @ p["d2e_w"] + p["d2e_b"]
    logits = e @ p["e2v_w"] + p["e2v_b"]
    return jnp.transpose(logits, (1, 0, 2))


# ----------------------------------------------------------------------------
# deterministic parameter init (shapes per the PyTorch __init__; biases = 0)
# ----------------------------------------------------------------------------
def init_params(key, vocab_size, emb_dim, dim_wpe, max_pos, hidden_dim):
    ee = emb_dim + 2 * dim_wpe  # encoder GRU input size

    def w(k, shape, scale=0.1):
        return (scale * jax.random.normal(k, shape, jnp.float32)).astype(jnp.float32)

    ks = iter(jax.random.split(key, 32))
    word_emb = w(next(ks), (vocab_size, emb_dim))
    return {
        # embeddings (tgt_emb copies the same `emb` matrix as word_emb)
        "word_emb": word_emb,
        "tgt_emb": word_emb,
        "pos1_emb": w(next(ks), (max_pos, dim_wpe)),
        "pos2_emb": w(next(ks), (max_pos, dim_wpe)),
        # encoder GRU (input size ee)
        "e_wir": w(next(ks), (ee, hidden_dim)),
        "e_wiz": w(next(ks), (ee, hidden_dim)),
        "e_win": w(next(ks), (ee, hidden_dim)),
        "e_whr": w(next(ks), (hidden_dim, hidden_dim)),
        "e_whz": w(next(ks), (hidden_dim, hidden_dim)),
        "e_whn": w(next(ks), (hidden_dim, hidden_dim)),
        "e_b": jnp.zeros((6, hidden_dim), jnp.float32),
        # en2de linear
        "en2de_w": w(next(ks), (hidden_dim, hidden_dim)),
        "en2de_b": jnp.zeros((1, hidden_dim), jnp.float32),
        # decoder GRU (input size emb_dim)
        "d_wir": w(next(ks), (emb_dim, hidden_dim)),
        "d_wiz": w(next(ks), (emb_dim, hidden_dim)),
        "d_win": w(next(ks), (emb_dim, hidden_dim)),
        "d_whr": w(next(ks), (hidden_dim, hidden_dim)),
        "d_whz": w(next(ks), (hidden_dim, hidden_dim)),
        "d_whn": w(next(ks), (hidden_dim, hidden_dim)),
        "d_b": jnp.zeros((6, hidden_dim), jnp.float32),
        # output heads
        "d2e_w": w(next(ks), (hidden_dim, emb_dim)),
        "d2e_b": jnp.zeros((1, emb_dim), jnp.float32),
        "e2v_w": w(next(ks), (emb_dim, vocab_size)),
        "e2v_b": jnp.zeros((1, vocab_size), jnp.float32),
    }


if __name__ == "__main__":
    VOCAB, EMB_DIM, DIM_WPE, MAX_POS, HIDDEN = 64, 16, 4, 32, 32
    NLAYERS = 1  # required by h_t.view(nlayers, B, H) in the reference module
    B, T = 4, 8

    root = jax.random.PRNGKey(0)
    k_params, k_inp, k_p1, k_p2 = jax.random.split(root, 4)

    params = init_params(k_params, VOCAB, EMB_DIM, DIM_WPE, MAX_POS, HIDDEN)

    inp = jax.random.randint(k_inp, (B, T), 0, VOCAB, dtype=jnp.int32)
    pos1 = jax.random.randint(k_p1, (B, T), 0, MAX_POS, dtype=jnp.int32)
    pos2 = jax.random.randint(k_p2, (B, T), 0, MAX_POS, dtype=jnp.int32)

    out = autoencoder_forward(inp, pos1, pos2, params)
    out = jax.block_until_ready(out)
    assert out.shape == (B, T, VOCAB), out.shape

    ref = jax.block_until_ready(reference_forward(inp, pos1, pos2, params))
    np.testing.assert_allclose(np.asarray(out), np.asarray(ref),
                               rtol=1e-4, atol=1e-4)

    print("KERNEL_OK")
</pallas_src>

<mosaic_0001>
module attributes {stable_mosaic.version = 11 : i64} {
  func.func @rnn_kernel(%arg0: memref<8x8x128xf32, #tpu.memory_space<vmem>>, %arg1: memref<8x8x128xf32, #tpu.memory_space<vmem>>, %arg2: memref<128x384xf32, #tpu.memory_space<vmem>>, %arg3: memref<128x384xf32, #tpu.memory_space<vmem>>, %arg4: memref<1x384xf32, #tpu.memory_space<vmem>>, %arg5: memref<1x128xf32, #tpu.memory_space<vmem>>, %arg6: memref<128x128xf32, #tpu.memory_space<vmem>>, %arg7: memref<1x128xf32, #tpu.memory_space<vmem>>, %arg8: memref<128x384xf32, #tpu.memory_space<vmem>>, %arg9: memref<128x384xf32, #tpu.memory_space<vmem>>, %arg10: memref<1x384xf32, #tpu.memory_space<vmem>>, %arg11: memref<1x128xf32, #tpu.memory_space<vmem>>, %arg12: memref<8x8x128xf32, #tpu.memory_space<vmem>>, %arg13: memref<8x8x384xf32, #tpu.memory_space<vmem>>, %arg14: memref<8x8x384xf32, #tpu.memory_space<vmem>>) attributes {dimension_semantics = [], scalar_prefetch = 0 : i64, scratch_operands = 2 : i64, tpu.core_type = #tpu.core_type<tc>} {
    %c0 = arith.constant 0 : index
    %c0_0 = arith.constant 0 : index
    %c0_1 = arith.constant 0 : index
    %0 = vector.load %arg0[%c0, %c0_0, %c0_1] : memref<8x8x128xf32, #tpu.memory_space<vmem>>, vector<8x8x128xf32>
    %1 = vector.shape_cast %0 : vector<8x8x128xf32> to vector<64x128xf32>
    %c0_2 = arith.constant 0 : index
    %c0_3 = arith.constant 0 : index
    %2 = vector.load %arg2[%c0_2, %c0_3] : memref<128x384xf32, #tpu.memory_space<vmem>>, vector<128x384xf32>
    %cst = arith.constant dense<0.000000e+00> : vector<64x384xf32>
    %3 = tpu.matmul %1, %2, %cst {dimension_numbers = #tpu.dot_dimension_numbers<[1], [0], [0], [1], [0, 0, 1, 1], [], []>} : vector<64x128xf32>, vector<128x384xf32>, vector<64x384xf32> -> vector<64x384xf32>
    %c0_4 = arith.constant 0 : index
    %c0_5 = arith.constant 0 : index
    %4 = vector.load %arg4[%c0_4, %c0_5] : memref<1x384xf32, #tpu.memory_space<vmem>>, vector<1x384xf32>
    %5 = vector.broadcast %4 : vector<1x384xf32> to vector<64x384xf32>
    %6 = arith.addf %3, %5 : vector<64x384xf32>
    %7 = vector.shape_cast %6 : vector<64x384xf32> to vector<8x8x384xf32>
    %c0_6 = arith.constant 0 : index
    %c0_7 = arith.constant 0 : index
    %c0_8 = arith.constant 0 : index
    %8 = vector.load %arg13[%c0_6, %c0_7, %c0_8] : memref<8x8x384xf32, #tpu.memory_space<vmem>>, vector<8x8x384xf32>
    tpu.vector_store %arg13[%c0_6, %c0_7, %c0_8], %7 {strides = array<i32>} : memref<8x8x384xf32, #tpu.memory_space<vmem>>, vector<8x8x384xf32>,
    %c0_9 = arith.constant 0 : index
    %c0_10 = arith.constant 0 : index
    %c0_11 = arith.constant 0 : index
    %9 = vector.load %arg1[%c0_9, %c0_10, %c0_11] : memref<8x8x128xf32, #tpu.memory_space<vmem>>, vector<8x8x128xf32>
    %10 = vector.shape_cast %9 : vector<8x8x128xf32> to vector<64x128xf32>
    %c0_12 = arith.constant 0 : index
    %c0_13 = arith.constant 0 : index
    %11 = vector.load %arg8[%c0_12, %c0_13] : memref<128x384xf32, #tpu.memory_space<vmem>>, vector<128x384xf32>
    %cst_14 = arith.constant dense<0.000000e+00> : vector<64x384xf32>
    %12 = tpu.matmul %10, %11, %cst_14 {dimension_numbers = #tpu.dot_dimension_numbers<[1], [0], [0], [1], [0, 0, 1, 1], [], []>} : vector<64x128xf32>, vector<128x384xf32>, vector<64x384xf32> -> vector<64x384xf32>
    %c0_15 = arith.constant 0 : index
    %c0_16 = arith.constant 0 : index
    %13 = vector.load %arg10[%c0_15, %c0_16] : memref<1x384xf32, #tpu.memory_space<vmem>>, vector<1x384xf32>
    %14 = vector.broadcast %13 : vector<1x384xf32> to vector<64x384xf32>
    %15 = arith.addf %12, %14 : vector<64x384xf32>
    %16 = vector.shape_cast %15 : vector<64x384xf32> to vector<8x8x384xf32>
    %c0_17 = arith.constant 0 : index
    %c0_18 = arith.constant 0 : index
    %c0_19 = arith.constant 0 : index
    %17 = vector.load %arg14[%c0_17, %c0_18, %c0_19] : memref<8x8x384xf32, #tpu.memory_space<vmem>>, vector<8x8x384xf32>
    tpu.vector_store %arg14[%c0_17, %c0_18, %c0_19], %16 {strides = array<i32>} : memref<8x8x384xf32, #tpu.memory_space<vmem>>, vector<8x8x384xf32>,
    %cst_20 = arith.constant 0.000000e+00 : f32
    %18 = vector.broadcast %cst_20 : f32 to vector<8x128xf32>
    %c0_21 = arith.constant 0 : index
    %c0_22 = arith.constant 0 : index
    %19 = vector.load %arg3[%c0_21, %c0_22] : memref<128x384xf32, #tpu.memory_space<vmem>>, vector<128x384xf32>
    %c0_23 = arith.constant 0 : index
    %c0_24 = arith.constant 0 : index
    %20 = vector.load %arg5[%c0_23, %c0_24] : memref<1x128xf32, #tpu.memory_space<vmem>>, vector<1x128xf32>
    %c0_i32 = arith.constant 0 : i32
    %21 = arith.index_cast %c0_i32 : i32 to index
    %c0_25 = arith.constant 0 : index
    %c0_26 = arith.constant 0 : index
    %22 = vector.load %arg13[%21, %c0_25, %c0_26] : memref<8x8x384xf32, #tpu.memory_space<vmem>>, vector<1x8x384xf32>
    %23 = vector.shape_cast %22 : vector<1x8x384xf32> to vector<8x384xf32>
    %cst_27 = arith.constant dense<0.000000e+00> : vector<8x384xf32>
    %24 = tpu.matmul %18, %19, %cst_27 {dimension_numbers = #tpu.dot_dimension_numbers<[1], [0], [0], [1], [0, 0, 1, 1], [], []>} : vector<8x128xf32>, vector<128x384xf32>, vector<8x384xf32> -> vector<8x384xf32>
    %25 = vector.extract_strided_slice %23 {offsets = [0, 0], sizes = [8, 128], strides = [1, 1]} : vector<8x384xf32> to vector<8x128xf32>
    %26 = vector.extract_strided_slice %24 {offsets = [0, 0], sizes = [8, 128], strides = [1, 1]} : vector<8x384xf32> to vector<8x128xf32>
    %27 = arith.addf %25, %26 : vector<8x128xf32>
    %28 = arith.negf %27 : vector<8x128xf32>
    %29 = math.exp %28 : vector<8x128xf32>
    %cst_28 = arith.constant 1.000000e+00 : f32
    %30 = vector.broadcast %cst_28 : f32 to vector<8x128xf32>
    %31 = arith.addf %30, %29 : vector<8x128xf32>
    %32 = arith.divf %30, %31 : vector<8x128xf32>
    %33 = vector.extract_strided_slice %23 {offsets = [0, 128], sizes = [8, 128], strides = [1, 1]} : vector<8x384xf32> to vector<8x128xf32>
    %34 = vector.extract_strided_slice %24 {offsets = [0, 128], sizes = [8, 128], strides = [1, 1]} : vector<8x384xf32> to vector<8x128xf32>
    %35 = arith.addf %33, %34 : vector<8x128xf32>
    %36 = arith.negf %35 : vector<8x128xf32>
    %37 = math.exp %36 : vector<8x128xf32>
    %cst_29 = arith.constant 1.000000e+00 : f32
    %38 = vector.broadcast %cst_29 : f32 to vector<8x128xf32>
    %39 = arith.addf %38, %37 : vector<8x128xf32>
    %40 = arith.divf %38, %39 : vector<8x128xf32>
    %41 = vector.extract_strided_slice %23 {offsets = [0, 256], sizes = [8, 128], strides = [1, 1]} : vector<8x384xf32> to vector<8x128xf32>
    %42 = vector.extract_strided_slice %24 {offsets = [0, 256], sizes = [8, 128], strides = [1, 1]} : vector<8x384xf32> to vector<8x128xf32>
    %43 = vector.broadcast %20 : vector<1x128xf32> to vector<8x128xf32>
    %44 = arith.addf %42, %43 : vector<8x128xf32>
    %45 = arith.mulf %32, %44 : vector<8x128xf32>
    %46 = arith.addf %41, %45 : vector<8x128xf32>
    %47 = math.tanh %46 : vector<8x128xf32>
    %cst_30 = arith.constant 1.000000e+00 : f32
    %48 = vector.broadcast %cst_30 : f32 to vector<8x128xf32>
    %49 = arith.subf %48, %40 : vector<8x128xf32>
    %50 = arith.mulf %49, %47 : vector<8x128xf32>
    %51 = arith.mulf %40, %18 : vector<8x128xf32>
    %52 = arith.addf %50, %51 : vector<8x128xf32>
    %c1_i32 = arith.constant 1 : i32
    %53 = arith.index_cast %c1_i32 : i32 to index
    %c0_31 = arith.constant 0 : index
    %c0_32 = arith.constant 0 : index
    %54 = vector.load %arg13[%53, %c0_31, %c0_32] : memref<8x8x384xf32, #tpu.memory_space<vmem>>, vector<1x8x384xf32>
    %55 = vector.shape_cast %54 : vector<1x8x384xf32> to vector<8x384xf32>
    %cst_33 = arith.constant dense<0.000000e+00> : vector<8x384xf32>
    %56 = tpu.matmul %52, %19, %cst_33 {dimension_numbers = #tpu.dot_dimension_numbers<[1], [0], [0], [1], [0, 0, 1, 1], [], []>} : vector<8x128xf32>, vector<128x384xf32>, vector<8x384xf32> -> vector<8x384xf32>
    %57 = vector.extract_strided_slice %55 {offsets = [0, 0], sizes = [8, 128], strides = [1, 1]} : vector<8x384xf32> to vector<8x128xf32>
    %58 = vector.extract_strided_slice %56 {offsets = [0, 0], sizes = [8, 128], strides = [1, 1]} : vector<8x384xf32> to vector<8x128xf32>
    %59 = arith.addf %57, %58 : vector<8x128xf32>
    %60 = arith.negf %59 : vector<8x128xf32>
    %61 = math.exp %60 : vector<8x128xf32>
    %cst_34 = arith.constant 1.000000e+00 : f32
    %62 = vector.broadcast %cst_34 : f32 to vector<8x128xf32>
    %63 = arith.addf %62, %61 : vector<8x128xf32>
    %64 = arith.divf %62, %63 : vector<8x128xf32>
    %65 = vector.extract_strided_slice %55 {offsets = [0, 128], sizes = [8, 128], strides = [1, 1]} : vector<8x384xf32> to vector<8x128xf32>
    %66 = vector.extract_strided_slice %56 {offsets = [0, 128], sizes = [8, 128], strides = [1, 1]} : vector<8x384xf32> to vector<8x128xf32>
    %67 = arith.addf %65, %66 : vector<8x128xf32>
    %68 = arith.negf %67 : vector<8x128xf32>
    %69 = math.exp %68 : vector<8x128xf32>
    %cst_35 = arith.constant 1.000000e+00 : f32
    %70 = vector.broadcast %cst_35 : f32 to vector<8x128xf32>
    %71 = arith.addf %70, %69 : vector<8x128xf32>
    %72 = arith.divf %70, %71 : vector<8x128xf32>
    %73 = vector.extract_strided_slice %55 {offsets = [0, 256], sizes = [8, 128], strides = [1, 1]} : vector<8x384xf32> to vector<8x128xf32>
    %74 = vector.extract_strided_slice %56 {offsets = [0, 256], sizes = [8, 128], strides = [1, 1]} : vector<8x384xf32> to vector<8x128xf32>
    %75 = vector.broadcast %20 : vector<1x128xf32> to vector<8x128xf32>
    %76 = arith.addf %74, %75 : vector<8x128xf32>
    %77 = arith.mulf %64, %76 : vector<8x128xf32>
    %78 = arith.addf %73, %77 : vector<8x128xf32>
    %79 = math.tanh %78 : vector<8x128xf32>
    %cst_36 = arith.constant 1.000000e+00 : f32
    %80 = vector.broadcast %cst_36 : f32 to vector<8x128xf32>
    %81 = arith.subf %80, %72 : vector<8x128xf32>
    %82 = arith.mulf %81, %79 : vector<8x128xf32>
    %83 = arith.mulf %72, %52 : vector<8x128xf32>
    %84 = arith.addf %82, %83 : vector<8x128xf32>
    %c2_i32 = arith.constant 2 : i32
    %85 = arith.index_cast %c2_i32 : i32 to index
    %c0_37 = arith.constant 0 : index
    %c0_38 = arith.constant 0 : index
    %86 = vector.load %arg13[%85, %c0_37, %c0_38] : memref<8x8x384xf32, #tpu.memory_space<vmem>>, vector<1x8x384xf32>
    %87 = vector.shape_cast %86 : vector<1x8x384xf32> to vector<8x384xf32>
    %cst_39 = arith.constant dense<0.000000e+00> : vector<8x384xf32>
    %88 = tpu.matmul %84, %19, %cst_39 {dimension_numbers = #tpu.dot_dimension_numbers<[1], [0], [0], [1], [0, 0, 1, 1], [], []>} : vector<8x128xf32>, vector<128x384xf32>, vector<8x384xf32> -> vector<8x384xf32>
    %89 = vector.extract_strided_slice %87 {offsets = [0, 0], sizes = [8, 128], strides = [1, 1]} : vector<8x384xf32> to vector<8x128xf32>
    %90 = vector.extract_strided_slice %88 {offsets = [0, 0], sizes = [8, 128], strides = [1, 1]} : vector<8x384xf32> to vector<8x128xf32>
    %91 = arith.addf %89, %90 : vector<8x128xf32>
    %92 = arith.negf %91 : vector<8x128xf32>
    %93 = math.exp %92 : vector<8x128xf32>
    %cst_40 = arith.constant 1.000000e+00 : f32
    %94 = vector.broadcast %cst_40 : f32 to vector<8x128xf32>
    %95 = arith.addf %94, %93 : vector<8x128xf32>
    %96 = arith.divf %94, %95 : vector<8x128xf32>
    %97 = vector.extract_strided_slice %87 {offsets = [0, 128], sizes = [8, 128], strides = [1, 1]} : vector<8x384xf32> to vector<8x128xf32>
    %98 = vector.extract_strided_slice %88 {offsets = [0, 128], sizes = [8, 128], strides = [1, 1]} : vector<8x384xf32> to vector<8x128xf32>
    %99 = arith.addf %97, %98 : vector<8x128xf32>
    %100 = arith.negf %99 : vector<8x128xf32>
    %101 = math.exp %100 : vector<8x128xf32>
    %cst_41 = arith.constant 1.000000e+00 : f32
    %102 = vector.broadcast %cst_41 : f32 to vector<8x128xf32>
    %103 = arith.addf %102, %101 : vector<8x128xf32>
    %104 = arith.divf %102, %103 : vector<8x128xf32>
    %105 = vector.extract_strided_slice %87 {offsets = [0, 256], sizes = [8, 128], strides = [1, 1]} : vector<8x384xf32> to vector<8x128xf32>
    %106 = vector.extract_strided_slice %88 {offsets = [0, 256], sizes = [8, 128], strides = [1, 1]} : vector<8x384xf32> to vector<8x128xf32>
    %107 = vector.broadcast %20 : vector<1x128xf32> to vector<8x128xf32>
    %108 = arith.addf %106, %107 : vector<8x128xf32>
    %109 = arith.mulf %96, %108 : vector<8x128xf32>
    %110 = arith.addf %105, %109 : vector<8x128xf32>
    %111 = math.tanh %110 : vector<8x128xf32>
    %cst_42 = arith.constant 1.000000e+00 : f32
    %112 = vector.broadcast %cst_42 : f32 to vector<8x128xf32>
    %113 = arith.subf %112, %104 : vector<8x128xf32>
    %114 = arith.mulf %113, %111 : vector<8x128xf32>
    %115 = arith.mulf %104, %84 : vector<8x128xf32>
    %116 = arith.addf %114, %115 : vector<8x128xf32>
    %c3_i32 = arith.constant 3 : i32
    %117 = arith.index_cast %c3_i32 : i32 to index
    %c0_43 = arith.constant 0 : index
    %c0_44 = arith.constant 0 : index
    %118 = vector.load %arg13[%117, %c0_43, %c0_44] : memref<8x8x384xf32, #tpu.memory_space<vmem>>, vector<1x8x384xf32>
    %119 = vector.shape_cast %118 : vector<1x8x384xf32> to vector<8x384xf32>
    %cst_45 = arith.constant dense<0.000000e+00> : vector<8x384xf32>
    %120 = tpu.matmul %116, %19, %cst_45 {dimension_numbers = #tpu.dot_dimension_numbers<[1], [0], [0], [1], [0, 0, 1, 1], [], []>} : vector<8x128xf32>, vector<128x384xf32>, vector<8x384xf32> -> vector<8x384xf32>
    %121 = vector.extract_strided_slice %119 {offsets = [0, 0], sizes = [8, 128], strides = [1, 1]} : vector<8x384xf32> to vector<8x128xf32>
    %122 = vector.extract_strided_slice %120 {offsets = [0, 0], sizes = [8, 128], strides = [1, 1]} : vector<8x384xf32> to vector<8x128xf32>
    %123 = arith.addf %121, %122 : vector<8x128xf32>
    %124 = arith.negf %123 : vector<8x128xf32>
    %125 = math.exp %124 : vector<8x128xf32>
    %cst_46 = arith.constant 1.000000e+00 : f32
    %126 = vector.broadcast %cst_46 : f32 to vector<8x128xf32>
    %127 = arith.addf %126, %125 : vector<8x128xf32>
    %128 = arith.divf %126, %127 : vector<8x128xf32>
    %129 = vector.extract_strided_slice %119 {offsets = [0, 128], sizes = [8, 128], strides = [1, 1]} : vector<8x384xf32> to vector<8x128xf32>
    %130 = vector.extract_strided_slice %120 {offsets = [0, 128], sizes = [8, 128], strides = [1, 1]} : vector<8x384xf32> to vector<8x128xf32>
    %131 = arith.addf %129, %130 : vector<8x128xf32>
    %132 = arith.negf %131 : vector<8x128xf32>
    %133 = math.exp %132 : vector<8x128xf32>
    %cst_47 = arith.constant 1.000000e+00 : f32
    %134 = vector.broadcast %cst_47 : f32 to vector<8x128xf32>
    %135 = arith.addf %134, %133 : vector<8x128xf32>
    %136 = arith.divf %134, %135 : vector<8x128xf32>
    %137 = vector.extract_strided_slice %119 {offsets = [0, 256], sizes = [8, 128], strides = [1, 1]} : vector<8x384xf32> to vector<8x128xf32>
    %138 = vector.extract_strided_slice %120 {offsets = [0, 256], sizes = [8, 128], strides = [1, 1]} : vector<8x384xf32> to vector<8x128xf32>
    %139 = vector.broadcast %20 : vector<1x128xf32> to vector<8x128xf32>
    %140 = arith.addf %138, %139 : vector<8x128xf32>
    %141 = arith.mulf %128, %140 : vector<8x128xf32>
    %142 = arith.addf %137, %141 : vector<8x128xf32>
    %143 = math.tanh %142 : vector<8x128xf32>
    %cst_48 = arith.constant 1.000000e+00 : f32
    %144 = vector.broadcast %cst_48 : f32 to vector<8x128xf32>
    %145 = arith.subf %144, %136 : vector<8x128xf32>
    %146 = arith.mulf %145, %143 : vector<8x128xf32>
    %147 = arith.mulf %136, %116 : vector<8x128xf32>
    %148 = arith.addf %146, %147 : vector<8x128xf32>
    %c4_i32 = arith.constant 4 : i32
    %149 = arith.index_cast %c4_i32 : i32 to index
    %c0_49 = arith.constant 0 : index
    %c0_50 = arith.constant 0 : index
    %150 = vector.load %arg13[%149, %c0_49, %c0_50] : memref<8x8x384xf32, #tpu.memory_space<vmem>>, vector<1x8x384xf32>
    %151 = vector.shape_cast %150 : vector<1x8x384xf32> to vector<8x384xf32>
    %cst_51 = arith.constant dense<0.000000e+00> : vector<8x384xf32>
    %152 = tpu.matmul %148, %19, %cst_51 {dimension_numbers = #tpu.dot_dimension_numbers<[1], [0], [0], [1], [0, 0, 1, 1], [], []>} : vector<8x128xf32>, vector<128x384xf32>, vector<8x384xf32> -> vector<8x384xf32>
    %153 = vector.extract_strided_slice %151 {offsets = [0, 0], sizes = [8, 128], strides = [1, 1]} : vector<8x384xf32> to vector<8x128xf32>
    %154 = vector.extract_strided_slice %152 {offsets = [0, 0], sizes = [8, 128], strides = [1, 1]} : vector<8x384xf32> to vector<8x128xf32>
    %155 = arith.addf %153, %154 : vector<8x128xf32>
    %156 = arith.negf %155 : vector<8x128xf32>
    %157 = math.exp %156 : vector<8x128xf32>
    %cst_52 = arith.constant 1.000000e+00 : f32
    %158 = vector.broadcast %cst_52 : f32 to vector<8x128xf32>
    %159 = arith.addf %158, %157 : vector<8x128xf32>
    %160 = arith.divf %158, %159 : vector<8x128xf32>
    %161 = vector.extract_strided_slice %151 {offsets = [0, 128], sizes = [8, 128], strides = [1, 1]} : vector<8x384xf32> to vector<8x128xf32>
    %162 = vector.extract_strided_slice %152 {offsets = [0, 128], sizes = [8, 128], strides = [1, 1]} : vector<8x384xf32> to vector<8x128xf32>
    %163 = arith.addf %161, %162 : vector<8x128xf32>
    %164 = arith.negf %163 : vector<8x128xf32>
    %165 = math.exp %164 : vector<8x128xf32>
    %cst_53 = arith.constant 1.000000e+00 : f32
    %166 = vector.broadcast %cst_53 : f32 to vector<8x128xf32>
    %167 = arith.addf %166, %165 : vector<8x128xf32>
    %168 = arith.divf %166, %167 : vector<8x128xf32>
    %169 = vector.extract_strided_slice %151 {offsets = [0, 256], sizes = [8, 128], strides = [1, 1]} : vector<8x384xf32> to vector<8x128xf32>
    %170 = vector.extract_strided_slice %152 {offsets = [0, 256], sizes = [8, 128], strides = [1, 1]} : vector<8x384xf32> to vector<8x128xf32>
    %171 = vector.broadcast %20 : vector<1x128xf32> to vector<8x128xf32>
    %172 = arith.addf %170, %171 : vector<8x128xf32>
    %173 = arith.mulf %160, %172 : vector<8x128xf32>
    %174 = arith.addf %169, %173 : vector<8x128xf32>
    %175 = math.tanh %174 : vector<8x128xf32>
    %cst_54 = arith.constant 1.000000e+00 : f32
    %176 = vector.broadcast %cst_54 : f32 to vector<8x128xf32>
    %177 = arith.subf %176, %168 : vector<8x128xf32>
    %178 = arith.mulf %177, %175 : vector<8x128xf32>
    %179 = arith.mulf %168, %148 : vector<8x128xf32>
    %180 = arith.addf %178, %179 : vector<8x128xf32>
    %c5_i32 = arith.constant 5 : i32
    %181 = arith.index_cast %c5_i32 : i32 to index
    %c0_55 = arith.constant 0 : index
    %c0_56 = arith.constant 0 : index
    %182 = vector.load %arg13[%181, %c0_55, %c0_56] : memref<8x8x384xf32, #tpu.memory_space<vmem>>, vector<1x8x384xf32>
    %183 = vector.shape_cast %182 : vector<1x8x384xf32> to vector<8x384xf32>
    %cst_57 = arith.constant dense<0.000000e+00> : vector<8x384xf32>
    %184 = tpu.matmul %180, %19, %cst_57 {dimension_numbers = #tpu.dot_dimension_numbers<[1], [0], [0], [1], [0, 0, 1, 1], [], []>} : vector<8x128xf32>, vector<128x384xf32>, vector<8x384xf32> -> vector<8x384xf32>
    %185 = vector.extract_strided_slice %183 {offsets = [0, 0], sizes = [8, 128], strides = [1, 1]} : vector<8x384xf32> to vector<8x128xf32>
    %186 = vector.extract_strided_slice %184 {offsets = [0, 0], sizes = [8, 128], strides = [1, 1]} : vector<8x384xf32> to vector<8x128xf32>
    %187 = arith.addf %185, %186 : vector<8x128xf32>
    %188 = arith.negf %187 : vector<8x128xf32>
    %189 = math.exp %188 : vector<8x128xf32>
    %cst_58 = arith.constant 1.000000e+00 : f32
    %190 = vector.broadcast %cst_58 : f32 to vector<8x128xf32>
    %191 = arith.addf %190, %189 : vector<8x128xf32>
    %192 = arith.divf %190, %191 : vector<8x128xf32>
    %193 = vector.extract_strided_slice %183 {offsets = [0, 128], sizes = [8, 128], strides = [1, 1]} : vector<8x384xf32> to vector<8x128xf32>
    %194 = vector.extract_strided_slice %184 {offsets = [0, 128], sizes = [8, 128], strides = [1, 1]} : vector<8x384xf32> to vector<8x128xf32>
    %195 = arith.addf %193, %194 : vector<8x128xf32>
    %196 = arith.negf %195 : vector<8x128xf32>
    %197 = math.exp %196 : vector<8x128xf32>
    %cst_59 = arith.constant 1.000000e+00 : f32
    %198 = vector.broadcast %cst_59 : f32 to vector<8x128xf32>
    %199 = arith.addf %198, %197 : vector<8x128xf32>
    %200 = arith.divf %198, %199 : vector<8x128xf32>
    %201 = vector.extract_strided_slice %183 {offsets = [0, 256], sizes = [8, 128], strides = [1, 1]} : vector<8x384xf32> to vector<8x128xf32>
    %202 = vector.extract_strided_slice %184 {offsets = [0, 256], sizes = [8, 128], strides = [1, 1]} : vector<8x384xf32> to vector<8x128xf32>
    %203 = vector.broadcast %20 : vector<1x128xf32> to vector<8x128xf32>
    %204 = arith.addf %202, %203 : vector<8x128xf32>
    %205 = arith.mulf %192, %204 : vector<8x128xf32>
    %206 = arith.addf %201, %205 : vector<8x128xf32>
    %207 = math.tanh %206 : vector<8x128xf32>
    %cst_60 = arith.constant 1.000000e+00 : f32
    %208 = vector.broadcast %cst_60 : f32 to vector<8x128xf32>
    %209 = arith.subf %208, %200 : vector<8x128xf32>
    %210 = arith.mulf %209, %207 : vector<8x128xf32>
    %211 = arith.mulf %200, %180 : vector<8x128xf32>
    %212 = arith.addf %210, %211 : vector<8x128xf32>
    %c6_i32 = arith.constant 6 : i32
    %213 = arith.index_cast %c6_i32 : i32 to index
    %c0_61 = arith.constant 0 : index
    %c0_62 = arith.constant 0 : index
    %214 = vector.load %arg13[%213, %c0_61, %c0_62] : memref<8x8x384xf32, #tpu.memory_space<vmem>>, vector<1x8x384xf32>
    %215 = vector.shape_cast %214 : vector<1x8x384xf32> to vector<8x384xf32>
    %cst_63 = arith.constant dense<0.000000e+00> : vector<8x384xf32>
    %216 = tpu.matmul %212, %19, %cst_63 {dimension_numbers = #tpu.dot_dimension_numbers<[1], [0], [0], [1], [0, 0, 1, 1], [], []>} : vector<8x128xf32>, vector<128x384xf32>, vector<8x384xf32> -> vector<8x384xf32>
    %217 = vector.extract_strided_slice %215 {offsets = [0, 0], sizes = [8, 128], strides = [1, 1]} : vector<8x384xf32> to vector<8x128xf32>
    %218 = vector.extract_strided_slice %216 {offsets = [0, 0], sizes = [8, 128], strides = [1, 1]} : vector<8x384xf32> to vector<8x128xf32>
    %219 = arith.addf %217, %218 : vector<8x128xf32>
    %220 = arith.negf %219 : vector<8x128xf32>
    %221 = math.exp %220 : vector<8x128xf32>
    %cst_64 = arith.constant 1.000000e+00 : f32
    %222 = vector.broadcast %cst_64 : f32 to vector<8x128xf32>
    %223 = arith.addf %222, %221 : vector<8x128xf32>
    %224 = arith.divf %222, %223 : vector<8x128xf32>
    %225 = vector.extract_strided_slice %215 {offsets = [0, 128], sizes = [8, 128], strides = [1, 1]} : vector<8x384xf32> to vector<8x128xf32>
    %226 = vector.extract_strided_slice %216 {offsets = [0, 128], sizes = [8, 128], strides = [1, 1]} : vector<8x384xf32> to vector<8x128xf32>
    %227 = arith.addf %225, %226 : vector<8x128xf32>
    %228 = arith.negf %227 : vector<8x128xf32>
    %229 = math.exp %228 : vector<8x128xf32>
    %cst_65 = arith.constant 1.000000e+00 : f32
    %230 = vector.broadcast %cst_65 : f32 to vector<8x128xf32>
    %231 = arith.addf %230, %229 : vector<8x128xf32>
    %232 = arith.divf %230, %231 : vector<8x128xf32>
    %233 = vector.extract_strided_slice %215 {offsets = [0, 256], sizes = [8, 128], strides = [1, 1]} : vector<8x384xf32> to vector<8x128xf32>
    %234 = vector.extract_strided_slice %216 {offsets = [0, 256], sizes = [8, 128], strides = [1, 1]} : vector<8x384xf32> to vector<8x128xf32>
    %235 = vector.broadcast %20 : vector<1x128xf32> to vector<8x128xf32>
    %236 = arith.addf %234, %235 : vector<8x128xf32>
    %237 = arith.mulf %224, %236 : vector<8x128xf32>
    %238 = arith.addf %233, %237 : vector<8x128xf32>
    %239 = math.tanh %238 : vector<8x128xf32>
    %cst_66 = arith.constant 1.000000e+00 : f32
    %240 = vector.broadcast %cst_66 : f32 to vector<8x128xf32>
    %241 = arith.subf %240, %232 : vector<8x128xf32>
    %242 = arith.mulf %241, %239 : vector<8x128xf32>
    %243 = arith.mulf %232, %212 : vector<8x128xf32>
    %244 = arith.addf %242, %243 : vector<8x128xf32>
    %c7_i32 = arith.constant 7 : i32
    %245 = arith.index_cast %c7_i32 : i32 to index
    %c0_67 = arith.constant 0 : index
    %c0_68 = arith.constant 0 : index
    %246 = vector.load %arg13[%245, %c0_67, %c0_68] : memref<8x8x384xf32, #tpu.memory_space<vmem>>, vector<1x8x384xf32>
    %247 = vector.shape_cast %246 : vector<1x8x384xf32> to vector<8x384xf32>
    %cst_69 = arith.constant dense<0.000000e+00> : vector<8x384xf32>
    %248 = tpu.matmul %244, %19, %cst_69 {dimension_numbers = #tpu.dot_dimension_numbers<[1], [0], [0], [1], [0, 0, 1, 1], [], []>} : vector<8x128xf32>, vector<128x384xf32>, vector<8x384xf32> -> vector<8x384xf32>
    %249 = vector.extract_strided_slice %247 {offsets = [0, 0], sizes = [8, 128], strides = [1, 1]} : vector<8x384xf32> to vector<8x128xf32>
    %250 = vector.extract_strided_slice %248 {offsets = [0, 0], sizes = [8, 128], strides = [1, 1]} : vector<8x384xf32> to vector<8x128xf32>
    %251 = arith.addf %249, %250 : vector<8x128xf32>
    %252 = arith.negf %251 : vector<8x128xf32>
    %253 = math.exp %252 : vector<8x128xf32>
    %cst_70 = arith.constant 1.000000e+00 : f32
    %254 = vector.broadcast %cst_70 : f32 to vector<8x128xf32>
    %255 = arith.addf %254, %253 : vector<8x128xf32>
    %256 = arith.divf %254, %255 : vector<8x128xf32>
    %257 = vector.extract_strided_slice %247 {offsets = [0, 128], sizes = [8, 128], strides = [1, 1]} : vector<8x384xf32> to vector<8x128xf32>
    %258 = vector.extract_strided_slice %248 {offsets = [0, 128], sizes = [8, 128], strides = [1, 1]} : vector<8x384xf32> to vector<8x128xf32>
    %259 = arith.addf %257, %258 : vector<8x128xf32>
    %260 = arith.negf %259 : vector<8x128xf32>
    %261 = math.exp %260 : vector<8x128xf32>
    %cst_71 = arith.constant 1.000000e+00 : f32
    %262 = vector.broadcast %cst_71 : f32 to vector<8x128xf32>
    %263 = arith.addf %262, %261 : vector<8x128xf32>
    %264 = arith.divf %262, %263 : vector<8x128xf32>
    %265 = vector.extract_strided_slice %247 {offsets = [0, 256], sizes = [8, 128], strides = [1, 1]} : vector<8x384xf32> to vector<8x128xf32>
    %266 = vector.extract_strided_slice %248 {offsets = [0, 256], sizes = [8, 128], strides = [1, 1]} : vector<8x384xf32> to vector<8x128xf32>
    %267 = vector.broadcast %20 : vector<1x128xf32> to vector<8x128xf32>
    %268 = arith.addf %266, %267 : vector<8x128xf32>
    %269 = arith.mulf %256, %268 : vector<8x128xf32>
    %270 = arith.addf %265, %269 : vector<8x128xf32>
    %271 = math.tanh %270 : vector<8x128xf32>
    %cst_72 = arith.constant 1.000000e+00 : f32
    %272 = vector.broadcast %cst_72 : f32 to vector<8x128xf32>
    %273 = arith.subf %272, %264 : vector<8x128xf32>
    %274 = arith.mulf %273, %271 : vector<8x128xf32>
    %275 = arith.mulf %264, %244 : vector<8x128xf32>
    %276 = arith.addf %274, %275 : vector<8x128xf32>
    %c8_i32 = arith.constant 8 : i32
    %c0_73 = arith.constant 0 : index
    %c0_74 = arith.constant 0 : index
    %277 = vector.load %arg6[%c0_73, %c0_74] : memref<128x128xf32, #tpu.memory_space<vmem>>, vector<128x128xf32>
    %cst_75 = arith.constant dense<0.000000e+00> : vector<8x128xf32>
    %278 = tpu.matmul %276, %277, %cst_75 {dimension_numbers = #tpu.dot_dimension_numbers<[1], [0], [0], [1], [0, 0, 1, 1], [], []>} : vector<8x128xf32>, vector<128x128xf32>, vector<8x128xf32> -> vector<8x128xf32>
    %c0_76 = arith.constant 0 : index
    %c0_77 = arith.constant 0 : index
    %279 = vector.load %arg7[%c0_76, %c0_77] : memref<1x128xf32, #tpu.memory_space<vmem>>, vector<1x128xf32>
    %280 = vector.broadcast %279 : vector<1x128xf32> to vector<8x128xf32>
    %281 = arith.addf %278, %280 : vector<8x128xf32>
    %282 = math.tanh %281 : vector<8x128xf32>
    %c0_78 = arith.constant 0 : index
    %c0_79 = arith.constant 0 : index
    %283 = vector.load %arg9[%c0_78, %c0_79] : memref<128x384xf32, #tpu.memory_space<vmem>>, vector<128x384xf32>
    %c0_80 = arith.constant 0 : index
    %c0_81 = arith.constant 0 : index
    %284 = vector.load %arg11[%c0_80, %c0_81] : memref<1x128xf32, #tpu.memory_space<vmem>>, vector<1x128xf32>
    %c0_i32_82 = arith.constant 0 : i32
    %285 = arith.index_cast %c0_i32_82 : i32 to index
    %c0_83 = arith.constant 0 : index
    %c0_84 = arith.constant 0 : index
    %286 = vector.load %arg14[%285, %c0_83, %c0_84] : memref<8x8x384xf32, #tpu.memory_space<vmem>>, vector<1x8x384xf32>
    %287 = vector.shape_cast %286 : vector<1x8x384xf32> to vector<8x384xf32>
    %cst_85 = arith.constant dense<0.000000e+00> : vector<8x384xf32>
    %288 = tpu.matmul %282, %283, %cst_85 {dimension_numbers = #tpu.dot_dimension_numbers<[1], [0], [0], [1], [0, 0, 1, 1], [], []>} : vector<8x128xf32>, vector<128x384xf32>, vector<8x384xf32> -> vector<8x384xf32>
    %289 = vector.extract_strided_slice %287 {offsets = [0, 0], sizes = [8, 128], strides = [1, 1]} : vector<8x384xf32> to vector<8x128xf32>
    %290 = vector.extract_strided_slice %288 {offsets = [0, 0], sizes = [8, 128], strides = [1, 1]} : vector<8x384xf32> to vector<8x128xf32>
    %291 = arith.addf %289, %290 : vector<8x128xf32>
    %292 = arith.negf %291 : vector<8x128xf32>
    %293 = math.exp %292 : vector<8x128xf32>
    %cst_86 = arith.constant 1.000000e+00 : f32
    %294 = vector.broadcast %cst_86 : f32 to vector<8x128xf32>
    %295 = arith.addf %294, %293 : vector<8x128xf32>
    %296 = arith.divf %294, %295 : vector<8x128xf32>
    %297 = vector.extract_strided_slice %287 {offsets = [0, 128], sizes = [8, 128], strides = [1, 1]} : vector<8x384xf32> to vector<8x128xf32>
    %298 = vector.extract_strided_slice %288 {offsets = [0, 128], sizes = [8, 128], strides = [1, 1]} : vector<8x384xf32> to vector<8x128xf32>
    %299 = arith.addf %297, %298 : vector<8x128xf32>
    %300 = arith.negf %299 : vector<8x128xf32>
    %301 = math.exp %300 : vector<8x128xf32>
    %cst_87 = arith.constant 1.000000e+00 : f32
    %302 = vector.broadcast %cst_87 : f32 to vector<8x128xf32>
    %303 = arith.addf %302, %301 : vector<8x128xf32>
    %304 = arith.divf %302, %303 : vector<8x128xf32>
    %305 = vector.extract_strided_slice %287 {offsets = [0, 256], sizes = [8, 128], strides = [1, 1]} : vector<8x384xf32> to vector<8x128xf32>
    %306 = vector.extract_strided_slice %288 {offsets = [0, 256], sizes = [8, 128], strides = [1, 1]} : vector<8x384xf32> to vector<8x128xf32>
    %307 = vector.broadcast %284 : vector<1x128xf32> to vector<8x128xf32>
    %308 = arith.addf %306, %307 : vector<8x128xf32>
    %309 = arith.mulf %296, %308 : vector<8x128xf32>
    %310 = arith.addf %305, %309 : vector<8x128xf32>
    %311 = math.tanh %310 : vector<8x128xf32>
    %cst_88 = arith.constant 1.000000e+00 : f32
    %312 = vector.broadcast %cst_88 : f32 to vector<8x128xf32>
    %313 = arith.subf %312, %304 : vector<8x128xf32>
    %314 = arith.mulf %313, %311 : vector<8x128xf32>
    %315 = arith.mulf %304, %282 : vector<8x128xf32>
    %316 = arith.addf %314, %315 : vector<8x128xf32>
    %317 = arith.index_cast %c0_i32_82 : i32 to index
    %c0_89 = arith.constant 0 : index
    %c0_90 = arith.constant 0 : index
    %318 = vector.load %arg12[%317, %c0_89, %c0_90] : memref<8x8x128xf32, #tpu.memory_space<vmem>>, vector<1x8x128xf32>
    %319 = vector.shape_cast %318 : vector<1x8x128xf32> to vector<8x128xf32>
    %320 = vector.shape_cast %316 : vector<8x128xf32> to vector<1x8x128xf32>
    tpu.vector_store %arg12[%317, %c0_89, %c0_90], %320 {strides = array<i32>} : memref<8x8x128xf32, #tpu.memory_space<vmem>>, vector<1x8x128xf32>,
    %c1_i32_91 = arith.constant 1 : i32
    %321 = arith.index_cast %c1_i32_91 : i32 to index
    %c0_92 = arith.constant 0 : index
    %c0_93 = arith.constant 0 : index
    %322 = vector.load %arg14[%321, %c0_92, %c0_93] : memref<8x8x384xf32, #tpu.memory_space<vmem>>, vector<1x8x384xf32>
    %323 = vector.shape_cast %322 : vector<1x8x384xf32> to vector<8x384xf32>
    %cst_94 = arith.constant dense<0.000000e+00> : vector<8x384xf32>
    %324 = tpu.matmul %316, %283, %cst_94 {dimension_numbers = #tpu.dot_dimension_numbers<[1], [0], [0], [1], [0, 0, 1, 1], [], []>} : vector<8x128xf32>, vector<128x384xf32>, vector<8x384xf32> -> vector<8x384xf32>
    %325 = vector.extract_strided_slice %323 {offsets = [0, 0], sizes = [8, 128], strides = [1, 1]} : vector<8x384xf32> to vector<8x128xf32>
    %326 = vector.extract_strided_slice %324 {offsets = [0, 0], sizes = [8, 128], strides = [1, 1]} : vector<8x384xf32> to vector<8x128xf32>
    %327 = arith.addf %325, %326 : vector<8x128xf32>
    %328 = arith.negf %327 : vector<8x128xf32>
    %329 = math.exp %328 : vector<8x128xf32>
    %cst_95 = arith.constant 1.000000e+00 : f32
    %330 = vector.broadcast %cst_95 : f32 to vector<8x128xf32>
    %331 = arith.addf %330, %329 : vector<8x128xf32>
    %332 = arith.divf %330, %331 : vector<8x128xf32>
    %333 = vector.extract_strided_slice %323 {offsets = [0, 128], sizes = [8, 128], strides = [1, 1]} : vector<8x384xf32> to vector<8x128xf32>
    %334 = vector.extract_strided_slice %324 {offsets = [0, 128], sizes = [8, 128], strides = [1, 1]} : vector<8x384xf32> to vector<8x128xf32>
    %335 = arith.addf %333, %334 : vector<8x128xf32>
    %336 = arith.negf %335 : vector<8x128xf32>
    %337 = math.exp %336 : vector<8x128xf32>
    %cst_96 = arith.constant 1.000000e+00 : f32
    %338 = vector.broadcast %cst_96 : f32 to vector<8x128xf32>
    %339 = arith.addf %338, %337 : vector<8x128xf32>
    %340 = arith.divf %338, %339 : vector<8x128xf32>
    %341 = vector.extract_strided_slice %323 {offsets = [0, 256], sizes = [8, 128], strides = [1, 1]} : vector<8x384xf32> to vector<8x128xf32>
    %342 = vector.extract_strided_slice %324 {offsets = [0, 256], sizes = [8, 128], strides = [1, 1]} : vector<8x384xf32> to vector<8x128xf32>
    %343 = vector.broadcast %284 : vector<1x128xf32> to vector<8x128xf32>
    %344 = arith.addf %342, %343 : vector<8x128xf32>
    %345 = arith.mulf %332, %344 : vector<8x128xf32>
    %346 = arith.addf %341, %345 : vector<8x128xf32>
    %347 = math.tanh %346 : vector<8x128xf32>
    %cst_97 = arith.constant 1.000000e+00 : f32
    %348 = vector.broadcast %cst_97 : f32 to vector<8x128xf32>
    %349 = arith.subf %348, %340 : vector<8x128xf32>
    %350 = arith.mulf %349, %347 : vector<8x128xf32>
    %351 = arith.mulf %340, %316 : vector<8x128xf32>
    %352 = arith.addf %350, %351 : vector<8x128xf32>
    %353 = arith.index_cast %c1_i32_91 : i32 to index
    %c0_98 = arith.constant 0 : index
    %c0_99 = arith.constant 0 : index
    %354 = vector.load %arg12[%353, %c0_98, %c0_99] : memref<8x8x128xf32, #tpu.memory_space<vmem>>, vector<1x8x128xf32>
    %355 = vector.shape_cast %354 : vector<1x8x128xf32> to vector<8x128xf32>
    %356 = vector.shape_cast %352 : vector<8x128xf32> to vector<1x8x128xf32>
    tpu.vector_store %arg12[%353, %c0_98, %c0_99], %356 {strides = array<i32>} : memref<8x8x128xf32, #tpu.memory_space<vmem>>, vector<1x8x128xf32>,
    %c2_i32_100 = arith.constant 2 : i32
    %357 = arith.index_cast %c2_i32_100 : i32 to index
    %c0_101 = arith.constant 0 : index
    %c0_102 = arith.constant 0 : index
    %358 = vector.load %arg14[%357, %c0_101, %c0_102] : memref<8x8x384xf32, #tpu.memory_space<vmem>>, vector<1x8x384xf32>
    %359 = vector.shape_cast %358 : vector<1x8x384xf32> to vector<8x384xf32>
    %cst_103 = arith.constant dense<0.000000e+00> : vector<8x384xf32>
    %360 = tpu.matmul %352, %283, %cst_103 {dimension_numbers = #tpu.dot_dimension_numbers<[1], [0], [0], [1], [0, 0, 1, 1], [], []>} : vector<8x128xf32>, vector<128x384xf32>, vector<8x384xf32> -> vector<8x384xf32>
    %361 = vector.extract_strided_slice %359 {offsets = [0, 0], sizes = [8, 128], strides = [1, 1]} : vector<8x384xf32> to vector<8x128xf32>
    %362 = vector.extract_strided_slice %360 {offsets = [0, 0], sizes = [8, 128], strides = [1, 1]} : vector<8x384xf32> to vector<8x128xf32>
    %363 = arith.addf %361, %362 : vector<8x128xf32>
    %364 = arith.negf %363 : vector<8x128xf32>
    %365 = math.exp %364 : vector<8x128xf32>
    %cst_104 = arith.constant 1.000000e+00 : f32
    %366 = vector.broadcast %cst_104 : f32 to vector<8x128xf32>
    %367 = arith.addf %366, %365 : vector<8x128xf32>
    %368 = arith.divf %366, %367 : vector<8x128xf32>
    %369 = vector.extract_strided_slice %359 {offsets = [0, 128], sizes = [8, 128], strides = [1, 1]} : vector<8x384xf32> to vector<8x128xf32>
    %370 = vector.extract_strided_slice %360 {offsets = [0, 128], sizes = [8, 128], strides = [1, 1]} : vector<8x384xf32> to vector<8x128xf32>
    %371 = arith.addf %369, %370 : vector<8x128xf32>
    %372 = arith.negf %371 : vector<8x128xf32>
    %373 = math.exp %372 : vector<8x128xf32>
    %cst_105 = arith.constant 1.000000e+00 : f32
    %374 = vector.broadcast %cst_105 : f32 to vector<8x128xf32>
    %375 = arith.addf %374, %373 : vector<8x128xf32>
    %376 = arith.divf %374, %375 : vector<8x128xf32>
    %377 = vector.extract_strided_slice %359 {offsets = [0, 256], sizes = [8, 128], strides = [1, 1]} : vector<8x384xf32> to vector<8x128xf32>
    %378 = vector.extract_strided_slice %360 {offsets = [0, 256], sizes = [8, 128], strides = [1, 1]} : vector<8x384xf32> to vector<8x128xf32>
    %379 = vector.broadcast %284 : vector<1x128xf32> to vector<8x128xf32>
    %380 = arith.addf %378, %379 : vector<8x128xf32>
    %381 = arith.mulf %368, %380 : vector<8x128xf32>
    %382 = arith.addf %377, %381 : vector<8x128xf32>
    %383 = math.tanh %382 : vector<8x128xf32>
    %cst_106 = arith.constant 1.000000e+00 : f32
    %384 = vector.broadcast %cst_106 : f32 to vector<8x128xf32>
    %385 = arith.subf %384, %376 : vector<8x128xf32>
    %386 = arith.mulf %385, %383 : vector<8x128xf32>
    %387 = arith.mulf %376, %352 : vector<8x128xf32>
    %388 = arith.addf %386, %387 : vector<8x128xf32>
    %389 = arith.index_cast %c2_i32_100 : i32 to index
    %c0_107 = arith.constant 0 : index
    %c0_108 = arith.constant 0 : index
    %390 = vector.load %arg12[%389, %c0_107, %c0_108] : memref<8x8x128xf32, #tpu.memory_space<vmem>>, vector<1x8x128xf32>
    %391 = vector.shape_cast %390 : vector<1x8x128xf32> to vector<8x128xf32>
    %392 = vector.shape_cast %388 : vector<8x128xf32> to vector<1x8x128xf32>
    tpu.vector_store %arg12[%389, %c0_107, %c0_108], %392 {strides = array<i32>} : memref<8x8x128xf32, #tpu.memory_space<vmem>>, vector<1x8x128xf32>,
    %c3_i32_109 = arith.constant 3 : i32
    %393 = arith.index_cast %c3_i32_109 : i32 to index
    %c0_110 = arith.constant 0 : index
    %c0_111 = arith.constant 0 : index
    %394 = vector.load %arg14[%393, %c0_110, %c0_111] : memref<8x8x384xf32, #tpu.memory_space<vmem>>, vector<1x8x384xf32>
    %395 = vector.shape_cast %394 : vector<1x8x384xf32> to vector<8x384xf32>
    %cst_112 = arith.constant dense<0.000000e+00> : vector<8x384xf32>
    %396 = tpu.matmul %388, %283, %cst_112 {dimension_numbers = #tpu.dot_dimension_numbers<[1], [0], [0], [1], [0, 0, 1, 1], [], []>} : vector<8x128xf32>, vector<128x384xf32>, vector<8x384xf32> -> vector<8x384xf32>
    %397 = vector.extract_strided_slice %395 {offsets = [0, 0], sizes = [8, 128], strides = [1, 1]} : vector<8x384xf32> to vector<8x128xf32>
    %398 = vector.extract_strided_slice %396 {offsets = [0, 0], sizes = [8, 128], strides = [1, 1]} : vector<8x384xf32> to vector<8x128xf32>
    %399 = arith.addf %397, %398 : vector<8x128xf32>
    %400 = arith.negf %399 : vector<8x128xf32>
    %401 = math.exp %400 : vector<8x128xf32>
    %cst_113 = arith.constant 1.000000e+00 : f32
    %402 = vector.broadcast %cst_113 : f32 to vector<8x128xf32>
    %403 = arith.addf %402, %401 : vector<8x128xf32>
    %404 = arith.divf %402, %403 : vector<8x128xf32>
    %405 = vector.extract_strided_slice %395 {offsets = [0, 128], sizes = [8, 128], strides = [1, 1]} : vector<8x384xf32> to vector<8x128xf32>
    %406 = vector.extract_strided_slice %396 {offsets = [0, 128], sizes = [8, 128], strides = [1, 1]} : vector<8x384xf32> to vector<8x128xf32>
    %407 = arith.addf %405, %406 : vector<8x128xf32>
    %408 = arith.negf %407 : vector<8x128xf32>
    %409 = math.exp %408 : vector<8x128xf32>
    %cst_114 = arith.constant 1.000000e+00 : f32
    %410 = vector.broadcast %cst_114 : f32 to vector<8x128xf32>
    %411 = arith.addf %410, %409 : vector<8x128xf32>
    %412 = arith.divf %410, %411 : vector<8x128xf32>
    %413 = vector.extract_strided_slice %395 {offsets = [0, 256], sizes = [8, 128], strides = [1, 1]} : vector<8x384xf32> to vector<8x128xf32>
    %414 = vector.extract_strided_slice %396 {offsets = [0, 256], sizes = [8, 128], strides = [1, 1]} : vector<8x384xf32> to vector<8x128xf32>
    %415 = vector.broadcast %284 : vector<1x128xf32> to vector<8x128xf32>
    %416 = arith.addf %414, %415 : vector<8x128xf32>
    %417 = arith.mulf %404, %416 : vector<8x128xf32>
    %418 = arith.addf %413, %417 : vector<8x128xf32>
    %419 = math.tanh %418 : vector<8x128xf32>
    %cst_115 = arith.constant 1.000000e+00 : f32
    %420 = vector.broadcast %cst_115 : f32 to vector<8x128xf32>
    %421 = arith.subf %420, %412 : vector<8x128xf32>
    %422 = arith.mulf %421, %419 : vector<8x128xf32>
    %423 = arith.mulf %412, %388 : vector<8x128xf32>
    %424 = arith.addf %422, %423 : vector<8x128xf32>
    %425 = arith.index_cast %c3_i32_109 : i32 to index
    %c0_116 = arith.constant 0 : index
    %c0_117 = arith.constant 0 : index
    %426 = vector.load %arg12[%425, %c0_116, %c0_117] : memref<8x8x128xf32, #tpu.memory_space<vmem>>, vector<1x8x128xf32>
    %427 = vector.shape_cast %426 : vector<1x8x128xf32> to vector<8x128xf32>
    %428 = vector.shape_cast %424 : vector<8x128xf32> to vector<1x8x128xf32>
    tpu.vector_store %arg12[%425, %c0_116, %c0_117], %428 {strides = array<i32>} : memref<8x8x128xf32, #tpu.memory_space<vmem>>, vector<1x8x128xf32>,
    %c4_i32_118 = arith.constant 4 : i32
    %429 = arith.index_cast %c4_i32_118 : i32 to index
    %c0_119 = arith.constant 0 : index
    %c0_120 = arith.constant 0 : index
    %430 = vector.load %arg14[%429, %c0_119, %c0_120] : memref<8x8x384xf32, #tpu.memory_space<vmem>>, vector<1x8x384xf32>
    %431 = vector.shape_cast %430 : vector<1x8x384xf32> to vector<8x384xf32>
    %cst_121 = arith.constant dense<0.000000e+00> : vector<8x384xf32>
    %432 = tpu.matmul %424, %283, %cst_121 {dimension_numbers = #tpu.dot_dimension_numbers<[1], [0], [0], [1], [0, 0, 1, 1], [], []>} : vector<8x128xf32>, vector<128x384xf32>, vector<8x384xf32> -> vector<8x384xf32>
    %433 = vector.extract_strided_slice %431 {offsets = [0, 0], sizes = [8, 128], strides = [1, 1]} : vector<8x384xf32> to vector<8x128xf32>
    %434 = vector.extract_strided_slice %432 {offsets = [0, 0], sizes = [8, 128], strides = [1, 1]} : vector<8x384xf32> to vector<8x128xf32>
    %435 = arith.addf %433, %434 : vector<8x128xf32>
    %436 = arith.negf %435 : vector<8x128xf32>
    %437 = math.exp %436 : vector<8x128xf32>
    %cst_122 = arith.constant 1.000000e+00 : f32
    %438 = vector.broadcast %cst_122 : f32 to vector<8x128xf32>
    %439 = arith.addf %438, %437 : vector<8x128xf32>
    %440 = arith.divf %438, %439 : vector<8x128xf32>
    %441 = vector.extract_strided_slice %431 {offsets = [0, 128], sizes = [8, 128], strides = [1, 1]} : vector<8x384xf32> to vector<8x128xf32>
    %442 = vector.extract_strided_slice %432 {offsets = [0, 128], sizes = [8, 128], strides = [1, 1]} : vector<8x384xf32> to vector<8x128xf32>
    %443 = arith.addf %441, %442 : vector<8x128xf32>
    %444 = arith.negf %443 : vector<8x128xf32>
    %445 = math.exp %444 : vector<8x128xf32>
    %cst_123 = arith.constant 1.000000e+00 : f32
    %446 = vector.broadcast %cst_123 : f32 to vector<8x128xf32>
    %447 = arith.addf %446, %445 : vector<8x128xf32>
    %448 = arith.divf %446, %447 : vector<8x128xf32>
    %449 = vector.extract_strided_slice %431 {offsets = [0, 256], sizes = [8, 128], strides = [1, 1]} : vector<8x384xf32> to vector<8x128xf32>
    %450 = vector.extract_strided_slice %432 {offsets = [0, 256], sizes = [8, 128], strides = [1, 1]} : vector<8x384xf32> to vector<8x128xf32>
    %451 = vector.broadcast %284 : vector<1x128xf32> to vector<8x128xf32>
    %452 = arith.addf %450, %451 : vector<8x128xf32>
    %453 = arith.mulf %440, %452 : vector<8x128xf32>
    %454 = arith.addf %449, %453 : vector<8x128xf32>
    %455 = math.tanh %454 : vector<8x128xf32>
    %cst_124 = arith.constant 1.000000e+00 : f32
    %456 = vector.broadcast %cst_124 : f32 to vector<8x128xf32>
    %457 = arith.subf %456, %448 : vector<8x128xf32>
    %458 = arith.mulf %457, %455 : vector<8x128xf32>
    %459 = arith.mulf %448, %424 : vector<8x128xf32>
    %460 = arith.addf %458, %459 : vector<8x128xf32>
    %461 = arith.index_cast %c4_i32_118 : i32 to index
    %c0_125 = arith.constant 0 : index
    %c0_126 = arith.constant 0 : index
    %462 = vector.load %arg12[%461, %c0_125, %c0_126] : memref<8x8x128xf32, #tpu.memory_space<vmem>>, vector<1x8x128xf32>
    %463 = vector.shape_cast %462 : vector<1x8x128xf32> to vector<8x128xf32>
    %464 = vector.shape_cast %460 : vector<8x128xf32> to vector<1x8x128xf32>
    tpu.vector_store %arg12[%461, %c0_125, %c0_126], %464 {strides = array<i32>} : memref<8x8x128xf32, #tpu.memory_space<vmem>>, vector<1x8x128xf32>,
    %c5_i32_127 = arith.constant 5 : i32
    %465 = arith.index_cast %c5_i32_127 : i32 to index
    %c0_128 = arith.constant 0 : index
    %c0_129 = arith.constant 0 : index
    %466 = vector.load %arg14[%465, %c0_128, %c0_129] : memref<8x8x384xf32, #tpu.memory_space<vmem>>, vector<1x8x384xf32>
    %467 = vector.shape_cast %466 : vector<1x8x384xf32> to vector<8x384xf32>
    %cst_130 = arith.constant dense<0.000000e+00> : vector<8x384xf32>
    %468 = tpu.matmul %460, %283, %cst_130 {dimension_numbers = #tpu.dot_dimension_numbers<[1], [0], [0], [1], [0, 0, 1, 1], [], []>} : vector<8x128xf32>, vector<128x384xf32>, vector<8x384xf32> -> vector<8x384xf32>
    %469 = vector.extract_strided_slice %467 {offsets = [0, 0], sizes = [8, 128], strides = [1, 1]} : vector<8x384xf32> to vector<8x128xf32>
    %470 = vector.extract_strided_slice %468 {offsets = [0, 0], sizes = [8, 128], strides = [1, 1]} : vector<8x384xf32> to vector<8x128xf32>
    %471 = arith.addf %469, %470 : vector<8x128xf32>
    %472 = arith.negf %471 : vector<8x128xf32>
    %473 = math.exp %472 : vector<8x128xf32>
    %cst_131 = arith.constant 1.000000e+00 : f32
    %474 = vector.broadcast %cst_131 : f32 to vector<8x128xf32>
    %475 = arith.addf %474, %473 : vector<8x128xf32>
    %476 = arith.divf %474, %475 : vector<8x128xf32>
    %477 = vector.extract_strided_slice %467 {offsets = [0, 128], sizes = [8, 128], strides = [1, 1]} : vector<8x384xf32> to vector<8x128xf32>
    %478 = vector.extract_strided_slice %468 {offsets = [0, 128], sizes = [8, 128], strides = [1, 1]} : vector<8x384xf32> to vector<8x128xf32>
    %479 = arith.addf %477, %478 : vector<8x128xf32>
    %480 = arith.negf %479 : vector<8x128xf32>
    %481 = math.exp %480 : vector<8x128xf32>
    %cst_132 = arith.constant 1.000000e+00 : f32
    %482 = vector.broadcast %cst_132 : f32 to vector<8x128xf32>
    %483 = arith.addf %482, %481 : vector<8x128xf32>
    %484 = arith.divf %482, %483 : vector<8x128xf32>
    %485 = vector.extract_strided_slice %467 {offsets = [0, 256], sizes = [8, 128], strides = [1, 1]} : vector<8x384xf32> to vector<8x128xf32>
    %486 = vector.extract_strided_slice %468 {offsets = [0, 256], sizes = [8, 128], strides = [1, 1]} : vector<8x384xf32> to vector<8x128xf32>
    %487 = vector.broadcast %284 : vector<1x128xf32> to vector<8x128xf32>
    %488 = arith.addf %486, %487 : vector<8x128xf32>
    %489 = arith.mulf %476, %488 : vector<8x128xf32>
    %490 = arith.addf %485, %489 : vector<8x128xf32>
    %491 = math.tanh %490 : vector<8x128xf32>
    %cst_133 = arith.constant 1.000000e+00 : f32
    %492 = vector.broadcast %cst_133 : f32 to vector<8x128xf32>
    %493 = arith.subf %492, %484 : vector<8x128xf32>
    %494 = arith.mulf %493, %491 : vector<8x128xf32>
    %495 = arith.mulf %484, %460 : vector<8x128xf32>
    %496 = arith.addf %494, %495 : vector<8x128xf32>
    %497 = arith.index_cast %c5_i32_127 : i32 to index
    %c0_134 = arith.constant 0 : index
    %c0_135 = arith.constant 0 : index
    %498 = vector.load %arg12[%497, %c0_134, %c0_135] : memref<8x8x128xf32, #tpu.memory_space<vmem>>, vector<1x8x128xf32>
    %499 = vector.shape_cast %498 : vector<1x8x128xf32> to vector<8x128xf32>
    %500 = vector.shape_cast %496 : vector<8x128xf32> to vector<1x8x128xf32>
    tpu.vector_store %arg12[%497, %c0_134, %c0_135], %500 {strides = array<i32>} : memref<8x8x128xf32, #tpu.memory_space<vmem>>, vector<1x8x128xf32>,
    %c6_i32_136 = arith.constant 6 : i32
    %501 = arith.index_cast %c6_i32_136 : i32 to index
    %c0_137 = arith.constant 0 : index
    %c0_138 = arith.constant 0 : index
    %502 = vector.load %arg14[%501, %c0_137, %c0_138] : memref<8x8x384xf32, #tpu.memory_space<vmem>>, vector<1x8x384xf32>
    %503 = vector.shape_cast %502 : vector<1x8x384xf32> to vector<8x384xf32>
    %cst_139 = arith.constant dense<0.000000e+00> : vector<8x384xf32>
    %504 = tpu.matmul %496, %283, %cst_139 {dimension_numbers = #tpu.dot_dimension_numbers<[1], [0], [0], [1], [0, 0, 1, 1], [], []>} : vector<8x128xf32>, vector<128x384xf32>, vector<8x384xf32> -> vector<8x384xf32>
    %505 = vector.extract_strided_slice %503 {offsets = [0, 0], sizes = [8, 128], strides = [1, 1]} : vector<8x384xf32> to vector<8x128xf32>
    %506 = vector.extract_strided_slice %504 {offsets = [0, 0], sizes = [8, 128], strides = [1, 1]} : vector<8x384xf32> to vector<8x128xf32>
    %507 = arith.addf %505, %506 : vector<8x128xf32>
    %508 = arith.negf %507 : vector<8x128xf32>
    %509 = math.exp %508 : vector<8x128xf32>
    %cst_140 = arith.constant 1.000000e+00 : f32
    %510 = vector.broadcast %cst_140 : f32 to vector<8x128xf32>
    %511 = arith.addf %510, %509 : vector<8x128xf32>
    %512 = arith.divf %510, %511 : vector<8x128xf32>
    %513 = vector.extract_strided_slice %503 {offsets = [0, 128], sizes = [8, 128], strides = [1, 1]} : vector<8x384xf32> to vector<8x128xf32>
    %514 = vector.extract_strided_slice %504 {offsets = [0, 128], sizes = [8, 128], strides = [1, 1]} : vector<8x384xf32> to vector<8x128xf32>
    %515 = arith.addf %513, %514 : vector<8x128xf32>
    %516 = arith.negf %515 : vector<8x128xf32>
    %517 = math.exp %516 : vector<8x128xf32>
    %cst_141 = arith.constant 1.000000e+00 : f32
    %518 = vector.broadcast %cst_141 : f32 to vector<8x128xf32>
    %519 = arith.addf %518, %517 : vector<8x128xf32>
    %520 = arith.divf %518, %519 : vector<8x128xf32>
    %521 = vector.extract_strided_slice %503 {offsets = [0, 256], sizes = [8, 128], strides = [1, 1]} : vector<8x384xf32> to vector<8x128xf32>
    %522 = vector.extract_strided_slice %504 {offsets = [0, 256], sizes = [8, 128], strides = [1, 1]} : vector<8x384xf32> to vector<8x128xf32>
    %523 = vector.broadcast %284 : vector<1x128xf32> to vector<8x128xf32>
    %524 = arith.addf %522, %523 : vector<8x128xf32>
    %525 = arith.mulf %512, %524 : vector<8x128xf32>
    %526 = arith.addf %521, %525 : vector<8x128xf32>
    %527 = math.tanh %526 : vector<8x128xf32>
    %cst_142 = arith.constant 1.000000e+00 : f32
    %528 = vector.broadcast %cst_142 : f32 to vector<8x128xf32>
    %529 = arith.subf %528, %520 : vector<8x128xf32>
    %530 = arith.mulf %529, %527 : vector<8x128xf32>
    %531 = arith.mulf %520, %496 : vector<8x128xf32>
    %532 = arith.addf %530, %531 : vector<8x128xf32>
    %533 = arith.index_cast %c6_i32_136 : i32 to index
    %c0_143 = arith.constant 0 : index
    %c0_144 = arith.constant 0 : index
    %534 = vector.load %arg12[%533, %c0_143, %c0_144] : memref<8x8x128xf32, #tpu.memory_space<vmem>>, vector<1x8x128xf32>
    %535 = vector.shape_cast %534 : vector<1x8x128xf32> to vector<8x128xf32>
    %536 = vector.shape_cast %532 : vector<8x128xf32> to vector<1x8x128xf32>
    tpu.vector_store %arg12[%533, %c0_143, %c0_144], %536 {strides = array<i32>} : memref<8x8x128xf32, #tpu.memory_space<vmem>>, vector<1x8x128xf32>,
    %c7_i32_145 = arith.constant 7 : i32
    %537 = arith.index_cast %c7_i32_145 : i32 to index
    %c0_146 = arith.constant 0 : index
    %c0_147 = arith.constant 0 : index
    %538 = vector.load %arg14[%537, %c0_146, %c0_147] : memref<8x8x384xf32, #tpu.memory_space<vmem>>, vector<1x8x384xf32>
    %539 = vector.shape_cast %538 : vector<1x8x384xf32> to vector<8x384xf32>
    %cst_148 = arith.constant dense<0.000000e+00> : vector<8x384xf32>
    %540 = tpu.matmul %532, %283, %cst_148 {dimension_numbers = #tpu.dot_dimension_numbers<[1], [0], [0], [1], [0, 0, 1, 1], [], []>} : vector<8x128xf32>, vector<128x384xf32>, vector<8x384xf32> -> vector<8x384xf32>
    %541 = vector.extract_strided_slice %539 {offsets = [0, 0], sizes = [8, 128], strides = [1, 1]} : vector<8x384xf32> to vector<8x128xf32>
    %542 = vector.extract_strided_slice %540 {offsets = [0, 0], sizes = [8, 128], strides = [1, 1]} : vector<8x384xf32> to vector<8x128xf32>
    %543 = arith.addf %541, %542 : vector<8x128xf32>
    %544 = arith.negf %543 : vector<8x128xf32>
    %545 = math.exp %544 : vector<8x128xf32>
    %cst_149 = arith.constant 1.000000e+00 : f32
    %546 = vector.broadcast %cst_149 : f32 to vector<8x128xf32>
    %547 = arith.addf %546, %545 : vector<8x128xf32>
    %548 = arith.divf %546, %547 : vector<8x128xf32>
    %549 = vector.extract_strided_slice %539 {offsets = [0, 128], sizes = [8, 128], strides = [1, 1]} : vector<8x384xf32> to vector<8x128xf32>
    %550 = vector.extract_strided_slice %540 {offsets = [0, 128], sizes = [8, 128], strides = [1, 1]} : vector<8x384xf32> to vector<8x128xf32>
    %551 = arith.addf %549, %550 : vector<8x128xf32>
    %552 = arith.negf %551 : vector<8x128xf32>
    %553 = math.exp %552 : vector<8x128xf32>
    %cst_150 = arith.constant 1.000000e+00 : f32
    %554 = vector.broadcast %cst_150 : f32 to vector<8x128xf32>
    %555 = arith.addf %554, %553 : vector<8x128xf32>
    %556 = arith.divf %554, %555 : vector<8x128xf32>
    %557 = vector.extract_strided_slice %539 {offsets = [0, 256], sizes = [8, 128], strides = [1, 1]} : vector<8x384xf32> to vector<8x128xf32>
    %558 = vector.extract_strided_slice %540 {offsets = [0, 256], sizes = [8, 128], strides = [1, 1]} : vector<8x384xf32> to vector<8x128xf32>
    %559 = vector.broadcast %284 : vector<1x128xf32> to vector<8x128xf32>
    %560 = arith.addf %558, %559 : vector<8x128xf32>
    %561 = arith.mulf %548, %560 : vector<8x128xf32>
    %562 = arith.addf %557, %561 : vector<8x128xf32>
    %563 = math.tanh %562 : vector<8x128xf32>
    %cst_151 = arith.constant 1.000000e+00 : f32
    %564 = vector.broadcast %cst_151 : f32 to vector<8x128xf32>
    %565 = arith.subf %564, %556 : vector<8x128xf32>
    %566 = arith.mulf %565, %563 : vector<8x128xf32>
    %567 = arith.mulf %556, %532 : vector<8x128xf32>
    %568 = arith.addf %566, %567 : vector<8x128xf32>
    %569 = arith.index_cast %c7_i32_145 : i32 to index
    %c0_152 = arith.constant 0 : index
    %c0_153 = arith.constant 0 : index
    %570 = vector.load %arg12[%569, %c0_152, %c0_153] : memref<8x8x128xf32, #tpu.memory_space<vmem>>, vector<1x8x128xf32>
    %571 = vector.shape_cast %570 : vector<1x8x128xf32> to vector<8x128xf32>
    %572 = vector.shape_cast %568 : vector<8x128xf32> to vector<1x8x128xf32>
    tpu.vector_store %arg12[%569, %c0_152, %c0_153], %572 {strides = array<i32>} : memref<8x8x128xf32, #tpu.memory_space<vmem>>, vector<1x8x128xf32>,
    %c8_i32_154 = arith.constant 8 : i32
    return
  }
}

</mosaic_0001>

<bundles_post_ra>
// kernel: tpu_custom_call.1
= control target key start
LH: loop header
LB: loop body
LE: loop exit
PB: predicated region body
PF: predicated region fallthrough
CT: control target
= control target key end

     0   :  { %17 = vsyncpa [#allocation5], 0  ;;  %s7281_s0 = inlined_call_operand.hbm [shape: f32[8,8,128], index: 0, kind: input, shape index: {}]   ;;  %s7282_s1 = inlined_call_operand.hbm [shape: f32[8,8,128], index: 1, kind: input, shape index: {}]   ;;  %s7283_s2 = inlined_call_operand.hbm [shape: f32[128,384], index: 2, kind: input, shape index: {}]   ;;  %s7284_s3 = inlined_call_operand.hbm [shape: f32[128,384], index: 3, kind: input, shape index: {}]   ;;  %s7285_s4 = inlined_call_operand.vmem [shape: f32[1,384], index: 4, kind: input, shape index: {}]   ;;  %s7286_s5 = inlined_call_operand.vmem [shape: f32[1,128], index: 5, kind: input, shape index: {}]   ;;  %s7287_s6 = inlined_call_operand.hbm [shape: f32[128,128], index: 6, kind: input, shape index: {}]   ;;  %s7288_s7 = inlined_call_operand.vmem [shape: f32[1,128], index: 7, kind: input, shape index: {}]   ;;  %s7289_s8 = inlined_call_operand.hbm [shape: f32[128,384], index: 8, kind: input, shape index: {}]   ;;  %s7290_s9 = inlined_call_operand.hbm [shape: f32[128,384], index: 9, kind: input, shape index: {}]   ;;  %s7291_s10 = inlined_call_operand.vmem [shape: f32[1,384], index: 10, kind: input, shape index: {}]   ;;  %s7292_s11 = inlined_call_operand.vmem [shape: f32[1,128], index: 11, kind: input, shape index: {}]   ;;  %s7293_s12 = inlined_call_operand.hbm [shape: f32[8,8,128], index: 12, kind: output, shape index: {}]  }
   0x1   :  { %18 = vsyncpa [#allocation8], 0 }
   0x2   :  { %19 = vsyncpa [#allocation11], 0 }
   0x3   :  { %20 = vsyncpa [#allocation14], 0 }
   0x4   :  { %21 = vsyncpa [#allocation6], 0  ;;  %s6207_s21 = smov [#allocation7]   ;;  %s6021_s25 = scalar_lea.hbm %s7282_s1, 1024 }
   0x5   :  { %s39_s22 = sshll.u32 %s6207_s21, 4  ;;  %p6022_p0 = scmp.ne.s32.totalorder %s7282_s1, %s6021_s25  ;;  %s40_s22 = int_to_ptr.vmem [resolvable:$true] %s39_s22 }
   0x6   :  { %p6025_p1 = scmp.lt.u32.totalorder %s6021_s25, %s7282_s1 }
   0x8   :  { %p6027_p2 = pnand %p6025_p1, %p6022_p0 }
   0xa   :  { %6030 = shalt.err (!%p6027_p2)
}
   0xb   :  { %s6031_s30 = scalar_lea.vmem %s40_s22, 1024  ;;  %p6036_p4 = scmp.lt.s32.totalorder %s40_s22, %s40_s22 }
   0xc   :  { %p6032_p3 = scmp.ne.s32.totalorder %s40_s22, %s6031_s30  ;;  %p6037_p5 = scmp.lt.s32.totalorder %s6031_s30, %s6031_s30 }
   0xe   :  { %p6038_p6 = por %p6037_p5, %p6036_p4 }
  0x10   :  { %p6039_p7 = pnand %p6038_p6, %p6032_p3 }
  0x12   :  { %6042 = shalt.err (!%p6039_p7)
}
  0x13   :  { %s6208_s13 = smov 128   ;;  %s6209_s14 = smov 8  }
  0x14   :  { %45 = dma.hbm_to_vmem [thread:$0]  %s7282_s1, 1024, %s40_s22, [#allocation8], %s6208_s13, %s6208_s13, %s6209_s14  }
  0x15   :  { %s6210_s17 = smov [#allocation10]   ;;  %s6211_s19 = smov [#allocation13]  }
  0x16   :  { %s63_s18 = sshll.u32 %s6210_s17, 4  ;;  %s93_s20 = sshll.u32 %s6211_s19, 4  ;;  %s64_s18 = int_to_ptr.vmem [resolvable:$true] %s63_s18  ;;  %s94_s20 = int_to_ptr.vmem [resolvable:$true] %s93_s20 }
  0x17   :  { %s6043_s24 = scalar_lea.hbm %s7284_s3, 6144 }
  0x18   :  { %p6044_p8 = scmp.ne.s32.totalorder %s7284_s3, %s6043_s24  ;;  %p6047_p9 = scmp.lt.u32.totalorder %s6043_s24, %s7284_s3 }
  0x1a   :  { %p6049_p10 = pnand %p6047_p9, %p6044_p8 }
  0x1c   :  { %6052 = shalt.err (!%p6049_p10)
}
  0x1d   :  { %s6053_s1 = scalar_lea.vmem %s64_s18, 6144  ;;  %p6058_p12 = scmp.lt.s32.totalorder %s64_s18, %s64_s18 }
  0x1e   :  { %p6054_p11 = scmp.ne.s32.totalorder %s64_s18, %s6053_s1  ;;  %p6059_p13 = scmp.lt.s32.totalorder %s6053_s1, %s6053_s1 }
  0x20   :  { %p6060_p0 = por %p6059_p13, %p6058_p12 }
  0x22   :  { %p6061_p1 = pnand %p6060_p0, %p6054_p11 }
  0x24   :  { %6064 = shalt.err (!%p6061_p1)
}
  0x25   :  { %s6212_s22 = smov 384   ;;  %s6213_s29 = smov 24  }
  0x26   :  { %69 = dma.hbm_to_vmem [thread:$0]  %s7284_s3, 6144, %s64_s18, [#allocation11], %s6212_s22, %s6212_s22, %s6213_s29  }
  0x27   :  { %s6065_s19 = scalar_lea.hbm %s7289_s8, 6144 }
  0x28   :  { %p6066_p2 = scmp.ne.s32.totalorder %s7289_s8, %s6065_s19  ;;  %p6069_p3 = scmp.lt.u32.totalorder %s6065_s19, %s7289_s8 }
  0x2a   :  { %p6071_p4 = pnand %p6069_p3, %p6066_p2 }
  0x2c   :  { %6074 = shalt.err (!%p6071_p4)
}
  0x2d   :  { %s6075_s26 = scalar_lea.vmem %s94_s20, 6144  ;;  %p6080_p6 = scmp.lt.s32.totalorder %s94_s20, %s94_s20 }
  0x2e   :  { %p6076_p5 = scmp.ne.s32.totalorder %s94_s20, %s6075_s26  ;;  %p6081_p7 = scmp.lt.s32.totalorder %s6075_s26, %s6075_s26 }
  0x30   :  { %p6082_p8 = por %p6081_p7, %p6080_p6 }
  0x32   :  { %p6083_p9 = pnand %p6082_p8, %p6076_p5 }
  0x34   :  { %6086 = shalt.err (!%p6083_p9)
}
  0x35   :  { %99 = dma.hbm_to_vmem [thread:$0]  %s7289_s8, 6144, %s94_s20, [#allocation14], %s6212_s22, %s6212_s22, %s6213_s29  }
  0x36   :  { %s6214_s27 = smov [#allocation4]   ;;  %s6215_s1 = smov [#allocation9]  }
  0x37   :  { %s27_s28 = sshll.u32 %s6214_s27, 4  ;;  %s51_s30 = sshll.u32 %s6215_s1, 4  ;;  %s28_s28 = int_to_ptr.vmem [resolvable:$true] %s27_s28  ;;  %s52_s30 = int_to_ptr.vmem [resolvable:$true] %s51_s30 }
  0x38   :  { %s6087_s17 = scalar_lea.hbm %s7281_s0, 1024 }
  0x39   :  { %p6088_p10 = scmp.ne.s32.totalorder %s7281_s0, %s6087_s17  ;;  %p6091_p11 = scmp.lt.u32.totalorder %s6087_s17, %s7281_s0 }
  0x3b   :  { %p6093_p12 = pnand %p6091_p11, %p6088_p10 }
  0x3d   :  { %6096 = shalt.err (!%p6093_p12)
}
  0x3e   :  { %s6097_s8 = scalar_lea.vmem %s28_s28, 1024  ;;  %p6102_p0 = scmp.lt.s32.totalorder %s28_s28, %s28_s28 }
  0x3f   :  { %p6098_p13 = scmp.ne.s32.totalorder %s28_s28, %s6097_s8  ;;  %p6103_p1 = scmp.lt.s32.totalorder %s6097_s8, %s6097_s8 }
  0x41   :  { %p6104_p2 = por %p6103_p1, %p6102_p0 }
  0x43   :  { %p6105_p3 = pnand %p6104_p2, %p6098_p13 }
  0x45   :  { %6108 = shalt.err (!%p6105_p3)
}
  0x46   :  { %33 = dma.hbm_to_vmem [thread:$0]  %s7281_s0, 1024, %s28_s28, [#allocation5], %s6208_s13, %s6208_s13, %s6209_s14  }
  0x47   :  { %s6109_s18 = scalar_lea.hbm %s7283_s2, 6144 }
  0x48   :  { %p6110_p4 = scmp.ne.s32.totalorder %s7283_s2, %s6109_s18  ;;  %p6113_p5 = scmp.lt.u32.totalorder %s6109_s18, %s7283_s2 }
  0x4a   :  { %p6115_p6 = pnand %p6113_p5, %p6110_p4 }
  0x4c   :  { %6118 = shalt.err (!%p6115_p6)
}
  0x4d   :  { %s6119_s17 = scalar_lea.vmem %s52_s30, 6144  ;;  %p6124_p8 = scmp.lt.s32.totalorder %s52_s30, %s52_s30 }
  0x4e   :  { %p6120_p7 = scmp.ne.s32.totalorder %s52_s30, %s6119_s17  ;;  %p6125_p9 = scmp.lt.s32.totalorder %s6119_s17, %s6119_s17 }
  0x50   :  { %p6126_p10 = por %p6125_p9, %p6124_p8 }
  0x52   :  { %p6127_p11 = pnand %p6126_p10, %p6120_p7 }
  0x54   :  { %6130 = shalt.err (!%p6127_p11)
}
  0x55   :  { %57 = dma.hbm_to_vmem [thread:$0]  %s7283_s2, 6144, %s52_s30, [#allocation8], %s6212_s22, %s6212_s22, %s6213_s29  }
  0x56   :  { %s6216_s19 = smov [#allocation12]   ;;  %s6217_s23 = smov [#allocation15]  }
  0x57   :  { %s79_s21 = sshll.u32 %s6216_s19, 4  ;;  %s105_s24 = sshll.u32 %s6217_s23, 4  ;;  %s80_s21 = int_to_ptr.vmem [resolvable:$true] %s79_s21  ;;  %s106_s24 = int_to_ptr.vmem [resolvable:$true] %s105_s24 }
  0x58   :  { %s6131_s25 = scalar_lea.hbm %s7287_s6, 2048 }
  0x59   :  { %p6132_p12 = scmp.ne.s32.totalorder %s7287_s6, %s6131_s25  ;;  %p6135_p13 = scmp.lt.u32.totalorder %s6131_s25, %s7287_s6 }
  0x5b   :  { %p6137_p0 = pnand %p6135_p13, %p6132_p12 }
  0x5d   :  { %6140 = shalt.err (!%p6137_p0)
}
  0x5e   :  { %s6141_s2 = scalar_lea.vmem %s80_s21, 2048  ;;  %p6146_p2 = scmp.lt.s32.totalorder %s80_s21, %s80_s21 }
  0x5f   :  { %p6142_p1 = scmp.ne.s32.totalorder %s80_s21, %s6141_s2  ;;  %p6147_p3 = scmp.lt.s32.totalorder %s6141_s2, %s6141_s2 }
  0x61   :  { %p6148_p4 = por %p6147_p3, %p6146_p2 }
  0x63   :  { %p6149_p5 = pnand %p6148_p4, %p6142_p1 }
  0x65   :  { %6152 = shalt.err (!%p6149_p5)
}
  0x66   :  { %85 = dma.hbm_to_vmem [thread:$0]  %s7287_s6, 2048, %s80_s21, [#allocation11], %s6208_s13, %s6208_s13, %s6209_s14  }
  0x67   :  { %s6153_s17 = scalar_lea.hbm %s7290_s9, 6144 }
  0x68   :  { %p6154_p6 = scmp.ne.s32.totalorder %s7290_s9, %s6153_s17  ;;  %p6157_p7 = scmp.lt.u32.totalorder %s6153_s17, %s7290_s9 }
  0x6a   :  { %p6159_p8 = pnand %p6157_p7, %p6154_p6 }
  0x6c   :  { %6162 = shalt.err (!%p6159_p8)
}
  0x6d   :  { %s6163_s8 = scalar_lea.vmem %s106_s24, 6144  ;;  %p6168_p10 = scmp.lt.s32.totalorder %s106_s24, %s106_s24 }
  0x6e   :  { %p6164_p9 = scmp.ne.s32.totalorder %s106_s24, %s6163_s8  ;;  %p6169_p11 = scmp.lt.s32.totalorder %s6163_s8, %s6163_s8 }
  0x70   :  { %p6170_p12 = por %p6169_p11, %p6168_p10 }
  0x72   :  { %p6171_p13 = pnand %p6170_p12, %p6164_p9 }
  0x74   :  { %6174 = shalt.err (!%p6171_p13)
}
  0x75   :  { %111 = dma.hbm_to_vmem [thread:$0]  %s7290_s9, 6144, %s106_s24, [#allocation14], %s6212_s22, %s6212_s22, %s6213_s29  }
  0x76   :  { %6197 = dma.done.wait [#allocation5], 1024  }
  0x77   :  { %6198 = vsyncadd [#allocation5], 4294966272 }
  0x78   :  { %6199 = dma.done.wait [#allocation8], 7168  }
  0x79   :  { %6200 = vsyncadd [#allocation8], 4294960128 }
  0x7a   :  { %6201 = dma.done.wait [#allocation11], 8192  }
  0x7b   :  { %6202 = vsyncadd [#allocation11], 4294959104 }
  0x7c   :  { %6203 = dma.done.wait [#allocation14], 12288  }
  0x7d   :  { %6204 = vsyncadd [#allocation14], 4294955008  ;;  %v6218_v0 = vmov 0.0   ;;  %v146_v1 = vld [vmem:[#allocation9 + $0x8] sm:$0xff]  ;;  %v149_v2 = vld [vmem:[#allocation9 + $0x20] sm:$0xff]  ;;  %vm6220_vm0 = vmmov 0  }
  0x7e   :  { %274 = vmatprep.mubr.f32.mxu0 %v6218_v0  ;;  %v145_v3 = vld [vmem:[#allocation9] sm:$0xff]  ;;  %v4731_v4 = vpack.c.bf16 %v149_v2, %v146_v1  ;;  %v148_v5 = vld [vmem:[#allocation9 + $0x18] sm:$0xff]  ;;  %v155_v7 = vld [vmem:[#allocation9 + $0x50] sm:$0xff] }
  0x7f   :  { %v152_v6 = vld [vmem:[#allocation9 + $0x38] sm:$0xff]  ;;  %v4733_v8 = vpack.c.bf16 %v148_v5, %v145_v3  ;;  %v151_v10 = vld [vmem:[#allocation9 + $0x30] sm:$0xff]  ;;  %v154_v11 = vld [vmem:[#allocation9 + $0x48] sm:$0xff] }
  0x80   :  { %v4735_v9 = vpack.c.bf16 %v155_v7, %v152_v6  ;;  %v158_v12 = vld [vmem:[#allocation9 + $0x68] sm:$0xff]  ;;  %4732 = vmatprep.subr.bf16.mxu0 %v4731_v4  ;;  %v161_v13 = vld [vmem:[#allocation9 + $0x80] sm:$0xff]  ;;  %v4737_v14 = vpack.c.bf16 %v154_v11, %v151_v10  ;;  %v160_v17 = vld [vmem:[#allocation9 + $0x78] sm:$0xff] }
  0x81   :  { %4734 = vmatpush1.bf16.msra.mxu0 %v4733_v8  ;;  %v4739_v15 = vpack.c.bf16 %v161_v13, %v158_v12  ;;  %v157_v16 = vld [vmem:[#allocation9 + $0x60] sm:$0xff]  ;;  %v164_v18 = vld [vmem:[#allocation9 + $0x98] sm:$0xff]  ;;  %v167_v19 = vld [vmem:[#allocation9 + $0xb0] sm:$0xff] }
  0x82   :  { %4736 = vmatprep.subr.bf16.mxu0 %v4735_v9  ;;  %v4741_v20 = vpack.c.bf16 %v160_v17, %v157_v16  ;;  %v163_v21 = vld [vmem:[#allocation9 + $0x90] sm:$0xff]  ;;  %v4743_v22 = vpack.c.bf16 %v167_v19, %v164_v18  ;;  %v166_v23 = vld [vmem:[#allocation9 + $0xa8] sm:$0xff]  ;;  %v173_v27 = vld [vmem:[#allocation9 + $0xe0] sm:$0xff] }
  0x83   :  { %v147_v24 = vld [vmem:[#allocation9 + $0x10] sm:$0xff]  ;;  %v150_v25 = vld [vmem:[#allocation9 + $0x28] sm:$0xff]  ;;  %v153_v29 = vld [vmem:[#allocation9 + $0x40] sm:$0xff]  ;;  %v4745_v31 = vpack.c.bf16 %v166_v23, %v163_v21 }
  0x84   :  { %v170_v26 = vld [vmem:[#allocation9 + $0xc8] sm:$0xff]  ;;  %v4763_v28 = vpack.c.bf16 %v150_v25, %v147_v24  ;;  %v156_v30 = vld [vmem:[#allocation9 + $0x58] sm:$0xff]  ;;  %v169_v32 = vld [vmem:[#allocation9 + $0xc0] sm:$0xff] }
  0x85   :  { %4738 = vmatpush1.bf16.msra.mxu0 %v4737_v14  ;;  %v4767_v33 = vpack.c.bf16 %v156_v30, %v153_v29  ;;  %v4747_v34 = vpack.c.bf16 %v173_v27, %v170_v26  ;;  %v172_v35 = vld [vmem:[#allocation9 + $0xd8] sm:$0xff]  ;;  %v6393_v36 = vld [vmem:[#allocation4] sm:$0xff]  ;;  %v159_v37 = vld [vmem:[#allocation9 + $0x70] sm:$0xff] }
  0x86   :  { %4740 = vmatprep.subr.bf16.mxu0 %v4739_v15  ;;  %4764 = vmatprep.subr.bf16.mxu1 %v4763_v28  ;;  %v176_v38 = vld [vmem:[#allocation9 + $0xf8] sm:$0xff]  ;;  %v179_v39 = vld [vmem:[#allocation9 + $0x110] sm:$0xff]  ;;  %v162_v40 = vld [vmem:[#allocation9 + $0x88] sm:$0xff]  ;;  %v4749_v42 = vpack.c.bf16 %v172_v35, %v169_v32 }
  0x87   :  { %4766 = vmatpush3.bf16.msra.mxu1 %v4763_v28  ;;  %4080 = vmatprep.mubr.f32.mxu1 %v6393_v36  ;;  %v4771_v41 = vpack.c.bf16 %v162_v40, %v159_v37  ;;  %v165_v43 = vld [vmem:[#allocation9 + $0xa0] sm:$0xff]  ;;  %v168_v44 = vld [vmem:[#allocation9 + $0xb8] sm:$0xff]  ;;  %v4751_v45 = vpack.c.bf16 %v179_v39, %v176_v38  ;;  %v175_v46 = vld [vmem:[#allocation9 + $0xf0] sm:$0xff] }
  0x88   :  { %4768 = vmatprep.subr.bf16.mxu1 %v4767_v33  ;;  %v178_v47 = vld [vmem:[#allocation9 + $0x108] sm:$0xff]  ;;  %v185_v49 = vld [vmem:[#allocation9 + $0x140] sm:$0xff]  ;;  %v4775_v50 = vpack.c.bf16 %v168_v44, %v165_v43  ;;  %v171_v51 = vld [vmem:[#allocation9 + $0xd0] sm:$0xff] }
  0x89   :  { %4742 = vmatpush1.bf16.msra.mxu0 %v4741_v20  ;;  %v182_v48 = vld [vmem:[#allocation9 + $0x128] sm:$0xff]  ;;  %v4753_v53 = vpack.c.bf16 %v178_v47, %v175_v46  ;;  %v181_v55 = vld [vmem:[#allocation9 + $0x120] sm:$0xff]  ;;  %v184_v56 = vld [vmem:[#allocation9 + $0x138] sm:$0xff] }
  0x8a   :  { %4744 = vmatprep.subr.bf16.mxu0 %v4743_v22  ;;  %v174_v52 = vld [vmem:[#allocation9 + $0xe8] sm:$0xff]  ;;  %v4755_v54 = vpack.c.bf16 %v185_v49, %v182_v48  ;;  %v188_v57 = vld [vmem:[#allocation9 + $0x158] sm:$0xff]  ;;  %v191_v58 = vld [vmem:[#allocation9 + $0x170] sm:$0xff]  ;;  %v4757_v62 = vpack.c.bf16 %v184_v56, %v181_v55 }
  0x8b   :  { %4770 = vmatpush3.bf16.msra.mxu1 %v4767_v33  ;;  %v4779_v59 = vpack.c.bf16 %v174_v52, %v171_v51  ;;  %v177_v60 = vld [vmem:[#allocation9 + $0x100] sm:$0xff]  ;;  %v180_v61 = vld [vmem:[#allocation9 + $0x118] sm:$0xff]  ;;  %v4759_v63 = vpack.c.bf16 %v191_v58, %v188_v57  ;;  %v187_v1 = vld [vmem:[#allocation9 + $0x150] sm:$0xff] }
  0x8c   :  { %4772 = vmatprep.subr.bf16.mxu1 %v4771_v41  ;;  %v190_v2 = vld [vmem:[#allocation9 + $0x168] sm:$0xff]  ;;  %v464_v4 = vld [vmem:[#allocation13 + $0x20] sm:$0xff]  ;;  %v4783_v5 = vpack.c.bf16 %v180_v61, %v177_v60  ;;  %v183_v6 = vld [vmem:[#allocation9 + $0x130] sm:$0xff] }
  0x8d   :  { %4746 = vmatpush1.bf16.msra.mxu0 %v4745_v31  ;;  %v461_v3 = vld [vmem:[#allocation13 + $0x8] sm:$0xff]  ;;  %v4761_v8 = vpack.c.bf16 %v190_v2, %v187_v1  ;;  %v460_v10 = vld [vmem:[#allocation13] sm:$0xff]  ;;  %v463_v11 = vld [vmem:[#allocation13 + $0x18] sm:$0xff] }
  0x8e   :  { %4748 = vmatprep.subr.bf16.mxu0 %v4747_v34  ;;  %v186_v7 = vld [vmem:[#allocation9 + $0x148] sm:$0xff]  ;;  %v4795_v9 = vpack.c.bf16 %v464_v4, %v461_v3  ;;  %v467_v12 = vld [vmem:[#allocation13 + $0x38] sm:$0xff]  ;;  %v470_v13 = vld [vmem:[#allocation13 + $0x50] sm:$0xff]  ;;  %v4797_v17 = vpack.c.bf16 %v463_v11, %v460_v10 }
  0x8f   :  { %4774 = vmatpush3.bf16.msra.mxu1 %v4771_v41  ;;  %v4787_v14 = vpack.c.bf16 %v186_v7, %v183_v6  ;;  %v189_v15 = vld [vmem:[#allocation9 + $0x160] sm:$0xff]  ;;  %v192_v16 = vld [vmem:[#allocation9 + $0x178] sm:$0xff]  ;;  %v4799_v18 = vpack.c.bf16 %v470_v13, %v467_v12  ;;  %v466_v19 = vld [vmem:[#allocation13 + $0x30] sm:$0xff] }
  0x90   :  { %4776 = vmatprep.subr.bf16.mxu1 %v4775_v50  ;;  %v469_v20 = vld [vmem:[#allocation13 + $0x48] sm:$0xff]  ;;  %v476_v22 = vld [vmem:[#allocation13 + $0x80] sm:$0xff]  ;;  %v4791_v23 = vpack.c.bf16 %v192_v16, %v189_v15  ;;  %v462_v24 = vld [vmem:[#allocation13 + $0x10] sm:$0xff] }
  0x91   :  { %4750 = vmatpush1.bf16.msra.mxu0 %v4749_v42  ;;  %v473_v21 = vld [vmem:[#allocation13 + $0x68] sm:$0xff]  ;;  %v4801_v27 = vpack.c.bf16 %v469_v20, %v466_v19  ;;  %v472_v29 = vld [vmem:[#allocation13 + $0x60] sm:$0xff]  ;;  %v475_v30 = vld [vmem:[#allocation13 + $0x78] sm:$0xff] }
  0x92   :  { %4752 = vmatprep.subr.bf16.mxu0 %v4751_v45  ;;  %v465_v25 = vld [vmem:[#allocation13 + $0x28] sm:$0xff]  ;;  %v4803_v28 = vpack.c.bf16 %v476_v22, %v473_v21  ;;  %v479_v31 = vld [vmem:[#allocation13 + $0x98] sm:$0xff]  ;;  %v482_v32 = vld [vmem:[#allocation13 + $0xb0] sm:$0xff]  ;;  %v4805_v35 = vpack.c.bf16 %v475_v30, %v472_v29 }
  0x93   :  { %4778 = vmatpush3.bf16.msra.mxu1 %v4775_v50  ;;  %v138_v26 = vld [vmem:[#allocation4 + $0x8] sm:$0xff]  ;;  %v4827_v33 = vpack.c.bf16 %v465_v25, %v462_v24  ;;  %v139_v34 = vld [vmem:[#allocation4 + $0x10] sm:$0xff]  ;;  %v471_v37 = vld [vmem:[#allocation13 + $0x58] sm:$0xff]  ;;  %v4807_v38 = vpack.c.bf16 %v482_v32, %v479_v31 }
  0x94   :  { %4780 = vmatprep.subr.bf16.mxu1 %v4779_v59  ;;  %v478_v39 = vld [vmem:[#allocation13 + $0x90] sm:$0xff]  ;;  %v481_v40 = vld [vmem:[#allocation13 + $0xa8] sm:$0xff]  ;;  %v488_v42 = vld [vmem:[#allocation13 + $0xe0] sm:$0xff] }
  0x95   :  { %4754 = vmatpush1.bf16.msra.mxu0 %v4753_v53  ;;  %v485_v41 = vld [vmem:[#allocation13 + $0xc8] sm:$0xff]  ;;  %v140_v44 = vld [vmem:[#allocation4 + $0x18] sm:$0xff]  ;;  %v4809_v45 = vpack.c.bf16 %v481_v40, %v478_v39  ;;  %v474_v46 = vld [vmem:[#allocation13 + $0x70] sm:$0xff] }
  0x96   :  { %4756 = vmatprep.subr.bf16.mxu0 %v4755_v54  ;;  %v477_v47 = vld [vmem:[#allocation13 + $0x88] sm:$0xff]  ;;  %v4811_v48 = vpack.c.bf16 %v488_v42, %v485_v41  ;;  %v484_v49 = vld [vmem:[#allocation13 + $0xc0] sm:$0xff]  ;;  %v487_v50 = vld [vmem:[#allocation13 + $0xd8] sm:$0xff] }
  0x97   :  { %4782 = vmatpush3.bf16.msra.mxu1 %v4779_v59  ;;  %v491_v51 = vld [vmem:[#allocation13 + $0xf8] sm:$0xff]  ;;  %v494_v52 = vld [vmem:[#allocation13 + $0x110] sm:$0xff]  ;;  %v4835_v53 = vpack.c.bf16 %v477_v47, %v474_v46  ;;  %v141_v54 = vld [vmem:[#allocation4 + $0x20] sm:$0xff]  ;;  %v4813_v55 = vpack.c.bf16 %v487_v50, %v484_v49 }
  0x98   :  { %4784 = vmatprep.subr.bf16.mxu1 %v4783_v5  ;;  %v480_v56 = vld [vmem:[#allocation13 + $0xa0] sm:$0xff]  ;;  %v483_v57 = vld [vmem:[#allocation13 + $0xb8] sm:$0xff]  ;;  %v4815_v58 = vpack.c.bf16 %v494_v52, %v491_v51  ;;  %v490_v59 = vld [vmem:[#allocation13 + $0xf0] sm:$0xff] }
  0x99   :  { %4758 = vmatpush1.bf16.msra.mxu0 %v4757_v62  ;;  %v493_v60 = vld [vmem:[#allocation13 + $0x108] sm:$0xff]  ;;  %v500_v62 = vld [vmem:[#allocation13 + $0x140] sm:$0xff]  ;;  %v486_v3 = vld [vmem:[#allocation13 + $0xd0] sm:$0xff] }
  0x9a   :  { %4760 = vmatprep.subr.bf16.mxu0 %v4759_v63  ;;  %v497_v61 = vld [vmem:[#allocation13 + $0x128] sm:$0xff]  ;;  %v4839_v63 = vpack.c.bf16 %v483_v57, %v480_v56  ;;  %v4817_v2 = vpack.c.bf16 %v493_v60, %v490_v59  ;;  %v496_v7 = vld [vmem:[#allocation13 + $0x120] sm:$0xff]  ;;  %v506_v10 = vld [vmem:[#allocation13 + $0x170] sm:$0xff] }
  0x9b   :  { %4786 = vmatpush3.bf16.msra.mxu1 %v4783_v5  ;;  %v142_v1 = vld [vmem:[#allocation4 + $0x28] sm:$0xff]  ;;  %v143_v5 = vld [vmem:[#allocation4 + $0x30] sm:$0xff]  ;;  %v4819_v6 = vpack.c.bf16 %v500_v62, %v497_v61  ;;  %v144_v13 = vld [vmem:[#allocation4 + $0x38] sm:$0xff] }
  0x9c   :  { %4788 = vmatprep.subr.bf16.mxu1 %v4787_v14  ;;  %v489_v4 = vld [vmem:[#allocation13 + $0xe8] sm:$0xff]  ;;  %v495_v15 = vld [vmem:[#allocation13 + $0x118] sm:$0xff]  ;;  %v452_v19 = vld [vmem:[#allocation7] sm:$0xff] }
  0x9d   :  { %4762 = vmatpush1.bf16.msra.mxu0 %v4761_v8  ;;  %v499_v8 = vld [vmem:[#allocation13 + $0x138] sm:$0xff]  ;;  %v4843_v11 = vpack.c.bf16 %v489_v4, %v486_v3  ;;  %v768_v20 = vld [vmem:[#allocation10 + $0x8] sm:$0xff]  ;;  %v771_v21 = vld [vmem:[#allocation10 + $0x20] sm:$0xff] }
  0x9e   :  { %4796 = vmatprep.subr.bf16.mxu0 %v4795_v9  ;;  %v503_v9 = vld [vmem:[#allocation13 + $0x158] sm:$0xff]  ;;  %v4821_v12 = vpack.c.bf16 %v499_v8, %v496_v7  ;;  %v498_v24 = vld [vmem:[#allocation13 + $0x130] sm:$0xff]  ;;  %v501_v25 = vld [vmem:[#allocation13 + $0x148] sm:$0xff] }
  0x9f   :  { %4790 = vmatpush3.bf16.msra.mxu1 %v4787_v14  ;;  %v492_v14 = vld [vmem:[#allocation13 + $0x100] sm:$0xff]  ;;  %v4823_v16 = vpack.c.bf16 %v506_v10, %v503_v9  ;;  %v774_v29 = vld [vmem:[#allocation10 + $0x38] sm:$0xff]  ;;  %v777_v30 = vld [vmem:[#allocation10 + $0x50] sm:$0xff]  ;;  %v4851_v31 = vpack.c.bf16 %v501_v25, %v498_v24 }
  0xa0   :  { %275 = vmatmul.mubr.f32.vlgmr.msra.gmra.mrb[0].mxu0 %v6393_v36  ;;  %4792 = vmatprep.subr.bf16.mxu1 %v4791_v23  ;;  %v468_v36 = vld [vmem:[#allocation13 + $0x40] sm:$0xff]  ;;  %v4847_v22 = vpack.c.bf16 %v495_v15, %v492_v14  ;;  %v453_v41 = vld [vmem:[#allocation7 + $0x8] sm:$0xff]  ;;  %v786_v46 = vld [vmem:[#allocation10 + $0x98] sm:$0xff] }
  0xa1   :  { %4798 = vmatpush1.bf16.msra.mxu0 %v4797_v17  ;;  %280 = vmatprep.mubr.f32.mxu0 %v6218_v0  ;;  %v4831_v43 = vpack.c.bf16 %v471_v37, %v468_v36  ;;  %v502_v17 = vld [vmem:[#allocation13 + $0x150] sm:$0xff]  ;;  %v776_v37 = vld [vmem:[#allocation10 + $0x48] sm:$0xff]  ;;  %v783_v39 = vld [vmem:[#allocation10 + $0x80] sm:$0xff] }
  0xa2   :  { %4800 = vmatprep.subr.bf16.mxu0 %v4799_v18  ;;  %v505_v18 = vld [vmem:[#allocation13 + $0x168] sm:$0xff]  ;;  %v773_v36 = vld [vmem:[#allocation10 + $0x30] sm:$0xff]  ;;  %v795_v56 = vld [vmem:[#allocation10 + $0xe0] sm:$0xff] }
  0xa3   :  { %4794 = vmatpush3.bf16.msra.mxu1 %v4791_v23  ;;  %v4825_v23 = vpack.c.bf16 %v505_v18, %v502_v17  ;;  %v6414_v42 = vpack.c.bf16 %v776_v37, %v773_v36  ;;  %v789_v47 = vld [vmem:[#allocation10 + $0xb0] sm:$0xff]  ;;  %v772_v49 = vld [vmem:[#allocation10 + $0x28] sm:$0xff]  ;;  %v775_v59 = vld [vmem:[#allocation10 + $0x40] sm:$0xff] }
  0xa4   :  { %281 = vmatmul.mubr.f32.gmra.mrb[2].mxu0 %v138_v26  ;;  %4828 = vmatprep.subr.bf16.mxu1 %v4827_v33  ;;  %v454_v50 = vld [vmem:[#allocation7 + $0x10] sm:$0xff]  ;;  %v6424_v52 = vpack.c.bf16 %v789_v47, %v786_v46  ;;  %v778_v60 = vld [vmem:[#allocation10 + $0x58] sm:$0xff]  ;;  %v784_v7 = vld [vmem:[#allocation10 + $0x88] sm:$0xff] }
  0xa5   :  { %4802 = vmatpush1.bf16.msra.mxu0 %v4801_v27  ;;  %286 = vmatprep.mubr.f32.mxu0 %v6218_v0  ;;  %v767_v27 = vld [vmem:[#allocation10] sm:$0xff]  ;;  %v455_v61 = vld [vmem:[#allocation7 + $0x18] sm:$0xff]  ;;  %v801_v4 = vld [vmem:[#allocation10 + $0x110] sm:$0xff] }
  0xa6   :  { %4804 = vmatprep.subr.bf16.mxu0 %v4803_v28  ;;  %4081 = vmatmul.mubr.f32.vlgmr.msra.gmra.mrb[0].mxu1 %v138_v26  ;;  %v6404_v26 = vpack.c.bf16 %v771_v21, %v768_v20  ;;  %v770_v28 = vld [vmem:[#allocation10 + $0x18] sm:$0xff]  ;;  %v456_v8 = vld [vmem:[#allocation7 + $0x20] sm:$0xff]  ;;  %v457_v18 = vld [vmem:[#allocation7 + $0x28] sm:$0xff] }
  0xa7   :  { %4830 = vmatpush3.bf16.msra.mxu1 %v4827_v33  ;;  %4083 = vmatprep.mubr.f32.mxu1 %v139_v34  ;;  %v6407_v32 = vpack.c.bf16 %v770_v28, %v767_v27  ;;  %v504_v33 = vld [vmem:[#allocation13 + $0x160] sm:$0xff]  ;;  %v798_v3 = vld [vmem:[#allocation10 + $0xf8] sm:$0xff]  ;;  %v458_v20 = vld [vmem:[#allocation7 + $0x30] sm:$0xff] }
  0xa8   :  { %287 = vmatmul.mubr.f32.gmra.mrb[4].mxu0 %v139_v34  ;;  %4832 = vmatprep.subr.bf16.mxu1 %v4831_v43  ;;  %v507_v34 = vld [vmem:[#allocation13 + $0x178] sm:$0xff]  ;;  %v6445_v10 = vpack.c.bf16 %v801_v4, %v798_v3  ;;  %v807_v14 = vld [vmem:[#allocation10 + $0x140] sm:$0xff]  ;;  %v813_v25 = vld [vmem:[#allocation10 + $0x170] sm:$0xff] }
  0xa9   :  { %4806 = vmatpush1.bf16.msra.mxu0 %v4805_v35  ;;  %292 = vmatprep.mubr.f32.mxu0 %v6218_v0  ;;  %v6410_v35 = vpack.c.bf16 %v777_v30, %v774_v29  ;;  %v4855_v40 = vpack.c.bf16 %v507_v34, %v504_v33  ;;  %v790_v17 = vld [vmem:[#allocation10 + $0xb8] sm:$0xff]  ;;  %v793_v28 = vld [vmem:[#allocation10 + $0xd0] sm:$0xff]  ;;  %v796_v29 = vld [vmem:[#allocation10 + $0xe8] sm:$0xff] }
  0xaa   :  { %4808 = vmatprep.subr.bf16.mxu0 %v4807_v38  ;;  %4084 = vmatmul.mubr.f32.gmra.mrb[2].mxu1 %v140_v44  ;;  %v780_v38 = vld [vmem:[#allocation10 + $0x68] sm:$0xff]  ;;  %v810_v24 = vld [vmem:[#allocation10 + $0x158] sm:$0xff]  ;;  %v809_v34 = vld [vmem:[#allocation10 + $0x150] sm:$0xff]  ;;  %v6470_v37 = vpack.c.bf16 %v796_v29, %v793_v28 }
  0xab   :  { %4834 = vmatpush3.bf16.msra.mxu1 %v4831_v43  ;;  %4086 = vmatprep.mubr.f32.mxu1 %v141_v54  ;;  %v6417_v43 = vpack.c.bf16 %v783_v39, %v780_v38  ;;  %v6467_v33 = vpack.c.bf16 %v813_v25, %v810_v24  ;;  %v812_v36 = vld [vmem:[#allocation10 + $0x168] sm:$0xff]  ;;  %v799_v38 = vld [vmem:[#allocation10 + $0x100] sm:$0xff]  ;;  %v802_v39 = vld [vmem:[#allocation10 + $0x118] sm:$0xff] }
  0xac   :  { %293 = vmatmul.mubr.f32.gmra.mrb[6].mxu0 %v140_v44  ;;  %4836 = vmatprep.subr.bf16.mxu1 %v4835_v53  ;;  %v779_v44 = vld [vmem:[#allocation10 + $0x60] sm:$0xff] }
  0xad   :  { %4810 = vmatpush1.bf16.msra.mxu0 %v4809_v45  ;;  %298 = vmatprep.mubr.f32.mxu0 %v6218_v0  ;;  %v782_v45 = vld [vmem:[#allocation10 + $0x78] sm:$0xff]  ;;  %v811_v47 = vld [vmem:[#allocation10 + $0x160] sm:$0xff] }
  0xae   :  { %4812 = vmatprep.subr.bf16.mxu0 %v4811_v48  ;;  %4087 = vmatmul.mubr.f32.gmra.mrb[4].mxu1 %v142_v1  ;;  %v769_v48 = vld [vmem:[#allocation10 + $0x10] sm:$0xff]  ;;  %v6421_v51 = vpack.c.bf16 %v782_v45, %v779_v44  ;;  %v808_v45 = vld [vmem:[#allocation10 + $0x148] sm:$0xff] }
  0xaf   :  { %4838 = vmatpush3.bf16.msra.mxu1 %v4835_v53  ;;  %4089 = vmatprep.mubr.f32.mxu1 %v143_v5  ;;  %v785_v53 = vld [vmem:[#allocation10 + $0x90] sm:$0xff]  ;;  %v6426_v57 = vpack.c.bf16 %v772_v49, %v769_v48  ;;  %v814_v48 = vld [vmem:[#allocation10 + $0x178] sm:$0xff] }
  0xb0   :  { %299 = vmatmul.mubr.f32.gmra.mrb[8].mxu0 %v141_v54  ;;  %4840 = vmatprep.subr.bf16.mxu1 %v4839_v63  ;;  %v788_v54 = vld [vmem:[#allocation10 + $0xa8] sm:$0xff]  ;;  %v805_v44 = vld [vmem:[#allocation10 + $0x130] sm:$0xff]  ;;  %v6496_v49 = vpack.c.bf16 %v814_v48, %v811_v47 }
  0xb1   :  { %4814 = vmatpush1.bf16.msra.mxu0 %v4813_v55  ;;  %304 = vmatprep.mubr.f32.mxu0 %v6218_v0  ;;  %v792_v55 = vld [vmem:[#allocation10 + $0xc8] sm:$0xff]  ;;  %v6431_v62 = vpack.c.bf16 %v788_v54, %v785_v53  ;;  %v6488_v46 = vpack.c.bf16 %v808_v45, %v805_v44 }
  0xb2   :  { %4816 = vmatprep.subr.bf16.mxu0 %v4815_v58  ;;  %4090 = vmatmul.mubr.f32.gmra.mrb[6].mxu1 %v144_v13  ;;  %v6219_v58 = vmov 0.0|0.0  }
  0xb3   :  { %4842 = vmatpush3.bf16.msra.mxu1 %v4839_v63  ;;  %4124 = vmatprep.mubr.f32.mxu1 %v452_v19  ;;  %v6434_v63 = vpack.c.bf16 %v795_v56, %v792_v55  ;;  %v193_v55 = vld [vmem:[%s7285_s4] sm:$0x7] }
  0xb4   :  { %305 = vmatmul.mubr.f32.gmra.mrb[10].mxu0 %v142_v1  ;;  %4844 = vmatprep.subr.bf16.mxu1 %v4843_v11  ;;  %v791_v1 = vld [vmem:[#allocation10 + $0xc0] sm:$0xff] }
  0xb5   :  { %4818 = vmatpush1.bf16.msra.mxu0 %v4817_v2  ;;  %310 = vmatprep.mubr.f32.mxu0 %v6218_v0  ;;  %v794_v2 = vld [vmem:[#allocation10 + $0xd8] sm:$0xff] }
  0xb6   :  { %4820 = vmatprep.subr.bf16.mxu0 %v4819_v6  ;;  %v781_v6 = vld [vmem:[#allocation10 + $0x70] sm:$0xff]  ;;  %v6442_v9 = vpack.c.bf16 %v794_v2, %v791_v1 }
  0xb7   :  { %4846 = vmatpush3.bf16.msra.mxu1 %v4843_v11  ;;  %v797_v11 = vld [vmem:[#allocation10 + $0xf0] sm:$0xff]  ;;  %v6448_v15 = vpack.c.bf16 %v784_v7, %v781_v6 }
  0xb8   :  { %311 = vmatmul.mubr.f32.gmra.mrb[12].mxu0 %v143_v5  ;;  %4848 = vmatprep.subr.bf16.mxu1 %v4847_v22  ;;  %v6437_v5 = vpack.c.bf16 %v778_v60, %v775_v59 }
  0xb9   :  { %4822 = vmatpush1.bf16.msra.mxu0 %v4821_v12  ;;  %316 = vmatprep.mubr.f32.mxu0 %v6218_v0  ;;  %v800_v12 = vld [vmem:[#allocation10 + $0x108] sm:$0xff] }
  0xba   :  { %4824 = vmatprep.subr.bf16.mxu0 %v4823_v16  ;;  %v787_v16 = vld [vmem:[#allocation10 + $0xa0] sm:$0xff] }
  0xbb   :  { %4850 = vmatpush3.bf16.msra.mxu1 %v4847_v22  ;;  %v803_v22 = vld [vmem:[#allocation10 + $0x120] sm:$0xff]  ;;  %v6459_v27 = vpack.c.bf16 %v790_v17, %v787_v16 }
  0xbc   :  { %317 = vmatmul.mubr.f32.gmra.mrb[14].mxu0 %v144_v13  ;;  %4852 = vmatprep.subr.bf16.mxu1 %v4851_v31  ;;  %v804_v13 = vld [vmem:[#allocation10 + $0x128] sm:$0xff]  ;;  %v508_v17 = vld [vmem:[%s7291_s10] sm:$0x7] }
  0xbd   :  { %4826 = vmatpush1.bf16.msra.mxu0 %v4825_v23  ;;  %589 = vmatprep.mubr.f32.mxu0 %v6218_v0  ;;  %v6456_v21 = vpack.c.bf16 %v807_v14, %v804_v13  ;;  %v806_v23 = vld [vmem:[#allocation10 + $0x138] sm:$0xff] }
  0xbe   :  { %4860 = vmatprep.subr.bf16.mxu0 %v6404_v26  ;;  %v6464_v30 = vpack.c.bf16 %v806_v23, %v803_v22 }
  0xbf   :  { %4854 = vmatpush3.bf16.msra.mxu1 %v4851_v31  ;;  %v459_v31 = vld [vmem:[#allocation7 + $0x38] sm:$0xff] }
  0xc0   :  { %590 = vmatmul.mubr.f32.vlgmr.msra.gmra.mrb[16].mxu0 %v452_v19  ;;  %4856 = vmatprep.subr.bf16.mxu1 %v4855_v40  ;;  %v6453_v19 = vpack.c.bf16 %v800_v12, %v797_v11 }
  0xc1   :  { %4862 = vmatpush1.bf16.msra.mxu0 %v6407_v32  ;;  %595 = vmatprep.mubr.f32.mxu0 %v6218_v0 }
  0xc2   :  { %4864 = vmatprep.subr.bf16.mxu0 %v6410_v35 }
  0xc3   :  { %4858 = vmatpush3.bf16.msra.mxu1 %v4855_v40  ;;  %v6477_v40 = vpack.c.bf16 %v812_v36, %v809_v34 }
  0xc4   :  { %596 = vmatmul.mubr.f32.gmra.mrb[18].mxu0 %v453_v41  ;;  %4891 = vmatprep.subr.bf16.mxu1 %v6219_v58 }
  0xc5   :  { %4866 = vmatpush1.bf16.msra.mxu0 %v6414_v42  ;;  %601 = vmatprep.mubr.f32.mxu0 %v6218_v0 }
  0xc6   :  { %4868 = vmatprep.subr.bf16.mxu0 %v6417_v43  ;;  %4125 = vmatmul.mubr.f32.vlgmr.msra.gmra.mrb[8].mxu1 %v453_v41  ;;  %v6481_v41 = vpack.c.bf16 %v802_v39, %v799_v38 }
  0xc7   :  { %4893 = vmatpush3.bf16.msra.mxu1 %v6426_v57  ;;  %4127 = vmatprep.mubr.f32.mxu1 %v454_v50 }
  0xc8   :  { %602 = vmatmul.mubr.f32.gmra.mrb[20].mxu0 %v454_v50  ;;  %4894 = vmatprep.subr.bf16.mxu1 %v6219_v58  ;;  %v195_v50 = vlaneseq }
  0xc9   :  { %4870 = vmatpush1.bf16.msra.mxu0 %v6421_v51  ;;  %607 = vmatprep.mubr.f32.mxu0 %v6218_v0 }
  0xca   :  { %4872 = vmatprep.subr.bf16.mxu0 %v6424_v52  ;;  %4128 = vmatmul.mubr.f32.gmra.mrb[10].mxu1 %v455_v61  ;;  %v6534_v53 = vshrl.u32 %v195_v50, 7 }
  0xcb   :  { %4896 = vmatpush3.bf16.msra.mxu1 %v6437_v5  ;;  %4130 = vmatprep.mubr.f32.mxu1 %v456_v8 }
  0xcc   :  { %608 = vmatmul.mubr.f32.gmra.mrb[22].mxu0 %v455_v61  ;;  %4897 = vmatprep.subr.bf16.mxu1 %v6219_v58  ;;  %v205_v54 = vsub.s32 2, %v6534_v53  ;;  %v197_v48 = vsub.s32 0, %v6534_v53  ;;  %v7294_v50 = vsub.s32 1, %v6534_v53 }
  0xcd   :  { %4874 = vmatpush1.bf16.msra.mxu0 %v6431_v62  ;;  %613 = vmatprep.mubr.f32.mxu0 %v6218_v0 }
  0xce   :  { %4876 = vmatprep.subr.bf16.mxu0 %v6434_v63  ;;  %4131 = vmatmul.mubr.f32.gmra.mrb[12].mxu1 %v457_v18  ;;  %v206_v56 = vrot.slane %v193_v55, %v205_v54 }
  0xcf   :  { %4899 = vmatpush3.bf16.msra.mxu1 %v6448_v15  ;;  %4133 = vmatprep.mubr.f32.mxu1 %v458_v20 }
  0xd0   :  { %614 = vmatmul.mubr.f32.gmra.mrb[24].mxu0 %v456_v8  ;;  %4900 = vmatprep.subr.bf16.mxu1 %v6219_v58 }
  0xd1   :  { %4878 = vmatpush1.bf16.msra.mxu0 %v6442_v9  ;;  %619 = vmatprep.mubr.f32.mxu0 %v6218_v0 }
  0xd2   :  { %4880 = vmatprep.subr.bf16.mxu0 %v6445_v10  ;;  %4134 = vmatmul.mubr.f32.gmra.mrb[14].mxu1 %v459_v31 }
  0xd3   :  { %4902 = vmatpush3.bf16.msra.mxu1 %v6459_v27  ;;  %4168 = vmatprep.mubr.msk.f32.mxu1 %vm6220_vm0, %v6218_v0 }
  0xd4   :  { %620 = vmatmul.mubr.f32.gmra.mrb[26].mxu0 %v457_v18  ;;  %4903 = vmatprep.subr.bf16.mxu1 %v6219_v58  ;;  %v6557_v18 = vrot.slane %v508_v17, %v205_v54  ;;  %v6586_v54 = vrot.slane %v193_v55, %v197_v48 }
  0xd5   :  { %4882 = vmatpush1.bf16.msra.mxu0 %v6453_v19  ;;  %625 = vmatprep.mubr.f32.mxu0 %v6218_v0 }
  0xd6   :  { %4884 = vmatprep.subr.bf16.mxu0 %v6456_v21 }
  0xd7   :  { %4905 = vmatpush3.bf16.msra.mxu1 %v6470_v37 }
  0xd8   :  { %626 = vmatmul.mubr.f32.gmra.mrb[28].mxu0 %v458_v20  ;;  %4906 = vmatprep.subr.bf16.mxu1 %v6219_v58 }
  0xd9   :  { %4886 = vmatpush1.bf16.msra.mxu0 %v6464_v30  ;;  %631 = vmatprep.mubr.f32.mxu0 %v6218_v0 }
  0xda   :  { %4888 = vmatprep.subr.bf16.mxu0 %v6467_v33 }
  0xdb   :  { %4908 = vmatpush3.bf16.msra.mxu1 %v6481_v41 }
  0xdc   :  { %632 = vmatmul.mubr.f32.gmra.mrb[30].mxu0 %v459_v31  ;;  %4909 = vmatprep.subr.bf16.mxu1 %v6219_v58 }
  0xdd   :  { %4890 = vmatpush1.bf16.msra.mxu0 %v6477_v40  ;;  %883 = vmatprep.mubr.f32.mxu0 %v6218_v0 }
  0xde   :  { %4916 = vmatprep.subr.bf16.mxu0 %v6404_v26 }
  0xdf   :  { %4911 = vmatpush3.bf16.msra.mxu1 %v6488_v46 }
  0xe0   :  { %884 = vmatmul.mubr.f32.vlgmr.msra.gmra.mrb[0].mxu0 %v6218_v0  ;;  %4912 = vmatprep.subr.bf16.mxu1 %v6219_v58 }
  0xe1   :  { %4918 = vmatpush1.bf16.msra.mxu0 %v6407_v32  ;;  %1056 = vmatprep.mubr.f32.mxu0 %v6218_v0 }
  0xe2   :  { %4920 = vmatprep.subr.bf16.mxu0 %v6410_v35 }
  0xe3   :  { %4914 = vmatpush3.bf16.msra.mxu1 %v6496_v49 }
  0xe4   :  { %4947 = vmatprep.subr.bf16.mxu1 %v6219_v58 }
  0xe5   :  { %4922 = vmatpush1.bf16.msra.mxu0 %v6414_v42 }
  0xe6   :  { %4924 = vmatprep.subr.bf16.mxu0 %v6417_v43  ;;  %4169 = vmatmul.mubr.f32.vlgmr.msra.gmra.mrb[16].mxu1 %v6218_v0 }
  0xe7   :  { %4949 = vmatpush3.bf16.msra.mxu1 %v6426_v57  ;;  %4203 = vmatprep.mubr.msk.f32.mxu1 %vm6220_vm0, %v6218_v0 }
  0xe8   :  { %4950 = vmatprep.subr.bf16.mxu1 %v6219_v58 }
  0xe9   :  { %4926 = vmatpush1.bf16.msra.mxu0 %v6421_v51 }
  0xea   :  { %4928 = vmatprep.subr.bf16.mxu0 %v6424_v52 }
  0xeb   :  { %4952 = vmatpush3.bf16.msra.mxu1 %v6437_v5 }
  0xec   :  { %4953 = vmatprep.subr.bf16.mxu1 %v6219_v58 }
  0xed   :  { %4930 = vmatpush1.bf16.msra.mxu0 %v6431_v62 }
  0xee   :  { %4932 = vmatprep.subr.bf16.mxu0 %v6434_v63 }
  0xef   :  { %4955 = vmatpush3.bf16.msra.mxu1 %v6448_v15 }
  0xf0   :  { %4956 = vmatprep.subr.bf16.mxu1 %v6219_v58 }
  0xf1   :  { %4934 = vmatpush1.bf16.msra.mxu0 %v6442_v9 }
  0xf2   :  { %4936 = vmatprep.subr.bf16.mxu0 %v6445_v10 }
  0xf3   :  { %4958 = vmatpush3.bf16.msra.mxu1 %v6459_v27 }
  0xf4   :  { %4959 = vmatprep.subr.bf16.mxu1 %v6219_v58 }
  0xf5   :  { %4938 = vmatpush1.bf16.msra.mxu0 %v6453_v19 }
  0xf6   :  { %4940 = vmatprep.subr.bf16.mxu0 %v6456_v21 }
  0xf7   :  { %4961 = vmatpush3.bf16.msra.mxu1 %v6470_v37 }
  0xf8   :  { %4962 = vmatprep.subr.bf16.mxu1 %v6219_v58 }
  0xf9   :  { %4942 = vmatpush1.bf16.msra.mxu0 %v6464_v30 }
  0xfa   :  { %4944 = vmatprep.subr.bf16.mxu0 %v6467_v33 }
  0xfb   :  { %4964 = vmatpush3.bf16.msra.mxu1 %v6481_v41 }
  0xfc   :  { %4965 = vmatprep.subr.bf16.mxu1 %v6219_v58 }
  0xfd   :  { %4946 = vmatpush1.bf16.msra.mxu0 %v6477_v40 }
  0xfe   :  { %4972 = vmatprep.subr.bf16.mxu0 %v6404_v26 }
  0xff   :  { %4967 = vmatpush3.bf16.msra.mxu1 %v6488_v46 }
 0x100   :  { %4968 = vmatprep.subr.bf16.mxu1 %v6219_v58 }
 0x103   :  { %4970 = vmatpush3.bf16.msra.mxu1 %v6496_v49 }
 0x104   :  { %5003 = vmatprep.subr.bf16.mxu1 %v6219_v58 }
 0x179   :  { %v4082_v59 = vpop.f32.mrb[0].mxu1 }
 0x17a   :  { %v6540_v60 = vadd.f32 %v4082_v59, %v206_v56  ;;  %v389_v61 = vpop.f32.mrb[1].mxu1 }
 0x17d   :  { %v4085_v1 = vpop.f32.mrb[2].mxu1 }
 0x17e   :  { %v6542_v2 = vadd.f32 %v4085_v1, %v206_v56  ;;  %v399_v3 = vpop.f32.mrb[3].mxu1  ;;  %v6590_v1 = vrot.slane %v193_v55, %v7294_v50  ;;  %v6597_v55 = vld [vmem:[%s7286_s5] ss:$0 sm:$0xff] }
 0x17f   :  { %v6544_v4 = vadd.f32 %v399_v3, %v206_v56 }
 0x181   :  { %v4088_v6 = vpop.f32.mrb[4].mxu1 }
 0x182   :  { %v6546_v7 = vadd.f32 %v4088_v6, %v206_v56  ;;  %v409_v8 = vpop.f32.mrb[5].mxu1 }
 0x183   :  { %v6548_v11 = vadd.f32 %v409_v8, %v206_v56 }
 0x185   :  { %v4091_v12 = vpop.f32.mrb[6].mxu1 }
 0x186   :  { %v6550_v13 = vadd.f32 %v4091_v12, %v206_v56  ;;  %v419_v14 = vpop.f32.mrb[7].mxu1 }
 0x187   :  { %v6552_v16 = vadd.f32 %v419_v14, %v206_v56 }
 0x199   :  { %v4126_v20 = vpop.f32.mrb[8].mxu1 }
 0x19a   :  { %v6560_v22 = vadd.f32 %v4126_v20, %v6557_v18  ;;  %v6562_v23 = vpop.f32.mrb[9].mxu1 }
 0x19d   :  { %v4129_v24 = vpop.f32.mrb[10].mxu1 }
 0x19e   :  { %v6565_v25 = vadd.f32 %v4129_v24, %v6557_v18  ;;  %v714_v28 = vpop.f32.mrb[11].mxu1 }
 0x19f   :  { %v6568_v29 = vadd.f32 %v714_v28, %v6557_v18 }
 0x1a1   :  { %v4132_v31 = vpop.f32.mrb[12].mxu1 }
 0x1a2   :  { %v6571_v34 = vadd.f32 %v4132_v31, %v6557_v18  ;;  %v724_v36 = vpop.f32.mrb[13].mxu1 }
 0x1a3   :  { %v6574_v38 = vadd.f32 %v724_v36, %v6557_v18 }
 0x1a5   :  { %v4135_v39 = vpop.f32.mrb[14].mxu1 }
 0x1a6   :  { %v6577_v44 = vadd.f32 %v4135_v39, %v6557_v18  ;;  %v734_v45 = vpop.f32.mrb[15].mxu1 }
 0x1a7   :  { %v6580_v47 = vadd.f32 %v734_v45, %v6557_v18 }
 0x1b3   :  { %v885_v59 = vpop.f32.mrb[0].mxu0 }
 0x1b4   :  { %v5779_v3 = vadd.f32 %v885_v59, %v6586_v54  ;;  %v887_v6 = vpop.f32.mrb[1].mxu0  ;;  %v390_v59 = vadd.f32 %v389_v61, %v206_v56 }
 0x1b5   :  { %v5780_v12 = vadd.f32 %v887_v6, %v6590_v1 }
 0x1b6   :  { %v3676_v8 = vmul.f32 -1.442695, %v5779_v3 }
 0x1b7   :  { %v3677_v14 = vmul.f32 -1.442695, %v5780_v12 }
 0x1b8   :  { %5858 = vpow2.f32 %v3676_v8 }
 0x1b9   :  { %v956_v17 = vpop.f32.mrb[16].mxu1  ;;  %5860 = vpow2.f32 %v3677_v14 }
 0x1ba   :  { %v4170_v20 = vpop.f32.mrb[17].mxu1  ;;  %v980_v39 = vadd.f32 %v6597_v55, %v956_v17 }
 0x1c2   :  { %v5859_v24 = vpop.eup %5858 }
 0x1c3   :  { %v964_v28 = vadd.f32 1.0, %v5859_v24  ;;  %v5861_v31 = vpop.eup %5860 }
 0x1c4   :  { %v971_v36 = vadd.f32 1.0, %v5861_v31 }
 0x1c5   :  { %5862 = vrcp.f32 %v964_v28 }
 0x1c6   :  { %5864 = vrcp.f32 %v971_v36 }
 0x1cf   :  { %v5863_v45 = vpop.eup %5862 }
 0x1d0   :  { %v981_v3 = vmul.f32 %v5863_v45, %v980_v39  ;;  %v5865_v8 = vpop.eup %5864 }
 0x1d1   :  { %v984_v12 = vsub.f32 1.0, %v5865_v8  ;;  %v986_v24 = vmul.f32 0.0, %v5865_v8 }
 0x1d2   :  { %v982_v6 = vadd.f32 %v981_v3, %v390_v59 }
 0x1d4   :  { %5866 = vtanh.f32 %v982_v6 }
 0x1de   :  { %v5867_v14 = vpop.eup %5866 }
 0x1df   :  { %v985_v20 = vmul.f32 %v5867_v14, %v984_v12 }
 0x1e1   :  { %v987_v28 = vadd.f32 %v986_v24, %v985_v20 }
 0x1e3   :  { %1057 = vmatmul.mubr.f32.vlgmr.msra.gmra.mrb[2].mxu0 %v987_v28  ;;  %4204 = vmatmul.mubr.f32.vlgmr.msra.gmra.mrb[18].mxu1 %v987_v28 }
 0x1e4   :  { %4974 = vmatpush1.bf16.msra.mxu0 %v6407_v32  ;;  %5005 = vmatpush3.bf16.msra.mxu1 %v6426_v57 }
 0x1e5   :  { %4976 = vmatprep.subr.bf16.mxu0 %v6410_v35  ;;  %5006 = vmatprep.subr.bf16.mxu1 %v6219_v58 }
 0x1e6   :  { %1223 = vmatprep.mubr.f32.mxu0 %v6218_v0  ;;  %4238 = vmatprep.mubr.msk.f32.mxu1 %vm6220_vm0, %v6218_v0 }
 0x1e8   :  { %4978 = vmatpush1.bf16.msra.mxu0 %v6414_v42  ;;  %5008 = vmatpush3.bf16.msra.mxu1 %v6437_v5 }
 0x1e9   :  { %4980 = vmatprep.subr.bf16.mxu0 %v6417_v43  ;;  %5009 = vmatprep.subr.bf16.mxu1 %v6219_v58 }
 0x1ec   :  { %4982 = vmatpush1.bf16.msra.mxu0 %v6421_v51  ;;  %5011 = vmatpush3.bf16.msra.mxu1 %v6448_v15 }
 0x1ed   :  { %4984 = vmatprep.subr.bf16.mxu0 %v6424_v52  ;;  %5012 = vmatprep.subr.bf16.mxu1 %v6219_v58 }
 0x1f0   :  { %4986 = vmatpush1.bf16.msra.mxu0 %v6431_v62  ;;  %5014 = vmatpush3.bf16.msra.mxu1 %v6459_v27 }
 0x1f1   :  { %4988 = vmatprep.subr.bf16.mxu0 %v6434_v63  ;;  %5015 = vmatprep.subr.bf16.mxu1 %v6219_v58 }
 0x1f4   :  { %4990 = vmatpush1.bf16.msra.mxu0 %v6442_v9  ;;  %5017 = vmatpush3.bf16.msra.mxu1 %v6470_v37 }
 0x1f5   :  { %4992 = vmatprep.subr.bf16.mxu0 %v6445_v10  ;;  %5018 = vmatprep.subr.bf16.mxu1 %v6219_v58 }
 0x1f8   :  { %4994 = vmatpush1.bf16.msra.mxu0 %v6453_v19  ;;  %5020 = vmatpush3.bf16.msra.mxu1 %v6481_v41 }
 0x1f9   :  { %4996 = vmatprep.subr.bf16.mxu0 %v6456_v21  ;;  %5021 = vmatprep.subr.bf16.mxu1 %v6219_v58 }
 0x1fc   :  { %4998 = vmatpush1.bf16.msra.mxu0 %v6464_v30  ;;  %5023 = vmatpush3.bf16.msra.mxu1 %v6488_v46 }
 0x1fd   :  { %5000 = vmatprep.subr.bf16.mxu0 %v6467_v33  ;;  %5024 = vmatprep.subr.bf16.mxu1 %v6219_v58 }
 0x200   :  { %5002 = vmatpush1.bf16.msra.mxu0 %v6477_v40  ;;  %5026 = vmatpush3.bf16.msra.mxu1 %v6496_v49 }
 0x201   :  { %5028 = vmatprep.subr.bf16.mxu0 %v6404_v26  ;;  %5059 = vmatprep.subr.bf16.mxu1 %v6219_v58 }
 0x2b6   :  { %v1058_v56 = vpop.f32.mrb[2].mxu0  ;;  %v1129_v61 = vpop.f32.mrb[18].mxu1 }
 0x2b7   :  { %v5781_v17 = vadd.f32 %v1058_v56, %v6586_v54  ;;  %v1060_v31 = vpop.f32.mrb[3].mxu0  ;;  %v4205_v36 = vpop.f32.mrb[19].mxu1  ;;  %v1147_v14 = vadd.f32 %v6597_v55, %v1129_v61 }
 0x2b8   :  { %v5782_v45 = vadd.f32 %v1060_v31, %v6590_v1 }
 0x2b9   :  { %v3679_v39 = vmul.f32 -1.442695, %v5781_v17 }
 0x2ba   :  { %v3680_v59 = vmul.f32 -1.442695, %v5782_v45 }
 0x2bb   :  { %5868 = vpow2.f32 %v3679_v39 }
 0x2bc   :  { %5870 = vpow2.f32 %v3680_v59 }
 0x2c5   :  { %v5869_v3 = vpop.eup %5868 }
 0x2c6   :  { %v1137_v6 = vadd.f32 1.0, %v5869_v3  ;;  %v5871_v8 = vpop.eup %5870 }
 0x2c7   :  { %v1144_v12 = vadd.f32 1.0, %v5871_v8 }
 0x2c8   :  { %5872 = vrcp.f32 %v1137_v6 }
 0x2c9   :  { %5874 = vrcp.f32 %v1144_v12 }
 0x2d2   :  { %v5873_v20 = vpop.eup %5872 }
 0x2d3   :  { %v1148_v24 = vmul.f32 %v5873_v20, %v1147_v14  ;;  %v5875_v36 = vpop.eup %5874 }
 0x2d4   :  { %v1151_v17 = vsub.f32 1.0, %v5875_v36  ;;  %v1153_v39 = vmul.f32 %v5875_v36, %v987_v28 }
 0x2d5   :  { %v1149_v56 = vadd.f32 %v1148_v24, %v6540_v60 }
 0x2d7   :  { %5876 = vtanh.f32 %v1149_v56 }
 0x2e1   :  { %v5877_v50 = vpop.eup %5876 }
 0x2e2   :  { %v1152_v31 = vmul.f32 %v5877_v50, %v1151_v17 }
 0x2e4   :  { %v1154_v45 = vadd.f32 %v1153_v39, %v1152_v31 }
 0x2e6   :  { %1224 = vmatmul.mubr.f32.vlgmr.msra.gmra.mrb[4].mxu0 %v1154_v45  ;;  %4239 = vmatmul.mubr.f32.vlgmr.msra.gmra.mrb[20].mxu1 %v1154_v45 }
 0x2e7   :  { %5030 = vmatpush1.bf16.msra.mxu0 %v6407_v32  ;;  %5061 = vmatpush3.bf16.msra.mxu1 %v6426_v57 }
 0x2e8   :  { %5032 = vmatprep.subr.bf16.mxu0 %v6410_v35  ;;  %5062 = vmatprep.subr.bf16.mxu1 %v6219_v58 }
 0x2e9   :  { %1390 = vmatprep.mubr.f32.mxu0 %v6218_v0  ;;  %4273 = vmatprep.mubr.msk.f32.mxu1 %vm6220_vm0, %v6218_v0 }
 0x2eb   :  { %5034 = vmatpush1.bf16.msra.mxu0 %v6414_v42  ;;  %5064 = vmatpush3.bf16.msra.mxu1 %v6437_v5 }
 0x2ec   :  { %5036 = vmatprep.subr.bf16.mxu0 %v6417_v43  ;;  %5065 = vmatprep.subr.bf16.mxu1 %v6219_v58 }
 0x2ef   :  { %5038 = vmatpush1.bf16.msra.mxu0 %v6421_v51  ;;  %5067 = vmatpush3.bf16.msra.mxu1 %v6448_v15 }
 0x2f0   :  { %5040 = vmatprep.subr.bf16.mxu0 %v6424_v52  ;;  %5068 = vmatprep.subr.bf16.mxu1 %v6219_v58 }
 0x2f3   :  { %5042 = vmatpush1.bf16.msra.mxu0 %v6431_v62  ;;  %5070 = vmatpush3.bf16.msra.mxu1 %v6459_v27 }
 0x2f4   :  { %5044 = vmatprep.subr.bf16.mxu0 %v6434_v63  ;;  %5071 = vmatprep.subr.bf16.mxu1 %v6219_v58 }
 0x2f7   :  { %5046 = vmatpush1.bf16.msra.mxu0 %v6442_v9  ;;  %5073 = vmatpush3.bf16.msra.mxu1 %v6470_v37 }
 0x2f8   :  { %5048 = vmatprep.subr.bf16.mxu0 %v6445_v10  ;;  %5074 = vmatprep.subr.bf16.mxu1 %v6219_v58 }
 0x2fb   :  { %5050 = vmatpush1.bf16.msra.mxu0 %v6453_v19  ;;  %5076 = vmatpush3.bf16.msra.mxu1 %v6481_v41 }
 0x2fc   :  { %5052 = vmatprep.subr.bf16.mxu0 %v6456_v21  ;;  %5077 = vmatprep.subr.bf16.mxu1 %v6219_v58 }
 0x2ff   :  { %5054 = vmatpush1.bf16.msra.mxu0 %v6464_v30  ;;  %5079 = vmatpush3.bf16.msra.mxu1 %v6488_v46 }
 0x300   :  { %5056 = vmatprep.subr.bf16.mxu0 %v6467_v33  ;;  %5080 = vmatprep.subr.bf16.mxu1 %v6219_v58 }
 0x303   :  { %5058 = vmatpush1.bf16.msra.mxu0 %v6477_v40  ;;  %5082 = vmatpush3.bf16.msra.mxu1 %v6496_v49 }
 0x304   :  { %5084 = vmatprep.subr.bf16.mxu0 %v6404_v26  ;;  %5115 = vmatprep.subr.bf16.mxu1 %v6219_v58 }
 0x3b9   :  { %v1225_v60 = vpop.f32.mrb[4].mxu0  ;;  %v1296_v50 = vpop.f32.mrb[20].mxu1 }
 0x3ba   :  { %v5783_v28 = vadd.f32 %v1225_v60, %v6586_v54  ;;  %v1227_v61 = vpop.f32.mrb[5].mxu0  ;;  %v4240_v59 = vpop.f32.mrb[21].mxu1  ;;  %v1314_v56 = vadd.f32 %v6597_v55, %v1296_v50 }
 0x3bb   :  { %v5784_v6 = vadd.f32 %v1227_v61, %v6590_v1 }
 0x3bc   :  { %v3681_v3 = vmul.f32 -1.442695, %v5783_v28 }
 0x3bd   :  { %v3682_v8 = vmul.f32 -1.442695, %v5784_v6 }
 0x3be   :  { %5878 = vpow2.f32 %v3681_v3 }
 0x3bf   :  { %5880 = vpow2.f32 %v3682_v8 }
 0x3c8   :  { %v5879_v12 = vpop.eup %5878 }
 0x3c9   :  { %v1304_v14 = vadd.f32 1.0, %v5879_v12  ;;  %v5881_v20 = vpop.eup %5880 }
 0x3ca   :  { %v1311_v24 = vadd.f32 1.0, %v5881_v20 }
 0x3cb   :  { %5882 = vrcp.f32 %v1304_v14 }
 0x3cc   :  { %5884 = vrcp.f32 %v1311_v24 }
 0x3d5   :  { %v5883_v36 = vpop.eup %5882 }
 0x3d6   :  { %v1315_v17 = vmul.f32 %v5883_v36, %v1314_v56  ;;  %v5885_v39 = vpop.eup %5884 }
 0x3d7   :  { %v1318_v60 = vsub.f32 1.0, %v5885_v39  ;;  %v1320_v59 = vmul.f32 %v5885_v39, %v1154_v45 }
 0x3d8   :  { %v1316_v31 = vadd.f32 %v1315_v17, %v6544_v4 }
 0x3da   :  { %5886 = vtanh.f32 %v1316_v31 }
 0x3e4   :  { %v5887_v28 = vpop.eup %5886 }
 0x3e5   :  { %v1319_v61 = vmul.f32 %v5887_v28, %v1318_v60 }
 0x3e7   :  { %v1321_v3 = vadd.f32 %v1320_v59, %v1319_v61 }
 0x3e9   :  { %1391 = vmatmul.mubr.f32.vlgmr.msra.gmra.mrb[6].mxu0 %v1321_v3  ;;  %4274 = vmatmul.mubr.f32.vlgmr.msra.gmra.mrb[22].mxu1 %v1321_v3 }
 0x3ea   :  { %5086 = vmatpush1.bf16.msra.mxu0 %v6407_v32  ;;  %5117 = vmatpush3.bf16.msra.mxu1 %v6426_v57 }
 0x3eb   :  { %5088 = vmatprep.subr.bf16.mxu0 %v6410_v35  ;;  %5118 = vmatprep.subr.bf16.mxu1 %v6219_v58 }
 0x3ec   :  { %1557 = vmatprep.mubr.f32.mxu0 %v6218_v0  ;;  %4308 = vmatprep.mubr.msk.f32.mxu1 %vm6220_vm0, %v6218_v0 }
 0x3ee   :  { %5090 = vmatpush1.bf16.msra.mxu0 %v6414_v42  ;;  %5120 = vmatpush3.bf16.msra.mxu1 %v6437_v5 }
 0x3ef   :  { %5092 = vmatprep.subr.bf16.mxu0 %v6417_v43  ;;  %5121 = vmatprep.subr.bf16.mxu1 %v6219_v58 }
 0x3f2   :  { %5094 = vmatpush1.bf16.msra.mxu0 %v6421_v51  ;;  %5123 = vmatpush3.bf16.msra.mxu1 %v6448_v15 }
 0x3f3   :  { %5096 = vmatprep.subr.bf16.mxu0 %v6424_v52  ;;  %5124 = vmatprep.subr.bf16.mxu1 %v6219_v58 }
 0x3f6   :  { %5098 = vmatpush1.bf16.msra.mxu0 %v6431_v62  ;;  %5126 = vmatpush3.bf16.msra.mxu1 %v6459_v27 }
 0x3f7   :  { %5100 = vmatprep.subr.bf16.mxu0 %v6434_v63  ;;  %5127 = vmatprep.subr.bf16.mxu1 %v6219_v58 }
 0x3fa   :  { %5102 = vmatpush1.bf16.msra.mxu0 %v6442_v9  ;;  %5129 = vmatpush3.bf16.msra.mxu1 %v6470_v37 }
 0x3fb   :  { %5104 = vmatprep.subr.bf16.mxu0 %v6445_v10  ;;  %5130 = vmatprep.subr.bf16.mxu1 %v6219_v58 }
 0x3fe   :  { %5106 = vmatpush1.bf16.msra.mxu0 %v6453_v19  ;;  %5132 = vmatpush3.bf16.msra.mxu1 %v6481_v41 }
 0x3ff   :  { %5108 = vmatprep.subr.bf16.mxu0 %v6456_v21  ;;  %5133 = vmatprep.subr.bf16.mxu1 %v6219_v58 }
 0x402   :  { %5110 = vmatpush1.bf16.msra.mxu0 %v6464_v30  ;;  %5135 = vmatpush3.bf16.msra.mxu1 %v6488_v46 }
 0x403   :  { %5112 = vmatprep.subr.bf16.mxu0 %v6467_v33  ;;  %5136 = vmatprep.subr.bf16.mxu1 %v6219_v58 }
 0x406   :  { %5114 = vmatpush1.bf16.msra.mxu0 %v6477_v40  ;;  %5138 = vmatpush3.bf16.msra.mxu1 %v6496_v49 }
 0x407   :  { %5140 = vmatprep.subr.bf16.mxu0 %v6404_v26  ;;  %5171 = vmatprep.subr.bf16.mxu1 %v6219_v58 }
 0x4bc   :  { %v1392_v4 = vpop.f32.mrb[6].mxu0  ;;  %v1463_v45 = vpop.f32.mrb[22].mxu1 }
 0x4bd   :  { %v5785_v50 = vadd.f32 %v1392_v4, %v6586_v54  ;;  %v1394_v6 = vpop.f32.mrb[7].mxu0  ;;  %v4275_v8 = vpop.f32.mrb[23].mxu1  ;;  %v1481_v31 = vadd.f32 %v6597_v55, %v1463_v45 }
 0x4be   :  { %v5786_v14 = vadd.f32 %v1394_v6, %v6590_v1 }
 0x4bf   :  { %v3683_v12 = vmul.f32 -1.442695, %v5785_v50 }
 0x4c0   :  { %v3684_v20 = vmul.f32 -1.442695, %v5786_v14 }
 0x4c1   :  { %5888 = vpow2.f32 %v3683_v12 }
 0x4c2   :  { %5890 = vpow2.f32 %v3684_v20 }
 0x4cb   :  { %v5889_v24 = vpop.eup %5888 }
 0x4cc   :  { %v1471_v56 = vadd.f32 1.0, %v5889_v24  ;;  %v5891_v36 = vpop.eup %5890 }
 0x4cd   :  { %v1478_v17 = vadd.f32 1.0, %v5891_v36 }
 0x4ce   :  { %5892 = vrcp.f32 %v1471_v56 }
 0x4cf   :  { %5894 = vrcp.f32 %v1478_v17 }
 0x4d8   :  { %v5893_v39 = vpop.eup %5892 }
 0x4d9   :  { %v1482_v60 = vmul.f32 %v5893_v39, %v1481_v31  ;;  %v5895_v61 = vpop.eup %5894 }
 0x4da   :  { %v1485_v59 = vsub.f32 1.0, %v5895_v61  ;;  %v1487_v6 = vmul.f32 %v5895_v61, %v1321_v3 }
 0x4db   :  { %v1483_v28 = vadd.f32 %v1482_v60, %v6542_v2 }
 0x4dd   :  { %5896 = vtanh.f32 %v1483_v28 }
 0x4e7   :  { %v5897_v4 = vpop.eup %5896 }
 0x4e8   :  { %v1486_v50 = vmul.f32 %v5897_v4, %v1485_v59 }
 0x4ea   :  { %v1488_v8 = vadd.f32 %v1487_v6, %v1486_v50 }
 0x4ec   :  { %1558 = vmatmul.mubr.f32.vlgmr.msra.gmra.mrb[8].mxu0 %v1488_v8  ;;  %4309 = vmatmul.mubr.f32.vlgmr.msra.gmra.mrb[24].mxu1 %v1488_v8 }
 0x4ed   :  { %5142 = vmatpush1.bf16.msra.mxu0 %v6407_v32  ;;  %5173 = vmatpush3.bf16.msra.mxu1 %v6426_v57 }
 0x4ee   :  { %5144 = vmatprep.subr.bf16.mxu0 %v6410_v35  ;;  %5174 = vmatprep.subr.bf16.mxu1 %v6219_v58 }
 0x4ef   :  { %1724 = vmatprep.mubr.f32.mxu0 %v6218_v0  ;;  %4343 = vmatprep.mubr.msk.f32.mxu1 %vm6220_vm0, %v6218_v0 }
 0x4f1   :  { %5146 = vmatpush1.bf16.msra.mxu0 %v6414_v42  ;;  %5176 = vmatpush3.bf16.msra.mxu1 %v6437_v5 }
 0x4f2   :  { %5148 = vmatprep.subr.bf16.mxu0 %v6417_v43  ;;  %5177 = vmatprep.subr.bf16.mxu1 %v6219_v58 }
 0x4f5   :  { %5150 = vmatpush1.bf16.msra.mxu0 %v6421_v51  ;;  %5179 = vmatpush3.bf16.msra.mxu1 %v6448_v15 }
 0x4f6   :  { %5152 = vmatprep.subr.bf16.mxu0 %v6424_v52  ;;  %5180 = vmatprep.subr.bf16.mxu1 %v6219_v58 }
 0x4f9   :  { %5154 = vmatpush1.bf16.msra.mxu0 %v6431_v62  ;;  %5182 = vmatpush3.bf16.msra.mxu1 %v6459_v27 }
 0x4fa   :  { %5156 = vmatprep.subr.bf16.mxu0 %v6434_v63  ;;  %5183 = vmatprep.subr.bf16.mxu1 %v6219_v58 }
 0x4fd   :  { %5158 = vmatpush1.bf16.msra.mxu0 %v6442_v9  ;;  %5185 = vmatpush3.bf16.msra.mxu1 %v6470_v37 }
 0x4fe   :  { %5160 = vmatprep.subr.bf16.mxu0 %v6445_v10  ;;  %5186 = vmatprep.subr.bf16.mxu1 %v6219_v58 }
 0x501   :  { %5162 = vmatpush1.bf16.msra.mxu0 %v6453_v19  ;;  %5188 = vmatpush3.bf16.msra.mxu1 %v6481_v41 }
 0x502   :  { %5164 = vmatprep.subr.bf16.mxu0 %v6456_v21  ;;  %5189 = vmatprep.subr.bf16.mxu1 %v6219_v58 }
 0x505   :  { %5166 = vmatpush1.bf16.msra.mxu0 %v6464_v30  ;;  %5191 = vmatpush3.bf16.msra.mxu1 %v6488_v46 }
 0x506   :  { %5168 = vmatprep.subr.bf16.mxu0 %v6467_v33  ;;  %5192 = vmatprep.subr.bf16.mxu1 %v6219_v58 }
 0x509   :  { %5170 = vmatpush1.bf16.msra.mxu0 %v6477_v40  ;;  %5194 = vmatpush3.bf16.msra.mxu1 %v6496_v49 }
 0x50a   :  { %5196 = vmatprep.subr.bf16.mxu0 %v6404_v26  ;;  %5227 = vmatprep.subr.bf16.mxu1 %v6219_v58 }
 0x5bf   :  { %v1559_v2 = vpop.f32.mrb[8].mxu0  ;;  %v1630_v3 = vpop.f32.mrb[24].mxu1 }
 0x5c0   :  { %v5787_v45 = vadd.f32 %v1559_v2, %v6586_v54  ;;  %v1561_v12 = vpop.f32.mrb[9].mxu0  ;;  %v4310_v14 = vpop.f32.mrb[25].mxu1  ;;  %v1648_v60 = vadd.f32 %v6597_v55, %v1630_v3 }
 0x5c1   :  { %v5788_v24 = vadd.f32 %v1561_v12, %v6590_v1 }
 0x5c2   :  { %v3685_v20 = vmul.f32 -1.442695, %v5787_v45 }
 0x5c3   :  { %v3686_v56 = vmul.f32 -1.442695, %v5788_v24 }
 0x5c4   :  { %5898 = vpow2.f32 %v3685_v20 }
 0x5c5   :  { %5900 = vpow2.f32 %v3686_v56 }
 0x5ce   :  { %v5899_v36 = vpop.eup %5898 }
 0x5cf   :  { %v1638_v17 = vadd.f32 1.0, %v5899_v36  ;;  %v5901_v31 = vpop.eup %5900 }
 0x5d0   :  { %v1645_v39 = vadd.f32 1.0, %v5901_v31 }
 0x5d1   :  { %5902 = vrcp.f32 %v1638_v17 }
 0x5d2   :  { %5904 = vrcp.f32 %v1645_v39 }
 0x5db   :  { %v5903_v28 = vpop.eup %5902 }
 0x5dc   :  { %v1649_v61 = vmul.f32 %v5903_v28, %v1648_v60  ;;  %v5905_v4 = vpop.eup %5904 }
 0x5dd   :  { %v1652_v50 = vsub.f32 1.0, %v5905_v4  ;;  %v1654_v45 = vmul.f32 %v5905_v4, %v1488_v8 }
 0x5de   :  { %v1650_v59 = vadd.f32 %v1649_v61, %v6548_v11 }
 0x5e0   :  { %5906 = vtanh.f32 %v1650_v59 }
 0x5ea   :  { %v5907_v6 = vpop.eup %5906 }
 0x5eb   :  { %v1653_v2 = vmul.f32 %v5907_v6, %v1652_v50 }
 0x5ed   :  { %v1655_v12 = vadd.f32 %v1654_v45, %v1653_v2 }
 0x5ef   :  { %1725 = vmatmul.mubr.f32.vlgmr.msra.gmra.mrb[10].mxu0 %v1655_v12  ;;  %4344 = vmatmul.mubr.f32.vlgmr.msra.gmra.mrb[26].mxu1 %v1655_v12 }
 0x5f0   :  { %5198 = vmatpush1.bf16.msra.mxu0 %v6407_v32  ;;  %5229 = vmatpush3.bf16.msra.mxu1 %v6426_v57 }
 0x5f1   :  { %5200 = vmatprep.subr.bf16.mxu0 %v6410_v35  ;;  %5230 = vmatprep.subr.bf16.mxu1 %v6219_v58 }
 0x5f2   :  { %1891 = vmatprep.mubr.f32.mxu0 %v6218_v0  ;;  %4378 = vmatprep.mubr.msk.f32.mxu1 %vm6220_vm0, %v6218_v0 }
 0x5f4   :  { %5202 = vmatpush1.bf16.msra.mxu0 %v6414_v42  ;;  %5232 = vmatpush3.bf16.msra.mxu1 %v6437_v5 }
 0x5f5   :  { %5204 = vmatprep.subr.bf16.mxu0 %v6417_v43  ;;  %5233 = vmatprep.subr.bf16.mxu1 %v6219_v58 }
 0x5f8   :  { %5206 = vmatpush1.bf16.msra.mxu0 %v6421_v51  ;;  %5235 = vmatpush3.bf16.msra.mxu1 %v6448_v15 }
 0x5f9   :  { %5208 = vmatprep.subr.bf16.mxu0 %v6424_v52  ;;  %5236 = vmatprep.subr.bf16.mxu1 %v6219_v58 }
 0x5fc   :  { %5210 = vmatpush1.bf16.msra.mxu0 %v6431_v62  ;;  %5238 = vmatpush3.bf16.msra.mxu1 %v6459_v27 }
 0x5fd   :  { %5212 = vmatprep.subr.bf16.mxu0 %v6434_v63  ;;  %5239 = vmatprep.subr.bf16.mxu1 %v6219_v58 }
 0x600   :  { %5214 = vmatpush1.bf16.msra.mxu0 %v6442_v9  ;;  %5241 = vmatpush3.bf16.msra.mxu1 %v6470_v37 }
 0x601   :  { %5216 = vmatprep.subr.bf16.mxu0 %v6445_v10  ;;  %5242 = vmatprep.subr.bf16.mxu1 %v6219_v58 }
 0x604   :  { %5218 = vmatpush1.bf16.msra.mxu0 %v6453_v19  ;;  %5244 = vmatpush3.bf16.msra.mxu1 %v6481_v41 }
 0x605   :  { %5220 = vmatprep.subr.bf16.mxu0 %v6456_v21  ;;  %5245 = vmatprep.subr.bf16.mxu1 %v6219_v58 }
 0x608   :  { %5222 = vmatpush1.bf16.msra.mxu0 %v6464_v30  ;;  %5247 = vmatpush3.bf16.msra.mxu1 %v6488_v46 }
 0x609   :  { %5224 = vmatprep.subr.bf16.mxu0 %v6467_v33  ;;  %5248 = vmatprep.subr.bf16.mxu1 %v6219_v58 }
 0x60c   :  { %5226 = vmatpush1.bf16.msra.mxu0 %v6477_v40  ;;  %5250 = vmatpush3.bf16.msra.mxu1 %v6496_v49 }
 0x60d   :  { %5252 = vmatprep.subr.bf16.mxu0 %v6404_v26  ;;  %5283 = vmatprep.subr.bf16.mxu1 %v6219_v58 }
 0x6c2   :  { %v1726_v11 = vpop.f32.mrb[10].mxu0  ;;  %v1797_v8 = vpop.f32.mrb[26].mxu1 }
 0x6c3   :  { %v5789_v3 = vadd.f32 %v1726_v11, %v6586_v54  ;;  %v1728_v14 = vpop.f32.mrb[11].mxu0  ;;  %v4345_v20 = vpop.f32.mrb[27].mxu1  ;;  %v1815_v26 = vadd.f32 %v6597_v55, %v1797_v8  ;;  %v2160_v8 = vld [vmem:[#allocation12 + $0x18] sm:$0xff] }
 0x6c4   :  { %v5790_v56 = vadd.f32 %v1728_v14, %v6590_v1  ;;  %v2161_v14 = vld [vmem:[#allocation12 + $0x20] sm:$0xff]  ;;  %v2162_v20 = vld [vmem:[#allocation12 + $0x28] sm:$0xff] }
 0x6c5   :  { %v3687_v24 = vmul.f32 -1.442695, %v5789_v3 }
 0x6c6   :  { %v3688_v36 = vmul.f32 -1.442695, %v5790_v56  ;;  %v2163_v56 = vld [vmem:[#allocation12 + $0x30] sm:$0xff] }
 0x6c7   :  { %5908 = vpow2.f32 %v3687_v24  ;;  %v5314_v24 = vpack.c.bf16 %v2162_v20, %v2161_v14 }
 0x6c8   :  { %5910 = vpow2.f32 %v3688_v36  ;;  %v2164_v36 = vld [vmem:[#allocation12 + $0x38] sm:$0xff] }
 0x6d1   :  { %v5909_v17 = vpop.eup %5908 }
 0x6d2   :  { %v1805_v31 = vadd.f32 1.0, %v5909_v17  ;;  %v5911_v39 = vpop.eup %5910  ;;  %v5317_v17 = vpack.c.bf16 %v2164_v36, %v2163_v56 }
 0x6d3   :  { %v1812_v60 = vadd.f32 1.0, %v5911_v39  ;;  %v2166_v39 = vld [vmem:[#allocation12 + $0x48] sm:$0xff] }
 0x6d4   :  { %5912 = vrcp.f32 %v1805_v31  ;;  %v2165_v31 = vld [vmem:[#allocation12 + $0x40] sm:$0xff] }
 0x6d5   :  { %5914 = vrcp.f32 %v1812_v60  ;;  %v5320_v60 = vpack.c.bf16 %v2166_v39, %v2165_v31  ;;  %v2251_v39 = vld [vmem:[#allocation15] sm:$0xff] }
 0x6de   :  { %v5913_v28 = vpop.eup %5912 }
 0x6df   :  { %v1816_v61 = vmul.f32 %v5913_v28, %v1815_v26  ;;  %v5915_v4 = vpop.eup %5914  ;;  %v2167_v26 = vld [vmem:[#allocation12 + $0x50] sm:$0xff]  ;;  %v2168_v28 = vld [vmem:[#allocation12 + $0x58] sm:$0xff] }
 0x6e0   :  { %v1819_v50 = vsub.f32 1.0, %v5915_v4  ;;  %v1821_v45 = vmul.f32 %v5915_v4, %v1655_v12  ;;  %v2159_v12 = vld [vmem:[#allocation12 + $0x10] sm:$0xff]  ;;  %v2170_v4 = vld [vmem:[#allocation12 + $0x68] sm:$0xff] }
 0x6e1   :  { %v1817_v59 = vadd.f32 %v1816_v61, %v6546_v7  ;;  %v2158_v7 = vld [vmem:[#allocation12 + $0x8] sm:$0xff]  ;;  %v5311_v3 = vpack.c.bf16 %v2160_v8, %v2159_v12  ;;  %v5323_v61 = vpack.c.bf16 %v2168_v28, %v2167_v26  ;;  %v2258_v26 = vld [vmem:[#allocation15 + $0x38] sm:$0xff]  ;;  %v2261_v28 = vld [vmem:[#allocation15 + $0x50] sm:$0xff] }
 0x6e3   :  { %5916 = vtanh.f32 %v1817_v59  ;;  %v2169_v59 = vld [vmem:[#allocation12 + $0x60] sm:$0xff] }
 0x6ed   :  { %v5917_v6 = vpop.eup %5916 }
 0x6ee   :  { %v1820_v2 = vmul.f32 %v5917_v6, %v1819_v50  ;;  %v5326_v50 = vpack.c.bf16 %v2170_v4, %v2169_v59  ;;  %v2171_v6 = vld [vmem:[#allocation12 + $0x70] sm:$0xff] }
 0x6f0   :  { %v1822_v11 = vadd.f32 %v1821_v45, %v1820_v2  ;;  %v2172_v2 = vld [vmem:[#allocation12 + $0x78] sm:$0xff] }
 0x6f1   :  { %v5329_v45 = vpack.c.bf16 %v2172_v2, %v2171_v6  ;;  %v2257_v6 = vld [vmem:[#allocation15 + $0x30] sm:$0xff]  ;;  %v2260_v2 = vld [vmem:[#allocation15 + $0x48] sm:$0xff] }
 0x6f2   :  { %1892 = vmatmul.mubr.f32.vlgmr.msra.gmra.mrb[12].mxu0 %v1822_v11  ;;  %4379 = vmatmul.mubr.f32.vlgmr.msra.gmra.mrb[28].mxu1 %v1822_v11 }
 0x6f3   :  { %5254 = vmatpush1.bf16.msra.mxu0 %v6407_v32  ;;  %5285 = vmatpush3.bf16.msra.mxu1 %v6426_v57 }
 0x6f4   :  { %5256 = vmatprep.subr.bf16.mxu0 %v6410_v35  ;;  %5286 = vmatprep.subr.bf16.mxu1 %v6219_v58 }
 0x6f5   :  { %2058 = vmatprep.mubr.f32.mxu0 %v6218_v0  ;;  %4413 = vmatprep.mubr.msk.f32.mxu1 %vm6220_vm0, %v6218_v0 }
 0x6f7   :  { %5258 = vmatpush1.bf16.msra.mxu0 %v6414_v42  ;;  %5288 = vmatpush3.bf16.msra.mxu1 %v6437_v5 }
 0x6f8   :  { %5260 = vmatprep.subr.bf16.mxu0 %v6417_v43  ;;  %5289 = vmatprep.subr.bf16.mxu1 %v6219_v58 }
 0x6fb   :  { %5262 = vmatpush1.bf16.msra.mxu0 %v6421_v51  ;;  %5291 = vmatpush3.bf16.msra.mxu1 %v6448_v15 }
 0x6fc   :  { %5264 = vmatprep.subr.bf16.mxu0 %v6424_v52  ;;  %5292 = vmatprep.subr.bf16.mxu1 %v6219_v58 }
 0x6ff   :  { %5266 = vmatpush1.bf16.msra.mxu0 %v6431_v62  ;;  %5294 = vmatpush3.bf16.msra.mxu1 %v6459_v27 }
 0x700   :  { %5268 = vmatprep.subr.bf16.mxu0 %v6434_v63  ;;  %5295 = vmatprep.subr.bf16.mxu1 %v6219_v58 }
 0x703   :  { %5270 = vmatpush1.bf16.msra.mxu0 %v6442_v9  ;;  %5297 = vmatpush3.bf16.msra.mxu1 %v6470_v37 }
 0x704   :  { %5272 = vmatprep.subr.bf16.mxu0 %v6445_v10  ;;  %5298 = vmatprep.subr.bf16.mxu1 %v6219_v58 }
 0x707   :  { %5274 = vmatpush1.bf16.msra.mxu0 %v6453_v19  ;;  %5300 = vmatpush3.bf16.msra.mxu1 %v6481_v41 }
 0x708   :  { %5276 = vmatprep.subr.bf16.mxu0 %v6456_v21  ;;  %5301 = vmatprep.subr.bf16.mxu1 %v6219_v58 }
 0x70b   :  { %5278 = vmatpush1.bf16.msra.mxu0 %v6464_v30  ;;  %5303 = vmatpush3.bf16.msra.mxu1 %v6488_v46 }
 0x70c   :  { %5280 = vmatprep.subr.bf16.mxu0 %v6467_v33  ;;  %5304 = vmatprep.subr.bf16.mxu1 %v6219_v58 }
 0x70f   :  { %5282 = vmatpush1.bf16.msra.mxu0 %v6477_v40  ;;  %5306 = vmatpush3.bf16.msra.mxu1 %v6496_v49  ;;  %v2157_v49 = vld [vmem:[#allocation12] sm:$0xff] }
 0x710   :  { %5307 = vmatprep.subr.bf16.mxu0 %v6219_v58  ;;  %5363 = vmatprep.subr.bf16.mxu1 %v6219_v58 }
 0x7c5   :  { %v1893_v32 = vpop.f32.mrb[12].mxu0  ;;  %v1964_v35 = vpop.f32.mrb[28].mxu1 }
 0x7c6   :  { %v5791_v42 = vadd.f32 %v1893_v32, %v6586_v54  ;;  %v1895_v43 = vpop.f32.mrb[13].mxu0  ;;  %v4380_v51 = vpop.f32.mrb[29].mxu1  ;;  %v1982_v15 = vadd.f32 %v6597_v55, %v1964_v35  ;;  %v2255_v32 = vld [vmem:[#allocation15 + $0x20] sm:$0xff] }
 0x7c7   :  { %v5792_v57 = vadd.f32 %v1895_v43, %v6590_v1  ;;  %v2256_v43 = vld [vmem:[#allocation15 + $0x28] sm:$0xff] }
 0x7c8   :  { %v3689_v52 = vmul.f32 -1.442695, %v5791_v42  ;;  %v2253_v42 = vld [vmem:[#allocation15 + $0x10] sm:$0xff] }
 0x7c9   :  { %v3690_v62 = vmul.f32 -1.442695, %v5792_v57  ;;  %v6851_v51 = vpack.c.bf16 %v2256_v43, %v2253_v42  ;;  %v2262_v57 = vld [vmem:[#allocation15 + $0x58] sm:$0xff] }
 0x7ca   :  { %5918 = vpow2.f32 %v3689_v52  ;;  %v2259_v52 = vld [vmem:[#allocation15 + $0x40] sm:$0xff]  ;;  %v2266_v42 = vld [vmem:[#allocation15 + $0x78] sm:$0xff] }
 0x7cb   :  { %5920 = vpow2.f32 %v3690_v62  ;;  %v6856_v62 = vpack.c.bf16 %v2262_v57, %v2259_v52  ;;  %v2270_v43 = vld [vmem:[#allocation15 + $0x98] sm:$0xff]  ;;  %v2273_v52 = vld [vmem:[#allocation15 + $0xb0] sm:$0xff] }
 0x7d4   :  { %v5919_v63 = vpop.eup %5918 }
 0x7d5   :  { %v1972_v5 = vadd.f32 1.0, %v5919_v63  ;;  %v5921_v9 = vpop.eup %5920  ;;  %v2265_v63 = vld [vmem:[#allocation15 + $0x70] sm:$0xff] }
 0x7d6   :  { %v1979_v10 = vadd.f32 1.0, %v5921_v9 }
 0x7d7   :  { %5922 = vrcp.f32 %v1972_v5  ;;  %v2268_v5 = vld [vmem:[#allocation15 + $0x88] sm:$0xff] }
 0x7d8   :  { %5924 = vrcp.f32 %v1979_v10  ;;  %v6860_v9 = vpack.c.bf16 %v2268_v5, %v2265_v63  ;;  %v2271_v10 = vld [vmem:[#allocation15 + $0xa0] sm:$0xff]  ;;  %v6892_v63 = vpack.c.bf16 %v2273_v52, %v2270_v43  ;;  %v2269_v5 = vld [vmem:[#allocation15 + $0x90] sm:$0xff] }
 0x7e1   :  { %v5923_v19 = vpop.eup %5922 }
 0x7e2   :  { %v1983_v21 = vmul.f32 %v5923_v19, %v1982_v15  ;;  %v5925_v30 = vpop.eup %5924  ;;  %v2274_v15 = vld [vmem:[#allocation15 + $0xb8] sm:$0xff] }
 0x7e3   :  { %v1986_v33 = vsub.f32 1.0, %v5925_v30  ;;  %v1988_v41 = vmul.f32 %v5925_v30, %v1822_v11  ;;  %v2252_v11 = vld [vmem:[#allocation15 + $0x8] sm:$0xff]  ;;  %v6864_v19 = vpack.c.bf16 %v2274_v15, %v2271_v10 }
 0x7e4   :  { %v1984_v27 = vadd.f32 %v1983_v21, %v6552_v16  ;;  %v5308_v16 = vpack.c.bf16 %v2158_v7, %v2157_v49  ;;  %v6849_v35 = vpack.c.bf16 %v2255_v32, %v2252_v11  ;;  %v2277_v21 = vld [vmem:[#allocation15 + $0xd0] sm:$0xff]  ;;  %v6882_v11 = vpack.c.bf16 %v2260_v2, %v2257_v6  ;;  %v2272_v10 = vld [vmem:[#allocation15 + $0xa8] sm:$0xff]  ;;  %v2295_v2 = vld [vmem:[#allocation15 + $0x160] sm:$0xff] }
 0x7e5   :  { %v2276_v15 = vld [vmem:[#allocation15 + $0xc8] sm:$0xff] }
 0x7e6   :  { %5926 = vtanh.f32 %v1984_v27  ;;  %v2280_v27 = vld [vmem:[#allocation15 + $0xe8] sm:$0xff] }
 0x7e7   :  { %v6868_v30 = vpack.c.bf16 %v2280_v27, %v2277_v21  ;;  %v2279_v21 = vld [vmem:[#allocation15 + $0xe0] sm:$0xff]  ;;  %v6895_v27 = vpack.c.bf16 %v2272_v10, %v2269_v5  ;;  %v2296_v6 = vld [vmem:[#allocation15 + $0x168] sm:$0xff] }
 0x7f0   :  { %v5927_v37 = vpop.eup %5926 }
 0x7f1   :  { %v1987_v40 = vmul.f32 %v5927_v37, %v1986_v33 }
 0x7f3   :  { %v6834_v46 = vadd.f32 %v1988_v41, %v1987_v40 }
 0x7f5   :  { %2059 = vmatmul.mubr.f32.vlgmr.msra.gmra.mrb[14].mxu0 %v6834_v46  ;;  %4414 = vmatmul.mubr.f32.vlgmr.msra.gmra.mrb[30].mxu1 %v6834_v46 }
 0x7f6   :  { %4448 = vmatprep.mubr.msk.f32.mxu0 %vm6220_vm0, %v6218_v0  ;;  %4483 = vmatprep.mubr.msk.f32.mxu1 %vm6220_vm0, %v6218_v0 }
 0x7f7   :  { %5309 = vmatpush3.bf16.msra.mxu0 %v5308_v16  ;;  %5365 = vmatpush3.bf16.msra.mxu1 %v6851_v51 }
 0x7f8   :  { %5310 = vmatprep.subr.bf16.mxu0 %v6219_v58  ;;  %5366 = vmatprep.subr.bf16.mxu1 %v6219_v58 }
 0x7fb   :  { %5312 = vmatpush3.bf16.msra.mxu0 %v5311_v3  ;;  %5368 = vmatpush3.bf16.msra.mxu1 %v6856_v62 }
 0x7fc   :  { %5313 = vmatprep.subr.bf16.mxu0 %v6219_v58  ;;  %5369 = vmatprep.subr.bf16.mxu1 %v6219_v58 }
 0x7ff   :  { %5315 = vmatpush3.bf16.msra.mxu0 %v5314_v24  ;;  %5371 = vmatpush3.bf16.msra.mxu1 %v6860_v9 }
 0x800   :  { %5316 = vmatprep.subr.bf16.mxu0 %v6219_v58  ;;  %5372 = vmatprep.subr.bf16.mxu1 %v6219_v58 }
 0x803   :  { %5318 = vmatpush3.bf16.msra.mxu0 %v5317_v17  ;;  %5374 = vmatpush3.bf16.msra.mxu1 %v6864_v19 }
 0x804   :  { %5319 = vmatprep.subr.bf16.mxu0 %v6219_v58  ;;  %5375 = vmatprep.subr.bf16.mxu1 %v6219_v58 }
 0x807   :  { %5321 = vmatpush3.bf16.msra.mxu0 %v5320_v60  ;;  %5377 = vmatpush3.bf16.msra.mxu1 %v6868_v30 }
 0x808   :  { %5322 = vmatprep.subr.bf16.mxu0 %v6219_v58  ;;  %5378 = vmatprep.subr.bf16.mxu1 %v6219_v58 }
 0x80b   :  { %5324 = vmatpush3.bf16.msra.mxu0 %v5323_v61 }
 0x80c   :  { %5325 = vmatprep.subr.bf16.mxu0 %v6219_v58 }
 0x80f   :  { %5327 = vmatpush3.bf16.msra.mxu0 %v5326_v50 }
 0x810   :  { %5328 = vmatprep.subr.bf16.mxu0 %v6219_v58 }
 0x813   :  { %5330 = vmatpush3.bf16.msra.mxu0 %v5329_v45  ;;  %v2264_v45 = vld [vmem:[#allocation15 + $0x68] sm:$0xff] }
 0x814   :  { %5332 = vmatprep.subr.bf16.mxu0 %v6849_v35 }
 0x8c8   :  { %v2060_v33 = vpop.f32.mrb[14].mxu0  ;;  %v2131_v37 = vpop.f32.mrb[30].mxu1 }
 0x8c9   :  { %v5793_v40 = vadd.f32 %v2060_v33, %v6586_v54  ;;  %v2062_v41 = vpop.f32.mrb[15].mxu0  ;;  %v4415_v49 = vpop.f32.mrb[31].mxu1  ;;  %v2149_v24 = vadd.f32 %v6597_v55, %v2131_v37  ;;  %v6879_v55 = vpack.c.bf16 %v2261_v28, %v2258_v26  ;;  %v6898_v33 = vpack.c.bf16 %v2279_v21, %v2276_v15  ;;  %v2275_v37 = vld [vmem:[#allocation15 + $0xc0] sm:$0xff]  ;;  %v2294_v28 = vld [vmem:[#allocation15 + $0x158] sm:$0xff] }
 0x8ca   :  { %v5794_v16 = vadd.f32 %v2062_v41, %v6590_v1  ;;  %v2254_v1 = vld [vmem:[#allocation15 + $0x18] sm:$0xff]  ;;  %v6020_v15 = vld [vmem:[%s7291_s10] sm:$0x7] }
 0x8cb   :  { %v3691_v7 = vmul.f32 -1.442695, %v5793_v40  ;;  %v6877_v4 = vpack.c.bf16 %v2254_v1, %v2251_v39  ;;  %v2278_v40 = vld [vmem:[#allocation15 + $0xd8] sm:$0xff]  ;;  %v2289_v39 = vld [vmem:[#allocation15 + $0x130] sm:$0xff]  ;;  %v2292_v1 = vld [vmem:[#allocation15 + $0x148] sm:$0xff]  ;;  %v6983_v21 = vrot.slane %v6020_v15, %v197_v48 }
 0x8cc   :  { %v3692_v12 = vmul.f32 -1.442695, %v5794_v16  ;;  %v6901_v41 = vpack.c.bf16 %v2278_v40, %v2275_v37  ;;  %v2282_v49 = vld [vmem:[#allocation15 + $0xf8] sm:$0xff]  ;;  %v6919_v26 = vpack.c.bf16 %v2292_v1, %v2289_v39 }
 0x8cd   :  { %5928 = vpow2.f32 %v3691_v7  ;;  %v2285_v7 = vld [vmem:[#allocation15 + $0x110] sm:$0xff] }
 0x8ce   :  { %5930 = vpow2.f32 %v3692_v12  ;;  %v6905_v16 = vpack.c.bf16 %v2285_v7, %v2282_v49  ;;  %v2281_v12 = vld [vmem:[#allocation15 + $0xf0] sm:$0xff]  ;;  %v7295_v49 = vsub.s32 1, %v6534_v53  ;;  %v6994_v53 = vld [vmem:[%s7292_s11] ss:$0 sm:$0xff]  ;;  %s6221_s11 = smov [#allocation16]  }
 0x8cf   :  { %s3661_s18 = sshll.u32 %s6221_s11, 4  ;;  %s3662_s18 = int_to_ptr.vmem [resolvable:$true] %s3661_s18 }
 0x8d0   :  { %v6987_v7 = vrot.slane %v6020_v15, %v7295_v49  ;;  %s6175_s27 = scalar_lea.vmem %s3662_s18, 1024  ;;  %p6180_p1 = scmp.lt.s32.totalorder %s3662_s18, %s3662_s18 }
 0x8d1   :  { %p6176_p0 = scmp.ne.s32.totalorder %s3662_s18, %s6175_s27  ;;  %p6181_p2 = scmp.lt.s32.totalorder %s6175_s27, %s6175_s27 }
 0x8d3   :  { %p6182_p3 = por %p6181_p2, %p6180_p1 }
 0x8d5   :  { %p6183_p4 = pnand %p6182_p3, %p6176_p0 }
 0x8d7   :  { %v5929_v8 = vpop.eup %5928 }
 0x8d8   :  { %v2139_v3 = vadd.f32 1.0, %v5929_v8  ;;  %v5931_v14 = vpop.eup %5930  ;;  %v2284_v8 = vld [vmem:[#allocation15 + $0x108] sm:$0xff] }
 0x8d9   :  { %v2146_v20 = vadd.f32 1.0, %v5931_v14  ;;  %v6907_v14 = vpack.c.bf16 %v2284_v8, %v2281_v12 }
 0x8da   :  { %5932 = vrcp.f32 %v2139_v3  ;;  %v2283_v3 = vld [vmem:[#allocation15 + $0x100] sm:$0xff] }
 0x8db   :  { %5934 = vrcp.f32 %v2146_v20  ;;  %v2286_v20 = vld [vmem:[#allocation15 + $0x118] sm:$0xff] }
 0x8e4   :  { %v5933_v56 = vpop.eup %5932 }
 0x8e5   :  { %v2150_v36 = vmul.f32 %v5933_v56, %v2149_v24  ;;  %v5935_v17 = vpop.eup %5934  ;;  %v6910_v24 = vpack.c.bf16 %v2286_v20, %v2283_v3  ;;  %v2288_v56 = vld [vmem:[#allocation15 + $0x128] sm:$0xff] }
 0x8e6   :  { %v2153_v31 = vsub.f32 1.0, %v5935_v17  ;;  %v2155_v59 = vmul.f32 %v5935_v17, %v6834_v46  ;;  %v2263_v46 = vld [vmem:[#allocation15 + $0x60] sm:$0xff] }
 0x8e7   :  { %v2151_v54 = vadd.f32 %v2150_v36, %v6550_v13  ;;  %v2267_v13 = vld [vmem:[#allocation15 + $0x80] sm:$0xff]  ;;  %v6889_v57 = vpack.c.bf16 %v2266_v42, %v2263_v46  ;;  %5380 = vmatpush3.bf16.msra.mxu1 %v6910_v24 }
 0x8e8   :  { %v6886_v32 = vpack.c.bf16 %v2267_v13, %v2264_v45  ;;  %v2291_v36 = vld [vmem:[#allocation15 + $0x140] sm:$0xff]  ;;  %5381 = vmatprep.subr.bf16.mxu1 %v6219_v58  ;;  %v2298_v45 = vld [vmem:[#allocation15 + $0x178] sm:$0xff] }
 0x8e9   :  { %5936 = vtanh.f32 %v2151_v54  ;;  %v2287_v54 = vld [vmem:[#allocation15 + $0x120] sm:$0xff]  ;;  %v6914_v17 = vpack.c.bf16 %v2291_v36, %v2288_v56  ;;  %v6929_v46 = vpack.c.bf16 %v2298_v45, %v2295_v2 }
 0x8ea   :  { %v3693_v42 = vld [vmem:[%s7288_s7] ss:$0 sm:$0xff] }
 0x8eb   :  { %5383 = vmatpush3.bf16.msra.mxu1 %v6919_v26 }
 0x8ec   :  { %5384 = vmatprep.subr.bf16.mxu1 %v6219_v58 }
 0x8ef   :  { %5386 = vmatpush3.bf16.msra.mxu1 %v6929_v46 }
 0x8f0   :  { %5419 = vmatprep.subr.bf16.mxu1 %v6219_v58 }
 0x8f3   :  { %v5937_v60 = vpop.eup %5936 }
 0x8f4   :  { %v2154_v61 = vmul.f32 %v5937_v60, %v2153_v31  ;;  %v2290_v31 = vld [vmem:[#allocation15 + $0x138] sm:$0xff] }
 0x8f5   :  { %v6917_v60 = vpack.c.bf16 %v2290_v31, %v2287_v54 }
 0x8f6   :  { %v2156_v50 = vadd.f32 %v2155_v59, %v2154_v61  ;;  %v2297_v61 = vld [vmem:[#allocation15 + $0x170] sm:$0xff] }
 0x8f7   :  { %v2293_v59 = vld [vmem:[#allocation15 + $0x150] sm:$0xff] }
 0x8f8   :  { %4449 = vmatmul.mubr.f32.vlgmr.msra.gmra.mrb[32].mxu0 %v2156_v50  ;;  %v6922_v50 = vpack.c.bf16 %v2297_v61, %v2294_v28  ;;  %v6925_v13 = vpack.c.bf16 %v2296_v6, %v2293_v59  ;;  %v705_v61 = vadd.f32 %v6562_v23, %v6557_v18 }
 0x8f9   :  { %5334 = vmatpush1.bf16.msra.mxu0 %v6877_v4  ;;  %2367 = vmatprep.mubr.f32.mxu0 %v6218_v0 }
 0x8fa   :  { %5336 = vmatprep.subr.bf16.mxu0 %v6879_v55 }
 0x8fd   :  { %5338 = vmatpush1.bf16.msra.mxu0 %v6882_v11 }
 0x8fe   :  { %5340 = vmatprep.subr.bf16.mxu0 %v6886_v32 }
 0x901   :  { %5342 = vmatpush1.bf16.msra.mxu0 %v6889_v57 }
 0x902   :  { %5344 = vmatprep.subr.bf16.mxu0 %v6892_v63 }
 0x905   :  { %5346 = vmatpush1.bf16.msra.mxu0 %v6895_v27 }
 0x906   :  { %5348 = vmatprep.subr.bf16.mxu0 %v6898_v33 }
 0x909   :  { %5350 = vmatpush1.bf16.msra.mxu0 %v6901_v41 }
 0x90a   :  { %5352 = vmatprep.subr.bf16.mxu0 %v6905_v16 }
 0x90d   :  { %5354 = vmatpush1.bf16.msra.mxu0 %v6907_v14 }
 0x90e   :  { %5356 = vmatprep.subr.bf16.mxu0 %v6914_v17 }
 0x911   :  { %5358 = vmatpush1.bf16.msra.mxu0 %v6917_v60 }
 0x912   :  { %5360 = vmatprep.subr.bf16.mxu0 %v6922_v50 }
 0x915   :  { %5362 = vmatpush1.bf16.msra.mxu0 %v6925_v13 }
 0x916   :  { %5388 = vmatprep.subr.bf16.mxu0 %v6849_v35 }
 0x9cb   :  { %v2246_v43 = vpop.f32.mrb[32].mxu0 }
 0x9cc   :  { %v2247_v52 = vadd.f32 %v3693_v42, %v2246_v43  ;;  %v4450_v5 = vpop.f32.mrb[33].mxu0 }
 0x9ce   :  { %5938 = vtanh.f32 %v2247_v52 }
 0x9d8   :  { %v6939_v10 = vpop.eup %5938 }
 0x9d9   :  { %2368 = vmatmul.mubr.f32.vlgmr.msra.gmra.mrb[16].mxu0 %v6939_v10  ;;  %4484 = vmatmul.mubr.f32.vlgmr.msra.gmra.mrb[32].mxu1 %v6939_v10 }
 0x9da   :  { %5390 = vmatpush1.bf16.msra.mxu0 %v6877_v4  ;;  %5421 = vmatpush3.bf16.msra.mxu1 %v6851_v51 }
 0x9db   :  { %5392 = vmatprep.subr.bf16.mxu0 %v6879_v55  ;;  %5422 = vmatprep.subr.bf16.mxu1 %v6219_v58 }
 0x9dc   :  { %2541 = vmatprep.mubr.f32.mxu0 %v6218_v0  ;;  %4518 = vmatprep.mubr.msk.f32.mxu1 %vm6220_vm0, %v6218_v0 }
 0x9de   :  { %5394 = vmatpush1.bf16.msra.mxu0 %v6882_v11  ;;  %5424 = vmatpush3.bf16.msra.mxu1 %v6856_v62 }
 0x9df   :  { %5396 = vmatprep.subr.bf16.mxu0 %v6886_v32  ;;  %5425 = vmatprep.subr.bf16.mxu1 %v6219_v58 }
 0x9e2   :  { %5398 = vmatpush1.bf16.msra.mxu0 %v6889_v57  ;;  %5427 = vmatpush3.bf16.msra.mxu1 %v6860_v9 }
 0x9e3   :  { %5400 = vmatprep.subr.bf16.mxu0 %v6892_v63  ;;  %5428 = vmatprep.subr.bf16.mxu1 %v6219_v58 }
 0x9e6   :  { %5402 = vmatpush1.bf16.msra.mxu0 %v6895_v27  ;;  %5430 = vmatpush3.bf16.msra.mxu1 %v6864_v19 }
 0x9e7   :  { %5404 = vmatprep.subr.bf16.mxu0 %v6898_v33  ;;  %5431 = vmatprep.subr.bf16.mxu1 %v6219_v58 }
 0x9ea   :  { %5406 = vmatpush1.bf16.msra.mxu0 %v6901_v41  ;;  %5433 = vmatpush3.bf16.msra.mxu1 %v6868_v30 }
 0x9eb   :  { %5408 = vmatprep.subr.bf16.mxu0 %v6905_v16  ;;  %5434 = vmatprep.subr.bf16.mxu1 %v6219_v58 }
 0x9ee   :  { %5410 = vmatpush1.bf16.msra.mxu0 %v6907_v14  ;;  %5436 = vmatpush3.bf16.msra.mxu1 %v6910_v24 }
 0x9ef   :  { %5412 = vmatprep.subr.bf16.mxu0 %v6914_v17  ;;  %5437 = vmatprep.subr.bf16.mxu1 %v6219_v58 }
 0x9f2   :  { %5414 = vmatpush1.bf16.msra.mxu0 %v6917_v60  ;;  %5439 = vmatpush3.bf16.msra.mxu1 %v6919_v26 }
 0x9f3   :  { %5416 = vmatprep.subr.bf16.mxu0 %v6922_v50  ;;  %5440 = vmatprep.subr.bf16.mxu1 %v6219_v58 }
 0x9f6   :  { %5418 = vmatpush1.bf16.msra.mxu0 %v6925_v13  ;;  %5442 = vmatpush3.bf16.msra.mxu1 %v6929_v46 }
 0x9f7   :  { %5444 = vmatprep.subr.bf16.mxu0 %v6849_v35  ;;  %5475 = vmatprep.subr.bf16.mxu1 %v6219_v58 }
 0xaac   :  { %v2369_v37 = vpop.f32.mrb[16].mxu0  ;;  %v2440_v40 = vpop.f32.mrb[32].mxu1 }
 0xaad   :  { %v5795_v12 = vadd.f32 %v2369_v37, %v6983_v21  ;;  %v2371_v8 = vpop.f32.mrb[17].mxu0  ;;  %v4485_v3 = vpop.f32.mrb[33].mxu1  ;;  %v2464_v1 = vadd.f32 %v6994_v53, %v2440_v40 }
 0xaae   :  { %v5796_v56 = vadd.f32 %v2371_v8, %v6987_v7 }
 0xaaf   :  { %v3694_v20 = vmul.f32 -1.442695, %v5795_v12 }
 0xab0   :  { %v3695_v36 = vmul.f32 -1.442695, %v5796_v56 }
 0xab1   :  { %5940 = vpow2.f32 %v3694_v20 }
 0xab2   :  { %5942 = vpow2.f32 %v3695_v36 }
 0xabb   :  { %v5941_v54 = vpop.eup %5940 }
 0xabc   :  { %v2448_v31 = vadd.f32 1.0, %v5941_v54  ;;  %v5943_v48 = vpop.eup %5942 }
 0xabd   :  { %v2455_v39 = vadd.f32 1.0, %v5943_v48 }
 0xabe   :  { %5944 = vrcp.f32 %v2448_v31 }
 0xabf   :  { %5946 = vrcp.f32 %v2455_v39 }
 0xac8   :  { %v5945_v28 = vpop.eup %5944 }
 0xac9   :  { %v2465_v59 = vmul.f32 %v5945_v28, %v2464_v1  ;;  %v5947_v2 = vpop.eup %5946 }
 0xaca   :  { %v2468_v45 = vsub.f32 1.0, %v5947_v2  ;;  %v2470_v52 = vmul.f32 %v5947_v2, %v6939_v10 }
 0xacb   :  { %v2466_v6 = vadd.f32 %v2465_v59, %v705_v61 }
 0xacd   :  { %5948 = vtanh.f32 %v2466_v6 }
 0xad7   :  { %v5949_v42 = vpop.eup %5948 }
 0xad8   :  { %v2469_v43 = vmul.f32 %v5949_v42, %v2468_v45 }
 0xada   :  { %v7000_v5 = vadd.f32 %v2470_v52, %v2469_v43 }
 0xadc   :  { %2472 = vst [vmem:[#allocation16] sm:$0xff] %v7000_v5  ;;  %2542 = vmatmul.mubr.f32.vlgmr.msra.gmra.mrb[18].mxu0 %v7000_v5  ;;  %4519 = vmatmul.mubr.f32.vlgmr.msra.gmra.mrb[34].mxu1 %v7000_v5 }
 0xadd   :  { %5446 = vmatpush1.bf16.msra.mxu0 %v6877_v4  ;;  %5477 = vmatpush3.bf16.msra.mxu1 %v6851_v51 }
 0xade   :  { %5448 = vmatprep.subr.bf16.mxu0 %v6879_v55  ;;  %5478 = vmatprep.subr.bf16.mxu1 %v6219_v58 }
 0xadf   :  { %2710 = vmatprep.mubr.f32.mxu0 %v6218_v0  ;;  %4553 = vmatprep.mubr.msk.f32.mxu1 %vm6220_vm0, %v6218_v0 }
 0xae1   :  { %5450 = vmatpush1.bf16.msra.mxu0 %v6882_v11  ;;  %5480 = vmatpush3.bf16.msra.mxu1 %v6856_v62 }
 0xae2   :  { %5452 = vmatprep.subr.bf16.mxu0 %v6886_v32  ;;  %5481 = vmatprep.subr.bf16.mxu1 %v6219_v58 }
 0xae5   :  { %5454 = vmatpush1.bf16.msra.mxu0 %v6889_v57  ;;  %5483 = vmatpush3.bf16.msra.mxu1 %v6860_v9 }
 0xae6   :  { %5456 = vmatprep.subr.bf16.mxu0 %v6892_v63  ;;  %5484 = vmatprep.subr.bf16.mxu1 %v6219_v58 }
 0xae9   :  { %5458 = vmatpush1.bf16.msra.mxu0 %v6895_v27  ;;  %5486 = vmatpush3.bf16.msra.mxu1 %v6864_v19 }
 0xaea   :  { %5460 = vmatprep.subr.bf16.mxu0 %v6898_v33  ;;  %5487 = vmatprep.subr.bf16.mxu1 %v6219_v58 }
 0xaed   :  { %5462 = vmatpush1.bf16.msra.mxu0 %v6901_v41  ;;  %5489 = vmatpush3.bf16.msra.mxu1 %v6868_v30 }
 0xaee   :  { %5464 = vmatprep.subr.bf16.mxu0 %v6905_v16  ;;  %5490 = vmatprep.subr.bf16.mxu1 %v6219_v58 }
 0xaf1   :  { %5466 = vmatpush1.bf16.msra.mxu0 %v6907_v14  ;;  %5492 = vmatpush3.bf16.msra.mxu1 %v6910_v24 }
 0xaf2   :  { %5468 = vmatprep.subr.bf16.mxu0 %v6914_v17  ;;  %5493 = vmatprep.subr.bf16.mxu1 %v6219_v58 }
 0xaf5   :  { %5470 = vmatpush1.bf16.msra.mxu0 %v6917_v60  ;;  %5495 = vmatpush3.bf16.msra.mxu1 %v6919_v26 }
 0xaf6   :  { %5472 = vmatprep.subr.bf16.mxu0 %v6922_v50  ;;  %5496 = vmatprep.subr.bf16.mxu1 %v6219_v58 }
 0xaf9   :  { %5474 = vmatpush1.bf16.msra.mxu0 %v6925_v13  ;;  %5498 = vmatpush3.bf16.msra.mxu1 %v6929_v46 }
 0xafa   :  { %5500 = vmatprep.subr.bf16.mxu0 %v6849_v35  ;;  %5531 = vmatprep.subr.bf16.mxu1 %v6219_v58 }
 0xbaf   :  { %v2543_v18 = vpop.f32.mrb[18].mxu0  ;;  %v2614_v23 = vpop.f32.mrb[34].mxu1 }
 0xbb0   :  { %v5797_v10 = vadd.f32 %v2543_v18, %v6983_v21  ;;  %v2545_v15 = vpop.f32.mrb[19].mxu0  ;;  %v4520_v37 = vpop.f32.mrb[35].mxu1  ;;  %v2632_v36 = vadd.f32 %v6994_v53, %v2614_v23 }
 0xbb1   :  { %v5798_v49 = vadd.f32 %v2545_v15, %v6987_v7 }
 0xbb2   :  { %v3697_v40 = vmul.f32 -1.442695, %v5797_v10 }
 0xbb3   :  { %v3698_v12 = vmul.f32 -1.442695, %v5798_v49 }
 0xbb4   :  { %5950 = vpow2.f32 %v3697_v40 }
 0xbb5   :  { %5952 = vpow2.f32 %v3698_v12 }
 0xbbe   :  { %v5951_v8 = vpop.eup %5950 }
 0xbbf   :  { %v2622_v3 = vadd.f32 1.0, %v5951_v8  ;;  %v5953_v20 = vpop.eup %5952 }
 0xbc0   :  { %v2629_v56 = vadd.f32 1.0, %v5953_v20 }
 0xbc1   :  { %5954 = vrcp.f32 %v2622_v3 }
 0xbc2   :  { %5956 = vrcp.f32 %v2629_v56 }
 0xbcb   :  { %v5955_v54 = vpop.eup %5954 }
 0xbcc   :  { %v2633_v31 = vmul.f32 %v5955_v54, %v2632_v36  ;;  %v5957_v39 = vpop.eup %5956 }
 0xbcd   :  { %v2636_v1 = vsub.f32 1.0, %v5957_v39  ;;  %v2638_v59 = vmul.f32 %v5957_v39, %v7000_v5 }
 0xbce   :  { %v2634_v48 = vadd.f32 %v2633_v31, %v6560_v22 }
 0xbd0   :  { %5958 = vtanh.f32 %v2634_v48 }
 0xbda   :  { %v5959_v28 = vpop.eup %5958 }
 0xbdb   :  { %v2637_v61 = vmul.f32 %v5959_v28, %v2636_v1 }
 0xbdd   :  { %v7045_v6 = vadd.f32 %v2638_v59, %v2637_v61 }
 0xbdf   :  { %2641 = vst [vmem:[#allocation16 + $0x8] sm:$0xff] %v7045_v6  ;;  %2711 = vmatmul.mubr.f32.vlgmr.msra.gmra.mrb[20].mxu0 %v7045_v6  ;;  %4554 = vmatmul.mubr.f32.vlgmr.msra.gmra.mrb[36].mxu1 %v7045_v6 }
 0xbe0   :  { %5502 = vmatpush1.bf16.msra.mxu0 %v6877_v4  ;;  %5533 = vmatpush3.bf16.msra.mxu1 %v6851_v51 }
 0xbe1   :  { %5504 = vmatprep.subr.bf16.mxu0 %v6879_v55  ;;  %5534 = vmatprep.subr.bf16.mxu1 %v6219_v58 }
 0xbe2   :  { %2879 = vmatprep.mubr.f32.mxu0 %v6218_v0  ;;  %4588 = vmatprep.mubr.msk.f32.mxu1 %vm6220_vm0, %v6218_v0 }
 0xbe4   :  { %5506 = vmatpush1.bf16.msra.mxu0 %v6882_v11  ;;  %5536 = vmatpush3.bf16.msra.mxu1 %v6856_v62 }
 0xbe5   :  { %5508 = vmatprep.subr.bf16.mxu0 %v6886_v32  ;;  %5537 = vmatprep.subr.bf16.mxu1 %v6219_v58 }
 0xbe8   :  { %5510 = vmatpush1.bf16.msra.mxu0 %v6889_v57  ;;  %5539 = vmatpush3.bf16.msra.mxu1 %v6860_v9 }
 0xbe9   :  { %5512 = vmatprep.subr.bf16.mxu0 %v6892_v63  ;;  %5540 = vmatprep.subr.bf16.mxu1 %v6219_v58 }
 0xbec   :  { %5514 = vmatpush1.bf16.msra.mxu0 %v6895_v27  ;;  %5542 = vmatpush3.bf16.msra.mxu1 %v6864_v19 }
 0xbed   :  { %5516 = vmatprep.subr.bf16.mxu0 %v6898_v33  ;;  %5543 = vmatprep.subr.bf16.mxu1 %v6219_v58 }
 0xbf0   :  { %5518 = vmatpush1.bf16.msra.mxu0 %v6901_v41  ;;  %5545 = vmatpush3.bf16.msra.mxu1 %v6868_v30 }
 0xbf1   :  { %5520 = vmatprep.subr.bf16.mxu0 %v6905_v16  ;;  %5546 = vmatprep.subr.bf16.mxu1 %v6219_v58 }
 0xbf4   :  { %5522 = vmatpush1.bf16.msra.mxu0 %v6907_v14  ;;  %5548 = vmatpush3.bf16.msra.mxu1 %v6910_v24 }
 0xbf5   :  { %5524 = vmatprep.subr.bf16.mxu0 %v6914_v17  ;;  %5549 = vmatprep.subr.bf16.mxu1 %v6219_v58 }
 0xbf8   :  { %5526 = vmatpush1.bf16.msra.mxu0 %v6917_v60  ;;  %5551 = vmatpush3.bf16.msra.mxu1 %v6919_v26 }
 0xbf9   :  { %5528 = vmatprep.subr.bf16.mxu0 %v6922_v50  ;;  %5552 = vmatprep.subr.bf16.mxu1 %v6219_v58 }
 0xbfc   :  { %5530 = vmatpush1.bf16.msra.mxu0 %v6925_v13  ;;  %5554 = vmatpush3.bf16.msra.mxu1 %v6929_v46 }
 0xbfd   :  { %5556 = vmatprep.subr.bf16.mxu0 %v6849_v35  ;;  %5587 = vmatprep.subr.bf16.mxu1 %v6219_v58 }
 0xcb2   :  { %v2712_v22 = vpop.f32.mrb[20].mxu0  ;;  %v2783_v2 = vpop.f32.mrb[36].mxu1 }
 0xcb3   :  { %v5799_v45 = vadd.f32 %v2712_v22, %v6983_v21  ;;  %v2714_v42 = vpop.f32.mrb[21].mxu0  ;;  %v4555_v43 = vpop.f32.mrb[37].mxu1  ;;  %v2801_v40 = vadd.f32 %v6994_v53, %v2783_v2 }
 0xcb4   :  { %v5800_v5 = vadd.f32 %v2714_v42, %v6987_v7 }
 0xcb5   :  { %v3699_v52 = vmul.f32 -1.442695, %v5799_v45 }
 0xcb6   :  { %v3700_v18 = vmul.f32 -1.442695, %v5800_v5 }
 0xcb7   :  { %5960 = vpow2.f32 %v3699_v52 }
 0xcb8   :  { %5962 = vpow2.f32 %v3700_v18 }
 0xcc1   :  { %v5961_v23 = vpop.eup %5960 }
 0xcc2   :  { %v2791_v10 = vadd.f32 1.0, %v5961_v23  ;;  %v5963_v15 = vpop.eup %5962 }
 0xcc3   :  { %v2798_v37 = vadd.f32 1.0, %v5963_v15 }
 0xcc4   :  { %5964 = vrcp.f32 %v2791_v10 }
 0xcc5   :  { %5966 = vrcp.f32 %v2798_v37 }
 0xcce   :  { %v5965_v49 = vpop.eup %5964 }
 0xccf   :  { %v2802_v12 = vmul.f32 %v5965_v49, %v2801_v40  ;;  %v5967_v3 = vpop.eup %5966 }
 0xcd0   :  { %v2805_v20 = vsub.f32 1.0, %v5967_v3  ;;  %v2807_v54 = vmul.f32 %v5967_v3, %v7045_v6 }
 0xcd1   :  { %v2803_v8 = vadd.f32 %v2802_v12, %v6568_v29 }
 0xcd3   :  { %5968 = vtanh.f32 %v2803_v8 }
 0xcdd   :  { %v5969_v56 = vpop.eup %5968 }
 0xcde   :  { %v2806_v36 = vmul.f32 %v5969_v56, %v2805_v20 }
 0xce0   :  { %v7090_v31 = vadd.f32 %v2807_v54, %v2806_v36 }
 0xce2   :  { %2810 = vst [vmem:[#allocation16 + $0x10] sm:$0xff] %v7090_v31  ;;  %2880 = vmatmul.mubr.f32.vlgmr.msra.gmra.mrb[22].mxu0 %v7090_v31  ;;  %4589 = vmatmul.mubr.f32.vlgmr.msra.gmra.mrb[38].mxu1 %v7090_v31 }
 0xce3   :  { %5558 = vmatpush1.bf16.msra.mxu0 %v6877_v4  ;;  %5589 = vmatpush3.bf16.msra.mxu1 %v6851_v51 }
 0xce4   :  { %5560 = vmatprep.subr.bf16.mxu0 %v6879_v55  ;;  %5590 = vmatprep.subr.bf16.mxu1 %v6219_v58 }
 0xce5   :  { %3048 = vmatprep.mubr.f32.mxu0 %v6218_v0  ;;  %4623 = vmatprep.mubr.msk.f32.mxu1 %vm6220_vm0, %v6218_v0 }
 0xce7   :  { %5562 = vmatpush1.bf16.msra.mxu0 %v6882_v11  ;;  %5592 = vmatpush3.bf16.msra.mxu1 %v6856_v62 }
 0xce8   :  { %5564 = vmatprep.subr.bf16.mxu0 %v6886_v32  ;;  %5593 = vmatprep.subr.bf16.mxu1 %v6219_v58 }
 0xceb   :  { %5566 = vmatpush1.bf16.msra.mxu0 %v6889_v57  ;;  %5595 = vmatpush3.bf16.msra.mxu1 %v6860_v9 }
 0xcec   :  { %5568 = vmatprep.subr.bf16.mxu0 %v6892_v63  ;;  %5596 = vmatprep.subr.bf16.mxu1 %v6219_v58 }
 0xcef   :  { %5570 = vmatpush1.bf16.msra.mxu0 %v6895_v27  ;;  %5598 = vmatpush3.bf16.msra.mxu1 %v6864_v19 }
 0xcf0   :  { %5572 = vmatprep.subr.bf16.mxu0 %v6898_v33  ;;  %5599 = vmatprep.subr.bf16.mxu1 %v6219_v58 }
 0xcf3   :  { %5574 = vmatpush1.bf16.msra.mxu0 %v6901_v41  ;;  %5601 = vmatpush3.bf16.msra.mxu1 %v6868_v30 }
 0xcf4   :  { %5576 = vmatprep.subr.bf16.mxu0 %v6905_v16  ;;  %5602 = vmatprep.subr.bf16.mxu1 %v6219_v58 }
 0xcf7   :  { %5578 = vmatpush1.bf16.msra.mxu0 %v6907_v14  ;;  %5604 = vmatpush3.bf16.msra.mxu1 %v6910_v24 }
 0xcf8   :  { %5580 = vmatprep.subr.bf16.mxu0 %v6914_v17  ;;  %5605 = vmatprep.subr.bf16.mxu1 %v6219_v58 }
 0xcfb   :  { %5582 = vmatpush1.bf16.msra.mxu0 %v6917_v60  ;;  %5607 = vmatpush3.bf16.msra.mxu1 %v6919_v26 }
 0xcfc   :  { %5584 = vmatprep.subr.bf16.mxu0 %v6922_v50  ;;  %5608 = vmatprep.subr.bf16.mxu1 %v6219_v58 }
 0xcff   :  { %5586 = vmatpush1.bf16.msra.mxu0 %v6925_v13  ;;  %5610 = vmatpush3.bf16.msra.mxu1 %v6929_v46 }
 0xd00   :  { %5612 = vmatprep.subr.bf16.mxu0 %v6849_v35  ;;  %5643 = vmatprep.subr.bf16.mxu1 %v6219_v58 }
 0xdb5   :  { %v2881_v29 = vpop.f32.mrb[22].mxu0  ;;  %v2952_v48 = vpop.f32.mrb[38].mxu1 }
 0xdb6   :  { %v5801_v39 = vadd.f32 %v2881_v29, %v6983_v21  ;;  %v2883_v1 = vpop.f32.mrb[23].mxu0  ;;  %v4590_v28 = vpop.f32.mrb[39].mxu1  ;;  %v2970_v43 = vadd.f32 %v6994_v53, %v2952_v48 }
 0xdb7   :  { %v5802_v59 = vadd.f32 %v2883_v1, %v6987_v7 }
 0xdb8   :  { %v3701_v61 = vmul.f32 -1.442695, %v5801_v39 }
 0xdb9   :  { %v3702_v6 = vmul.f32 -1.442695, %v5802_v59 }
 0xdba   :  { %5970 = vpow2.f32 %v3701_v61 }
 0xdbb   :  { %5972 = vpow2.f32 %v3702_v6 }
 0xdc4   :  { %v5971_v22 = vpop.eup %5970 }
 0xdc5   :  { %v2960_v2 = vadd.f32 1.0, %v5971_v22  ;;  %v5973_v45 = vpop.eup %5972 }
 0xdc6   :  { %v2967_v42 = vadd.f32 1.0, %v5973_v45 }
 0xdc7   :  { %5974 = vrcp.f32 %v2960_v2 }
 0xdc8   :  { %5976 = vrcp.f32 %v2967_v42 }
 0xdd1   :  { %v5975_v52 = vpop.eup %5974 }
 0xdd2   :  { %v2971_v5 = vmul.f32 %v5975_v52, %v2970_v43  ;;  %v5977_v23 = vpop.eup %5976 }
 0xdd3   :  { %v2974_v10 = vsub.f32 1.0, %v5977_v23  ;;  %v2976_v40 = vmul.f32 %v5977_v23, %v7090_v31 }
 0xdd4   :  { %v2972_v18 = vadd.f32 %v2971_v5, %v6565_v25 }
 0xdd6   :  { %5978 = vtanh.f32 %v2972_v18 }
 0xde0   :  { %v5979_v15 = vpop.eup %5978 }
 0xde1   :  { %v2975_v37 = vmul.f32 %v5979_v15, %v2974_v10 }
 0xde3   :  { %v7135_v49 = vadd.f32 %v2976_v40, %v2975_v37 }
 0xde5   :  { %2979 = vst [vmem:[#allocation16 + $0x18] sm:$0xff] %v7135_v49  ;;  %3049 = vmatmul.mubr.f32.vlgmr.msra.gmra.mrb[24].mxu0 %v7135_v49  ;;  %4624 = vmatmul.mubr.f32.vlgmr.msra.gmra.mrb[40].mxu1 %v7135_v49 }
 0xde6   :  { %5614 = vmatpush1.bf16.msra.mxu0 %v6877_v4  ;;  %5645 = vmatpush3.bf16.msra.mxu1 %v6851_v51 }
 0xde7   :  { %5616 = vmatprep.subr.bf16.mxu0 %v6879_v55  ;;  %5646 = vmatprep.subr.bf16.mxu1 %v6219_v58 }
 0xde8   :  { %3217 = vmatprep.mubr.f32.mxu0 %v6218_v0  ;;  %4658 = vmatprep.mubr.msk.f32.mxu1 %vm6220_vm0, %v6218_v0 }
 0xdea   :  { %5618 = vmatpush1.bf16.msra.mxu0 %v6882_v11  ;;  %5648 = vmatpush3.bf16.msra.mxu1 %v6856_v62 }
 0xdeb   :  { %5620 = vmatprep.subr.bf16.mxu0 %v6886_v32  ;;  %5649 = vmatprep.subr.bf16.mxu1 %v6219_v58 }
 0xdee   :  { %5622 = vmatpush1.bf16.msra.mxu0 %v6889_v57  ;;  %5651 = vmatpush3.bf16.msra.mxu1 %v6860_v9 }
 0xdef   :  { %5624 = vmatprep.subr.bf16.mxu0 %v6892_v63  ;;  %5652 = vmatprep.subr.bf16.mxu1 %v6219_v58 }
 0xdf2   :  { %5626 = vmatpush1.bf16.msra.mxu0 %v6895_v27  ;;  %5654 = vmatpush3.bf16.msra.mxu1 %v6864_v19 }
 0xdf3   :  { %5628 = vmatprep.subr.bf16.mxu0 %v6898_v33  ;;  %5655 = vmatprep.subr.bf16.mxu1 %v6219_v58 }
 0xdf6   :  { %5630 = vmatpush1.bf16.msra.mxu0 %v6901_v41  ;;  %5657 = vmatpush3.bf16.msra.mxu1 %v6868_v30 }
 0xdf7   :  { %5632 = vmatprep.subr.bf16.mxu0 %v6905_v16  ;;  %5658 = vmatprep.subr.bf16.mxu1 %v6219_v58 }
 0xdfa   :  { %5634 = vmatpush1.bf16.msra.mxu0 %v6907_v14  ;;  %5660 = vmatpush3.bf16.msra.mxu1 %v6910_v24 }
 0xdfb   :  { %5636 = vmatprep.subr.bf16.mxu0 %v6914_v17  ;;  %5661 = vmatprep.subr.bf16.mxu1 %v6219_v58 }
 0xdfe   :  { %5638 = vmatpush1.bf16.msra.mxu0 %v6917_v60  ;;  %5663 = vmatpush3.bf16.msra.mxu1 %v6919_v26 }
 0xdff   :  { %5640 = vmatprep.subr.bf16.mxu0 %v6922_v50  ;;  %5664 = vmatprep.subr.bf16.mxu1 %v6219_v58 }
 0xe02   :  { %5642 = vmatpush1.bf16.msra.mxu0 %v6925_v13  ;;  %5666 = vmatpush3.bf16.msra.mxu1 %v6929_v46 }
 0xe03   :  { %5668 = vmatprep.subr.bf16.mxu0 %v6849_v35  ;;  %5699 = vmatprep.subr.bf16.mxu1 %v6219_v58 }
 0xeb8   :  { %v3050_v25 = vpop.f32.mrb[24].mxu0  ;;  %v3121_v12 = vpop.f32.mrb[40].mxu1 }
 0xeb9   :  { %v5803_v8 = vadd.f32 %v3050_v25, %v6983_v21  ;;  %v3052_v3 = vpop.f32.mrb[25].mxu0  ;;  %v4625_v20 = vpop.f32.mrb[41].mxu1  ;;  %v3139_v1 = vadd.f32 %v6994_v53, %v3121_v12 }
 0xeba   :  { %v5804_v36 = vadd.f32 %v3052_v3, %v6987_v7 }
 0xebb   :  { %v3703_v56 = vmul.f32 -1.442695, %v5803_v8 }
 0xebc   :  { %v3704_v54 = vmul.f32 -1.442695, %v5804_v36 }
 0xebd   :  { %5980 = vpow2.f32 %v3703_v56 }
 0xebe   :  { %5982 = vpow2.f32 %v3704_v54 }
 0xec7   :  { %v5981_v31 = vpop.eup %5980 }
 0xec8   :  { %v3129_v29 = vadd.f32 1.0, %v5981_v31  ;;  %v5983_v48 = vpop.eup %5982 }
 0xec9   :  { %v3136_v39 = vadd.f32 1.0, %v5983_v48 }
 0xeca   :  { %5984 = vrcp.f32 %v3129_v29 }
 0xecb   :  { %5986 = vrcp.f32 %v3136_v39 }
 0xed4   :  { %v5985_v28 = vpop.eup %5984 }
 0xed5   :  { %v3140_v61 = vmul.f32 %v5985_v28, %v3139_v1  ;;  %v5987_v6 = vpop.eup %5986 }
 0xed6   :  { %v3143_v22 = vsub.f32 1.0, %v5987_v6  ;;  %v3145_v42 = vmul.f32 %v5987_v6, %v7135_v49 }
 0xed7   :  { %v3141_v59 = vadd.f32 %v3140_v61, %v6574_v38 }
 0xed9   :  { %5988 = vtanh.f32 %v3141_v59 }
 0xee3   :  { %v5989_v2 = vpop.eup %5988 }
 0xee4   :  { %v3144_v45 = vmul.f32 %v5989_v2, %v3143_v22 }
 0xee6   :  { %v7180_v43 = vadd.f32 %v3145_v42, %v3144_v45 }
 0xee8   :  { %3148 = vst [vmem:[#allocation16 + $0x20] sm:$0xff] %v7180_v43  ;;  %3218 = vmatmul.mubr.f32.vlgmr.msra.gmra.mrb[26].mxu0 %v7180_v43  ;;  %4659 = vmatmul.mubr.f32.vlgmr.msra.gmra.mrb[42].mxu1 %v7180_v43 }
 0xee9   :  { %5670 = vmatpush1.bf16.msra.mxu0 %v6877_v4  ;;  %5701 = vmatpush3.bf16.msra.mxu1 %v6851_v51 }
 0xeea   :  { %5672 = vmatprep.subr.bf16.mxu0 %v6879_v55  ;;  %5702 = vmatprep.subr.bf16.mxu1 %v6219_v58 }
 0xeeb   :  { %3386 = vmatprep.mubr.f32.mxu0 %v6218_v0  ;;  %4693 = vmatprep.mubr.msk.f32.mxu1 %vm6220_vm0, %v6218_v0 }
 0xeed   :  { %5674 = vmatpush1.bf16.msra.mxu0 %v6882_v11  ;;  %5704 = vmatpush3.bf16.msra.mxu1 %v6856_v62 }
 0xeee   :  { %5676 = vmatprep.subr.bf16.mxu0 %v6886_v32  ;;  %5705 = vmatprep.subr.bf16.mxu1 %v6219_v58 }
 0xef1   :  { %5678 = vmatpush1.bf16.msra.mxu0 %v6889_v57  ;;  %5707 = vmatpush3.bf16.msra.mxu1 %v6860_v9 }
 0xef2   :  { %5680 = vmatprep.subr.bf16.mxu0 %v6892_v63  ;;  %5708 = vmatprep.subr.bf16.mxu1 %v6219_v58 }
 0xef5   :  { %5682 = vmatpush1.bf16.msra.mxu0 %v6895_v27  ;;  %5710 = vmatpush3.bf16.msra.mxu1 %v6864_v19 }
 0xef6   :  { %5684 = vmatprep.subr.bf16.mxu0 %v6898_v33  ;;  %5711 = vmatprep.subr.bf16.mxu1 %v6219_v58 }
 0xef9   :  { %5686 = vmatpush1.bf16.msra.mxu0 %v6901_v41  ;;  %5713 = vmatpush3.bf16.msra.mxu1 %v6868_v30 }
 0xefa   :  { %5688 = vmatprep.subr.bf16.mxu0 %v6905_v16  ;;  %5714 = vmatprep.subr.bf16.mxu1 %v6219_v58 }
 0xefd   :  { %5690 = vmatpush1.bf16.msra.mxu0 %v6907_v14  ;;  %5716 = vmatpush3.bf16.msra.mxu1 %v6910_v24 }
 0xefe   :  { %5692 = vmatprep.subr.bf16.mxu0 %v6914_v17  ;;  %5717 = vmatprep.subr.bf16.mxu1 %v6219_v58 }
 0xf01   :  { %5694 = vmatpush1.bf16.msra.mxu0 %v6917_v60  ;;  %5719 = vmatpush3.bf16.msra.mxu1 %v6919_v26 }
 0xf02   :  { %5696 = vmatprep.subr.bf16.mxu0 %v6922_v50  ;;  %5720 = vmatprep.subr.bf16.mxu1 %v6219_v58 }
 0xf05   :  { %5698 = vmatpush1.bf16.msra.mxu0 %v6925_v13  ;;  %5722 = vmatpush3.bf16.msra.mxu1 %v6929_v46 }
 0xf06   :  { %5724 = vmatprep.subr.bf16.mxu0 %v6849_v35  ;;  %5755 = vmatprep.subr.bf16.mxu1 %v6219_v58 }
 0xfbb   :  { %v3219_v38 = vpop.f32.mrb[26].mxu0  ;;  %v3290_v52 = vpop.f32.mrb[42].mxu1 }
 0xfbc   :  { %v5805_v5 = vadd.f32 %v3219_v38, %v6983_v21  ;;  %v3221_v18 = vpop.f32.mrb[27].mxu0  ;;  %v4660_v23 = vpop.f32.mrb[43].mxu1  ;;  %v3308_v35 = vadd.f32 %v6994_v53, %v3290_v52 }
 0xfbd   :  { %v5806_v15 = vadd.f32 %v3221_v18, %v6987_v7 }
 0xfbe   :  { %v3705_v10 = vmul.f32 -1.442695, %v5805_v5 }
 0xfbf   :  { %v3706_v37 = vmul.f32 -1.442695, %v5806_v15 }
 0xfc0   :  { %5990 = vpow2.f32 %v3705_v10 }
 0xfc1   :  { %5992 = vpow2.f32 %v3706_v37 }
 0xfca   :  { %v5991_v40 = vpop.eup %5990 }
 0xfcb   :  { %v3298_v49 = vadd.f32 1.0, %v5991_v40  ;;  %v5993_v25 = vpop.eup %5992 }
 0xfcc   :  { %v3305_v12 = vadd.f32 1.0, %v5993_v25 }
 0xfcd   :  { %5994 = vrcp.f32 %v3298_v49 }
 0xfce   :  { %5996 = vrcp.f32 %v3305_v12 }
 0xfd7   :  { %v5995_v8 = vpop.eup %5994 }
 0xfd8   :  { %v3309_v3 = vmul.f32 %v5995_v8, %v3308_v35  ;;  %v5997_v56 = vpop.eup %5996 }
 0xfd9   :  { %v3312_v36 = vsub.f32 1.0, %v5997_v56  ;;  %v3314_v29 = vmul.f32 %v5997_v56, %v7180_v43 }
 0xfda   :  { %v3310_v20 = vadd.f32 %v3309_v3, %v6571_v34 }
 0xfdc   :  { %5998 = vtanh.f32 %v3310_v20 }
 0xfe6   :  { %v5999_v54 = vpop.eup %5998 }
 0xfe7   :  { %v3313_v31 = vmul.f32 %v5999_v54, %v3312_v36 }
 0xfe9   :  { %v3315_v48 = vadd.f32 %v3314_v29, %v3313_v31 }
 0xfeb   :  { %3317 = vst [vmem:[#allocation16 + $0x28] sm:$0xff] %v3315_v48  ;;  %3387 = vmatmul.mubr.f32.vlgmr.msra.gmra.mrb[28].mxu0 %v3315_v48  ;;  %4694 = vmatmul.mubr.f32.vlgmr.msra.gmra.mrb[44].mxu1 %v3315_v48 }
 0xfec   :  { %5726 = vmatpush1.bf16.msra.mxu0 %v6877_v4  ;;  %5757 = vmatpush3.bf16.msra.mxu1 %v6851_v51 }
 0xfed   :  { %5728 = vmatprep.subr.bf16.mxu0 %v6879_v55  ;;  %5758 = vmatprep.subr.bf16.mxu1 %v6219_v58 }
 0xfee   :  { %3555 = vmatprep.mubr.f32.mxu0 %v6218_v0  ;;  %4728 = vmatprep.mubr.msk.f32.mxu1 %vm6220_vm0, %v6218_v0 }
 0xff0   :  { %5730 = vmatpush1.bf16.msra.mxu0 %v6882_v11  ;;  %5760 = vmatpush3.bf16.msra.mxu1 %v6856_v62 }
 0xff1   :  { %5732 = vmatprep.subr.bf16.mxu0 %v6886_v32  ;;  %5761 = vmatprep.subr.bf16.mxu1 %v6219_v58 }
 0xff4   :  { %5734 = vmatpush1.bf16.msra.mxu0 %v6889_v57  ;;  %5763 = vmatpush3.bf16.msra.mxu1 %v6860_v9 }
 0xff5   :  { %5736 = vmatprep.subr.bf16.mxu0 %v6892_v63  ;;  %5764 = vmatprep.subr.bf16.mxu1 %v6219_v58 }
 0xff8   :  { %5738 = vmatpush1.bf16.msra.mxu0 %v6895_v27  ;;  %5766 = vmatpush3.bf16.msra.mxu1 %v6864_v19 }
 0xff9   :  { %5740 = vmatprep.subr.bf16.mxu0 %v6898_v33  ;;  %5767 = vmatprep.subr.bf16.mxu1 %v6219_v58 }
 0xffc   :  { %5742 = vmatpush1.bf16.msra.mxu0 %v6901_v41  ;;  %5769 = vmatpush3.bf16.msra.mxu1 %v6868_v30 }
 0xffd   :  { %5744 = vmatprep.subr.bf16.mxu0 %v6905_v16  ;;  %5770 = vmatprep.subr.bf16.mxu1 %v6219_v58 }
0x1000   :  { %5746 = vmatpush1.bf16.msra.mxu0 %v6907_v14  ;;  %5772 = vmatpush3.bf16.msra.mxu1 %v6910_v24 }
0x1001   :  { %5748 = vmatprep.subr.bf16.mxu0 %v6914_v17  ;;  %5773 = vmatprep.subr.bf16.mxu1 %v6219_v58 }
0x1004   :  { %5750 = vmatpush1.bf16.msra.mxu0 %v6917_v60  ;;  %5775 = vmatpush3.bf16.msra.mxu1 %v6919_v26 }
0x1005   :  { %5752 = vmatprep.subr.bf16.mxu0 %v6922_v50  ;;  %5776 = vmatprep.subr.bf16.mxu1 %v6219_v58 }
0x1008   :  { %5754 = vmatpush1.bf16.msra.mxu0 %v6925_v13  ;;  %5778 = vmatpush3.bf16.msra.mxu1 %v6929_v46 }
0x10be   :  { %v3388_v0 = vpop.f32.mrb[28].mxu0  ;;  %v3459_v34 = vpop.f32.mrb[44].mxu1 }
0x10bf   :  { %v5807_v51 = vadd.f32 %v3388_v0, %v6983_v21  ;;  %v3390_v62 = vpop.f32.mrb[29].mxu0  ;;  %v4695_v9 = vpop.f32.mrb[45].mxu1  ;;  %v3477_v57 = vadd.f32 %v6994_v53, %v3459_v34 }
0x10c0   :  { %v5808_v30 = vadd.f32 %v3390_v62, %v6987_v7 }
0x10c1   :  { %v3707_v19 = vmul.f32 -1.442695, %v5807_v51 }
0x10c2   :  { %v3708_v4 = vmul.f32 -1.442695, %v5808_v30 }
0x10c3   :  { %6000 = vpow2.f32 %v3707_v19 }
0x10c4   :  { %6002 = vpow2.f32 %v3708_v4 }
0x10cd   :  { %v6001_v55 = vpop.eup %6000 }
0x10ce   :  { %v3467_v11 = vadd.f32 1.0, %v6001_v55  ;;  %v6003_v58 = vpop.eup %6002 }
0x10cf   :  { %v3474_v32 = vadd.f32 1.0, %v6003_v58 }
0x10d0   :  { %6004 = vrcp.f32 %v3467_v11 }
0x10d1   :  { %6006 = vrcp.f32 %v3474_v32 }
0x10da   :  { %v6005_v63 = vpop.eup %6004 }
0x10db   :  { %v3478_v27 = vmul.f32 %v6005_v63, %v3477_v57  ;;  %v6007_v41 = vpop.eup %6006 }
0x10dc   :  { %v3481_v16 = vsub.f32 1.0, %v6007_v41  ;;  %v3483_v17 = vmul.f32 %v6007_v41, %v3315_v48 }
0x10dd   :  { %v3479_v33 = vadd.f32 %v3478_v27, %v6580_v47 }
0x10df   :  { %6008 = vtanh.f32 %v3479_v33 }
0x10e9   :  { %v6009_v14 = vpop.eup %6008 }
0x10ea   :  { %v3482_v24 = vmul.f32 %v6009_v14, %v3481_v16 }
0x10ec   :  { %v3484_v60 = vadd.f32 %v3483_v17, %v3482_v24 }
0x10ee   :  { %3486 = vst [vmem:[#allocation16 + $0x30] sm:$0xff] %v3484_v60  ;;  %3556 = vmatmul.mubr.f32.vlgmr.msra.gmra.mrb[30].mxu0 %v3484_v60  ;;  %4729 = vmatmul.mubr.f32.vlgmr.msra.gmra.mrb[46].mxu1 %v3484_v60 }
0x11c1   :  { %v3557_v26 = vpop.f32.mrb[30].mxu0  ;;  %v3628_v50 = vpop.f32.mrb[46].mxu1 }
0x11c2   :  { %v5809_v13 = vadd.f32 %v3557_v26, %v6983_v21  ;;  %v3559_v46 = vpop.f32.mrb[31].mxu0  ;;  %v4730_v39 = vpop.f32.mrb[47].mxu1  ;;  %v3646_v2 = vadd.f32 %v6994_v53, %v3628_v50 }
0x11c3   :  { %v5810_v28 = vadd.f32 %v3559_v46, %v6987_v7 }
0x11c4   :  { %v3709_v1 = vmul.f32 -1.442695, %v5809_v13 }
0x11c5   :  { %v3710_v47 = vmul.f32 -1.442695, %v5810_v28 }
0x11c6   :  { %6010 = vpow2.f32 %v3709_v1 }
0x11c7   :  { %6012 = vpow2.f32 %v3710_v47 }
0x11d0   :  { %v6011_v61 = vpop.eup %6010 }
0x11d1   :  { %v3636_v59 = vadd.f32 1.0, %v6011_v61  ;;  %v6013_v6 = vpop.eup %6012 }
0x11d2   :  { %v3643_v22 = vadd.f32 1.0, %v6013_v6 }
0x11d3   :  { %6014 = vrcp.f32 %v3636_v59 }
0x11d4   :  { %6016 = vrcp.f32 %v3643_v22 }
0x11dd   :  { %v6015_v45 = vpop.eup %6014 }
0x11de   :  { %v3647_v42 = vmul.f32 %v6015_v45, %v3646_v2  ;;  %v6017_v43 = vpop.eup %6016 }
0x11df   :  { %v3650_v38 = vsub.f32 1.0, %v6017_v43  ;;  %v3652_v5 = vmul.f32 %v6017_v43, %v3484_v60 }
0x11e0   :  { %v3648_v21 = vadd.f32 %v3647_v42, %v6577_v44 }
0x11e2   :  { %6018 = vtanh.f32 %v3648_v21 }
0x11ec   :  { %v6019_v52 = vpop.eup %6018 }
0x11ed   :  { %v3651_v7 = vmul.f32 %v6019_v52, %v3650_v38 }
0x11ef   :  { %v3653_v18 = vadd.f32 %v3652_v5, %v3651_v7 }
0x11f1   :  { %3655 = vst [vmem:[#allocation16 + $0x38] sm:$0xff] %v3653_v18 }
0x11f2   :  { %6186 = shalt.err (!%p6183_p4)
}
0x11f3   :  { %s6187_s1 = scalar_lea.hbm %s7293_s12, 1024 }
0x11f4   :  { %p6188_p5 = scmp.ne.s32.totalorder %s7293_s12, %s6187_s1  ;;  %p6191_p6 = scmp.lt.u32.totalorder %s6187_s1, %s7293_s12 }
0x11f6   :  { %p6193_p7 = pnand %p6191_p6, %p6188_p5 }
0x11f8   :  { %6196 = shalt.err (!%p6193_p7)
}
0x11f9   :  { %3667 = dma.vmem_to_hbm [thread:$0]  %s3662_s18, 1024, %s7293_s12, [#allocation6], %s6208_s13, %s6208_s13, %s6209_s14  }
0x11fa   :  { %6205 = dma.done.wait [#allocation6], 1024  }
0x11fb   :  { %6206 = vsyncadd [#allocation6], 4294966272 }
0x11fc   :  { %3671 = vsyncpa [#allocation5], 1 }
0x11fd   :  { %3672 = vsyncpa [#allocation8], 1 }
0x11fe   :  { %3673 = vsyncpa [#allocation11], 1 }
0x11ff   :  { %3674 = vsyncpa [#allocation14], 1 }
0x1200   :  { %3675 = vsyncpa [#allocation6], 1 }

</bundles_post_ra>
